<compile_context>
chip_gen: v7x
topology: tpu7x:2x2x1
jax: 0.10.0
libtpu: 0.0.40
codegen_flags: <defaults>
</compile_context>

<pallas_src>
import jax
import jax.numpy as jnp
from jax.experimental import pallas as pl
from jax.experimental.pallas import tpu as pltpu


# =============================================================================
# Kernel 1: ConvTranspose2d(in_ch, out_ch, kernel=2, stride=2)
#
# Each input pixel maps to a disjoint 2x2 output patch, so the whole op is a
# single (H2*W2, Cin) @ (Cin, 4*Cu) matmul per batch element.  The 2x2 scatter
# is folded into the kernel: rows are interleaved in-kernel (per-row stores),
# columns are packed into the lane dim as (kw, c), so the wrapper only needs a
# free row-major reshape (no HBM transpose pass) to get the NHWC upsample.
# =============================================================================
def _upconv2x2_kernel(x_ref, w_ref, b_ref, o_ref):
    # x_ref: (1, H2, W2, Cin) bf16
    # w_ref: (Cin, 4*Cu)      bf16, columns ordered (kh, kw, cout)
    # b_ref: (1, 4*Cu)        f32
    # o_ref: (1, 2*H2, W2, 2*Cu) bf16 with
    #        o[0, 2*i + kh, j, kw*Cu + c] = up(x)[2*i + kh, 2*j + kw, c]
    _, H2, W2, Cin = x_ref.shape
    Cu2 = o_ref.shape[-1]                       # 2 * Cu

    xf = x_ref[0].reshape(H2 * W2, Cin)
    y = jnp.dot(xf, w_ref[...], preferred_element_type=jnp.float32) + b_ref[...]
    y = y.astype(o_ref.dtype)                   # (H2*W2, 4*Cu), cols (kh, kw, c)

    # Row interleave in-kernel: output row 2*i+kh gets the (W2, 2*Cu) slab for
    # source row i and kernel-row kh.  (For large H2 this static unroll should
    # become a fori_loop / spatial grid axis; trivial at demo sizes.)
    for kh in range(2):
        ya = y[:, kh * Cu2:(kh + 1) * Cu2]      # (H2*W2, 2*Cu), cols (kw, c)
        for i in range(H2):
            o_ref[0, 2 * i + kh, :, :] = ya[i * W2:(i + 1) * W2, :]


def conv_transpose_2x2_s2(x_nhwc, w, b):
    # x_nhwc: (B, H2, W2, Cin) bf16; w: torch layout (Cin, Cout, 2, 2); b: (Cout,)
    B, H2, W2, Cin = x_nhwc.shape
    Cu = w.shape[1]
    # (Cin, Cout, kh, kw) -> (Cin, kh, kw, Cout) -> (Cin, 4*Cu), cols (kh, kw, c)
    w2 = jnp.transpose(w, (0, 2, 3, 1)).reshape(Cin, 4 * Cu).astype(jnp.bfloat16)
    b2 = jnp.tile(b, (4,)).reshape(1, 4 * Cu).astype(jnp.float32)

    out = pl.pallas_call(
        _upconv2x2_kernel,
        out_shape=jax.ShapeDtypeStruct((B, 2 * H2, W2, 2 * Cu), jnp.bfloat16),
        grid=(B,),
        in_specs=[
            pl.BlockSpec((1, H2, W2, Cin), lambda i: (i, 0, 0, 0)),
            pl.BlockSpec((Cin, 4 * Cu), lambda i: (0, 0)),
            pl.BlockSpec((1, 4 * Cu), lambda i: (0, 0)),
        ],
        out_specs=pl.BlockSpec((1, 2 * H2, W2, 2 * Cu), lambda i: (i, 0, 0, 0)),
        compiler_params=pltpu.CompilerParams(dimension_semantics=("parallel",)),
    )(x_nhwc, w2, b2)

    # Layout-preserving (free) reshape: (B, 2H2, W2, 2*Cu) -> (B, 2H2, 2W2, Cu)
    return out.reshape(B, 2 * H2, 2 * W2, Cu)


# =============================================================================
# Kernel 2/3: fused [optional channel-concat] + zero-pad halo + Conv3x3(pad=1)
#             + BatchNorm(eval, folded) + ReLU.
#
# The inputs are copied (at per-input spatial offsets, which also implements
# the module's F.pad placement) into a zeroed (H+2, W+2, Ctot) VMEM scratch.
# The conv is computed as 9 (H*W, Ctot) @ (Ctot, Cout) matmuls accumulated in
# f32; the dx shift uses 3 precomputed slabs, the dy shift is a free aligned
# row-offset into the flattened slab.
# =============================================================================
def _make_conv3x3_kernel(n_in, spatial_offsets):
    # spatial_offsets: per input, (row_off, col_off) of its top-left corner
    # inside the (H, W) output frame (zeros elsewhere == F.pad with zeros).
    def kernel(*args):
        x_refs = args[:n_in]
        w_ref, s_ref, b_ref = args[n_in:n_in + 3]
        o_ref = args[n_in + 3]
        xpad_ref = args[n_in + 4]

        Hp, Wp, Ctot = xpad_ref.shape
        H, W = Hp - 2, Wp - 2
        Cout = o_ref.shape[-1]

        # Build the zero-padded, channel-concatenated input tile in VMEM
        # (replaces HBM-level jnp.pad + jnp.concatenate).
        xpad_ref[...] = jnp.zeros_like(xpad_ref)
        c0 = 0
        for xr, (ro, co) in zip(x_refs, spatial_offsets):
            _, h, ww, c = xr.shape
            xpad_ref[1 + ro:1 + ro + h, 1 + co:1 + co + ww, c0:c0 + c] = (
                xr[0].astype(xpad_ref.dtype))
            c0 += c

        # 9-tap conv: 3 dx-shifted slabs, each reused for the 3 dy taps via
        # aligned contiguous row slices of the flattened slab.
        acc = jnp.zeros((H * W, Cout), jnp.float32)
        for dx in range(3):
            slab = xpad_ref[:, dx:dx + W, :].reshape(Hp * W, Ctot)
            for dy in range(3):
                patch = slab[dy * W:(dy + H) * W, :]
                wk = w_ref[(dy * 3 + dx) * Ctot:(dy * 3 + dx + 1) * Ctot, :]
                acc = acc + jnp.dot(patch, wk,
                                    preferred_element_type=jnp.float32)

        y = jnp.maximum(acc * s_ref[...] + b_ref[...], 0.0)   # folded BN + ReLU
        o_ref[0] = y.reshape(H, W, Cout).astype(o_ref.dtype)

    return kernel


def conv3x3_bn_relu(inputs, out_hw, w, b_conv, gamma, beta, mean, var,
                    eps=1e-5, out_dtype=jnp.float32):
    # inputs: list of (x_nhwc, row_off, col_off); channel-concatenated
    #         in-kernel in the given order (must match w's in-channel order).
    # w: torch layout (Cout, Ctot, 3, 3).
    H, W = out_hw
    xs = [x for x, _, _ in inputs]
    B = xs[0].shape[0]
    Ctot = sum(x.shape[-1] for x in xs)
    Cout = w.shape[0]

    # Fold BN (eval mode) + conv bias into per-channel scale / bias.
    scale = (gamma / jnp.sqrt(var + eps)).astype(jnp.float32)
    bias = ((b_conv - mean) * scale + beta).astype(jnp.float32)
    # (Cout, Ctot, kh, kw) -> (kh, kw, Ctot, Cout) -> (9*Ctot, Cout)
    w2 = jnp.transpose(w, (2, 3, 1, 0)).reshape(9 * Ctot, Cout).astype(jnp.bfloat16)

    kernel = _make_conv3x3_kernel(
        n_in=len(inputs),
        spatial_offsets=[(ro, co) for _, ro, co in inputs])

    in_specs = [pl.BlockSpec((1,) + x.shape[1:], lambda i: (i, 0, 0, 0))
                for x in xs]
    in_specs += [
        pl.BlockSpec((9 * Ctot, Cout), lambda i: (0, 0)),
        pl.BlockSpec((1, Cout), lambda i: (0, 0)),
        pl.BlockSpec((1, Cout), lambda i: (0, 0)),
    ]

    return pl.pallas_call(
        kernel,
        out_shape=jax.ShapeDtypeStruct((B, H, W, Cout), out_dtype),
        grid=(B,),
        in_specs=in_specs,
        out_specs=pl.BlockSpec((1, H, W, Cout), lambda i: (i, 0, 0, 0)),
        scratch_shapes=[pltpu.VMEM((H + 2, W + 2, Ctot), jnp.bfloat16)],
        compiler_params=pltpu.CompilerParams(dimension_semantics=("parallel",)),
    )(*xs, w2, scale.reshape(1, Cout), bias.reshape(1, Cout))


# =============================================================================
# Full Up.forward
# =============================================================================
def up_forward(x1_nchw, x2_nchw, p):
    # NCHW -> NHWC (channels last = lane dim), bf16 activations for the MXU.
    x1 = jnp.transpose(x1_nchw, (0, 2, 3, 1)).astype(jnp.bfloat16)
    x2 = jnp.transpose(x2_nchw, (0, 2, 3, 1)).astype(jnp.bfloat16)

    B, H2, W2, _ = x2.shape
    _, H1, W1, _ = x1.shape
    Cu = p["up_w"].shape[1]

    # self.up(x2): ConvTranspose2d(k=2, s=2)  (scatter folded into the kernel)
    xu = conv_transpose_2x2_s2(x2, p["up_w"], p["up_b"])   # (B, 2H2, 2W2, Cu)

    # F.pad placement offsets (realized inside the first conv's halo scratch —
    # no HBM pad) + torch.cat([x2_up, x1], dim=1) realized as the in-kernel
    # channel-concat order [xu, x1] matching c1_w's in-channel layout.
    diffY = H1 - 2 * H2
    diffX = W1 - 2 * W2
    pad_t, pad_l = diffY // 2, diffX // 2

    y1 = conv3x3_bn_relu(
        inputs=[(xu, pad_t, pad_l), (x1, 0, 0)],
        out_hw=(H1, W1),
        w=p["c1_w"], b_conv=p["c1_b"],
        gamma=p["bn1_g"], beta=p["bn1_b"], mean=p["bn1_m"], var=p["bn1_v"],
        out_dtype=jnp.bfloat16)

    y2 = conv3x3_bn_relu(
        inputs=[(y1, 0, 0)],
        out_hw=(H1, W1),
        w=p["c2_w"], b_conv=p["c2_b"],
        gamma=p["bn2_g"], beta=p["bn2_b"], mean=p["bn2_m"], var=p["bn2_v"],
        out_dtype=jnp.float32)

    return jnp.transpose(y2, (0, 3, 1, 2))  # back to NCHW


def make_params(key, in_ch, out_ch):
    ks = jax.random.split(key, 8)
    f32 = jnp.float32
    return {
        # ConvTranspose2d(in_ch, out_ch, 2, stride=2): weight (in_ch, out_ch, 2, 2)
        "up_w": 0.1 * jax.random.normal(ks[0], (in_ch, out_ch, 2, 2), f32),
        "up_b": 0.05 * jax.random.normal(ks[1], (out_ch,), f32),
        # Conv2d(in_ch, out_ch, 3, padding=1)
        "c1_w": 0.1 * jax.random.normal(ks[2], (out_ch, in_ch, 3, 3), f32),
        "c1_b": 0.05 * jax.random.normal(ks[3], (out_ch,), f32),
        "bn1_g": jnp.ones((out_ch,), f32),
        "bn1_b": jnp.zeros((out_ch,), f32),
        "bn1_m": 0.01 * jnp.arange(out_ch, dtype=f32),
        "bn1_v": jnp.ones((out_ch,), f32) + 0.1 * jnp.arange(out_ch, dtype=f32),
        # Conv2d(out_ch, out_ch, 3, padding=1)
        "c2_w": 0.1 * jax.random.normal(ks[4], (out_ch, out_ch, 3, 3), f32),
        "c2_b": 0.05 * jax.random.normal(ks[5], (out_ch,), f32),
        "bn2_g": jnp.ones((out_ch,), f32),
        "bn2_b": jnp.zeros((out_ch,), f32),
        "bn2_m": 0.01 * jnp.arange(out_ch, dtype=f32),
        "bn2_v": jnp.ones((out_ch,), f32) + 0.1 * jnp.arange(out_ch, dtype=f32),
    }


if __name__ == "__main__":
    in_ch, out_ch = 8, 4
    B, H, W = 2, 16, 16

    key = jax.random.PRNGKey(0)
    k1, k2, kp = jax.random.split(key, 3)

    # x1: skip connection (B, in_ch - out_ch, H, W); x2: coarse (B, in_ch, H/2, W/2)
    x1 = jax.random.normal(k1, (B, in_ch - out_ch, H, W), jnp.float32)
    x2 = jax.random.normal(k2, (B, in_ch, H // 2, W // 2), jnp.float32)
    params = make_params(kp, in_ch, out_ch)

    up_fwd = jax.jit(up_forward)
    out = up_fwd(x1, x2, params)
    out = jax.block_until_ready(out)

    assert out.shape == (B, out_ch, H, W)
    assert bool(jnp.all(out >= 0.0))  # final ReLU
    print("KERNEL_OK")
</pallas_src>

<mosaic_0001>
module attributes {stable_mosaic.version = 11 : i64} {
  func.func @_upconv2x2_kernel(%arg0: i32, %arg1: memref<1x8x8x8xbf16, #tpu.memory_space<vmem>>, %arg2: memref<8x16xbf16, #tpu.memory_space<vmem>>, %arg3: memref<1x16xf32, #tpu.memory_space<vmem>>, %arg4: memref<1x16x8x8xbf16, #tpu.memory_space<vmem>>) attributes {dimension_semantics = [#tpu.dimension_semantics<parallel>], iteration_bounds = array<i64: 2>, scalar_prefetch = 0 : i64, scratch_operands = 0 : i64, tpu.core_type = #tpu.core_type<tc>, window_params = [{transform_indices = @transform_0, window_bounds = array<i64: 1, 8, 8, 8>}, {pipeline_mode = #tpu.pipeline_mode<synchronous>, transform_indices = @transform_1, window_bounds = array<i64: 8, 16>}, {pipeline_mode = #tpu.pipeline_mode<synchronous>, transform_indices = @transform_2, window_bounds = array<i64: 1, 16>}, {transform_indices = @transform_3, window_bounds = array<i64: 1, 16, 8, 8>}]} {
    %c0 = arith.constant 0 : index
    %c0_0 = arith.constant 0 : index
    %c0_1 = arith.constant 0 : index
    %c0_2 = arith.constant 0 : index
    %0 = vector.load %arg1[%c0, %c0_0, %c0_1, %c0_2] : memref<1x8x8x8xbf16, #tpu.memory_space<vmem>>, vector<1x8x8x8xbf16>
    %1 = vector.shape_cast %0 : vector<1x8x8x8xbf16> to vector<8x8x8xbf16>
    %2 = vector.shape_cast %1 : vector<8x8x8xbf16> to vector<64x8xbf16>
    %c0_3 = arith.constant 0 : index
    %c0_4 = arith.constant 0 : index
    %3 = vector.load %arg2[%c0_3, %c0_4] : memref<8x16xbf16, #tpu.memory_space<vmem>>, vector<8x16xbf16>
    %cst = arith.constant dense<0.000000e+00> : vector<64x16xf32>
    %4 = tpu.matmul %2, %3, %cst {dimension_numbers = #tpu.dot_dimension_numbers<[1], [0], [0], [1], [0, 0, 1, 1], [], []>} : vector<64x8xbf16>, vector<8x16xbf16>, vector<64x16xf32> -> vector<64x16xf32>
    %c0_5 = arith.constant 0 : index
    %c0_6 = arith.constant 0 : index
    %5 = vector.load %arg3[%c0_5, %c0_6] : memref<1x16xf32, #tpu.memory_space<vmem>>, vector<1x16xf32>
    %6 = vector.broadcast %5 : vector<1x16xf32> to vector<64x16xf32>
    %7 = arith.addf %4, %6 : vector<64x16xf32>
    %8 = arith.truncf %7 : vector<64x16xf32> to vector<64x16xbf16>
    %9 = vector.extract_strided_slice %8 {offsets = [0, 0], sizes = [64, 8], strides = [1, 1]} : vector<64x16xbf16> to vector<64x8xbf16>
    %10 = vector.extract_strided_slice %9 {offsets = [0, 0], sizes = [8, 8], strides = [1, 1]} : vector<64x8xbf16> to vector<8x8xbf16>
    %c0_7 = arith.constant 0 : index
    %c0_8 = arith.constant 0 : index
    %c0_9 = arith.constant 0 : index
    %c0_10 = arith.constant 0 : index
    %11 = vector.load %arg4[%c0_7, %c0_8, %c0_9, %c0_10] : memref<1x16x8x8xbf16, #tpu.memory_space<vmem>>, vector<1x1x8x8xbf16>
    %12 = vector.shape_cast %11 : vector<1x1x8x8xbf16> to vector<8x8xbf16>
    %13 = vector.shape_cast %10 : vector<8x8xbf16> to vector<1x1x8x8xbf16>
    tpu.vector_store %arg4[%c0_7, %c0_8, %c0_9, %c0_10], %13 {strides = array<i32>} : memref<1x16x8x8xbf16, #tpu.memory_space<vmem>>, vector<1x1x8x8xbf16>,
    %14 = vector.extract_strided_slice %9 {offsets = [8, 0], sizes = [8, 8], strides = [1, 1]} : vector<64x8xbf16> to vector<8x8xbf16>
    %c0_11 = arith.constant 0 : index
    %c2 = arith.constant 2 : index
    %c0_12 = arith.constant 0 : index
    %c0_13 = arith.constant 0 : index
    %15 = vector.load %arg4[%c0_11, %c2, %c0_12, %c0_13] : memref<1x16x8x8xbf16, #tpu.memory_space<vmem>>, vector<1x1x8x8xbf16>
    %16 = vector.shape_cast %15 : vector<1x1x8x8xbf16> to vector<8x8xbf16>
    %17 = vector.shape_cast %14 : vector<8x8xbf16> to vector<1x1x8x8xbf16>
    tpu.vector_store %arg4[%c0_11, %c2, %c0_12, %c0_13], %17 {strides = array<i32>} : memref<1x16x8x8xbf16, #tpu.memory_space<vmem>>, vector<1x1x8x8xbf16>,
    %18 = vector.extract_strided_slice %9 {offsets = [16, 0], sizes = [8, 8], strides = [1, 1]} : vector<64x8xbf16> to vector<8x8xbf16>
    %c0_14 = arith.constant 0 : index
    %c4 = arith.constant 4 : index
    %c0_15 = arith.constant 0 : index
    %c0_16 = arith.constant 0 : index
    %19 = vector.load %arg4[%c0_14, %c4, %c0_15, %c0_16] : memref<1x16x8x8xbf16, #tpu.memory_space<vmem>>, vector<1x1x8x8xbf16>
    %20 = vector.shape_cast %19 : vector<1x1x8x8xbf16> to vector<8x8xbf16>
    %21 = vector.shape_cast %18 : vector<8x8xbf16> to vector<1x1x8x8xbf16>
    tpu.vector_store %arg4[%c0_14, %c4, %c0_15, %c0_16], %21 {strides = array<i32>} : memref<1x16x8x8xbf16, #tpu.memory_space<vmem>>, vector<1x1x8x8xbf16>,
    %22 = vector.extract_strided_slice %9 {offsets = [24, 0], sizes = [8, 8], strides = [1, 1]} : vector<64x8xbf16> to vector<8x8xbf16>
    %c0_17 = arith.constant 0 : index
    %c6 = arith.constant 6 : index
    %c0_18 = arith.constant 0 : index
    %c0_19 = arith.constant 0 : index
    %23 = vector.load %arg4[%c0_17, %c6, %c0_18, %c0_19] : memref<1x16x8x8xbf16, #tpu.memory_space<vmem>>, vector<1x1x8x8xbf16>
    %24 = vector.shape_cast %23 : vector<1x1x8x8xbf16> to vector<8x8xbf16>
    %25 = vector.shape_cast %22 : vector<8x8xbf16> to vector<1x1x8x8xbf16>
    tpu.vector_store %arg4[%c0_17, %c6, %c0_18, %c0_19], %25 {strides = array<i32>} : memref<1x16x8x8xbf16, #tpu.memory_space<vmem>>, vector<1x1x8x8xbf16>,
    %26 = vector.extract_strided_slice %9 {offsets = [32, 0], sizes = [8, 8], strides = [1, 1]} : vector<64x8xbf16> to vector<8x8xbf16>
    %c0_20 = arith.constant 0 : index
    %c8 = arith.constant 8 : index
    %c0_21 = arith.constant 0 : index
    %c0_22 = arith.constant 0 : index
    %27 = vector.load %arg4[%c0_20, %c8, %c0_21, %c0_22] : memref<1x16x8x8xbf16, #tpu.memory_space<vmem>>, vector<1x1x8x8xbf16>
    %28 = vector.shape_cast %27 : vector<1x1x8x8xbf16> to vector<8x8xbf16>
    %29 = vector.shape_cast %26 : vector<8x8xbf16> to vector<1x1x8x8xbf16>
    tpu.vector_store %arg4[%c0_20, %c8, %c0_21, %c0_22], %29 {strides = array<i32>} : memref<1x16x8x8xbf16, #tpu.memory_space<vmem>>, vector<1x1x8x8xbf16>,
    %30 = vector.extract_strided_slice %9 {offsets = [40, 0], sizes = [8, 8], strides = [1, 1]} : vector<64x8xbf16> to vector<8x8xbf16>
    %c0_23 = arith.constant 0 : index
    %c10 = arith.constant 10 : index
    %c0_24 = arith.constant 0 : index
    %c0_25 = arith.constant 0 : index
    %31 = vector.load %arg4[%c0_23, %c10, %c0_24, %c0_25] : memref<1x16x8x8xbf16, #tpu.memory_space<vmem>>, vector<1x1x8x8xbf16>
    %32 = vector.shape_cast %31 : vector<1x1x8x8xbf16> to vector<8x8xbf16>
    %33 = vector.shape_cast %30 : vector<8x8xbf16> to vector<1x1x8x8xbf16>
    tpu.vector_store %arg4[%c0_23, %c10, %c0_24, %c0_25], %33 {strides = array<i32>} : memref<1x16x8x8xbf16, #tpu.memory_space<vmem>>, vector<1x1x8x8xbf16>,
    %34 = vector.extract_strided_slice %9 {offsets = [48, 0], sizes = [8, 8], strides = [1, 1]} : vector<64x8xbf16> to vector<8x8xbf16>
    %c0_26 = arith.constant 0 : index
    %c12 = arith.constant 12 : index
    %c0_27 = arith.constant 0 : index
    %c0_28 = arith.constant 0 : index
    %35 = vector.load %arg4[%c0_26, %c12, %c0_27, %c0_28] : memref<1x16x8x8xbf16, #tpu.memory_space<vmem>>, vector<1x1x8x8xbf16>
    %36 = vector.shape_cast %35 : vector<1x1x8x8xbf16> to vector<8x8xbf16>
    %37 = vector.shape_cast %34 : vector<8x8xbf16> to vector<1x1x8x8xbf16>
    tpu.vector_store %arg4[%c0_26, %c12, %c0_27, %c0_28], %37 {strides = array<i32>} : memref<1x16x8x8xbf16, #tpu.memory_space<vmem>>, vector<1x1x8x8xbf16>,
    %38 = vector.extract_strided_slice %9 {offsets = [56, 0], sizes = [8, 8], strides = [1, 1]} : vector<64x8xbf16> to vector<8x8xbf16>
    %c0_29 = arith.constant 0 : index
    %c14 = arith.constant 14 : index
    %c0_30 = arith.constant 0 : index
    %c0_31 = arith.constant 0 : index
    %39 = vector.load %arg4[%c0_29, %c14, %c0_30, %c0_31] : memref<1x16x8x8xbf16, #tpu.memory_space<vmem>>, vector<1x1x8x8xbf16>
    %40 = vector.shape_cast %39 : vector<1x1x8x8xbf16> to vector<8x8xbf16>
    %41 = vector.shape_cast %38 : vector<8x8xbf16> to vector<1x1x8x8xbf16>
    tpu.vector_store %arg4[%c0_29, %c14, %c0_30, %c0_31], %41 {strides = array<i32>} : memref<1x16x8x8xbf16, #tpu.memory_space<vmem>>, vector<1x1x8x8xbf16>,
    %42 = vector.extract_strided_slice %8 {offsets = [0, 8], sizes = [64, 8], strides = [1, 1]} : vector<64x16xbf16> to vector<64x8xbf16>
    %43 = vector.extract_strided_slice %42 {offsets = [0, 0], sizes = [8, 8], strides = [1, 1]} : vector<64x8xbf16> to vector<8x8xbf16>
    %c0_32 = arith.constant 0 : index
    %c1 = arith.constant 1 : index
    %c0_33 = arith.constant 0 : index
    %c0_34 = arith.constant 0 : index
    %44 = vector.load %arg4[%c0_32, %c1, %c0_33, %c0_34] : memref<1x16x8x8xbf16, #tpu.memory_space<vmem>>, vector<1x1x8x8xbf16>
    %45 = vector.shape_cast %44 : vector<1x1x8x8xbf16> to vector<8x8xbf16>
    %46 = vector.shape_cast %43 : vector<8x8xbf16> to vector<1x1x8x8xbf16>
    tpu.vector_store %arg4[%c0_32, %c1, %c0_33, %c0_34], %46 {strides = array<i32>} : memref<1x16x8x8xbf16, #tpu.memory_space<vmem>>, vector<1x1x8x8xbf16>,
    %47 = vector.extract_strided_slice %42 {offsets = [8, 0], sizes = [8, 8], strides = [1, 1]} : vector<64x8xbf16> to vector<8x8xbf16>
    %c0_35 = arith.constant 0 : index
    %c3 = arith.constant 3 : index
    %c0_36 = arith.constant 0 : index
    %c0_37 = arith.constant 0 : index
    %48 = vector.load %arg4[%c0_35, %c3, %c0_36, %c0_37] : memref<1x16x8x8xbf16, #tpu.memory_space<vmem>>, vector<1x1x8x8xbf16>
    %49 = vector.shape_cast %48 : vector<1x1x8x8xbf16> to vector<8x8xbf16>
    %50 = vector.shape_cast %47 : vector<8x8xbf16> to vector<1x1x8x8xbf16>
    tpu.vector_store %arg4[%c0_35, %c3, %c0_36, %c0_37], %50 {strides = array<i32>} : memref<1x16x8x8xbf16, #tpu.memory_space<vmem>>, vector<1x1x8x8xbf16>,
    %51 = vector.extract_strided_slice %42 {offsets = [16, 0], sizes = [8, 8], strides = [1, 1]} : vector<64x8xbf16> to vector<8x8xbf16>
    %c0_38 = arith.constant 0 : index
    %c5 = arith.constant 5 : index
    %c0_39 = arith.constant 0 : index
    %c0_40 = arith.constant 0 : index
    %52 = vector.load %arg4[%c0_38, %c5, %c0_39, %c0_40] : memref<1x16x8x8xbf16, #tpu.memory_space<vmem>>, vector<1x1x8x8xbf16>
    %53 = vector.shape_cast %52 : vector<1x1x8x8xbf16> to vector<8x8xbf16>
    %54 = vector.shape_cast %51 : vector<8x8xbf16> to vector<1x1x8x8xbf16>
    tpu.vector_store %arg4[%c0_38, %c5, %c0_39, %c0_40], %54 {strides = array<i32>} : memref<1x16x8x8xbf16, #tpu.memory_space<vmem>>, vector<1x1x8x8xbf16>,
    %55 = vector.extract_strided_slice %42 {offsets = [24, 0], sizes = [8, 8], strides = [1, 1]} : vector<64x8xbf16> to vector<8x8xbf16>
    %c0_41 = arith.constant 0 : index
    %c7 = arith.constant 7 : index
    %c0_42 = arith.constant 0 : index
    %c0_43 = arith.constant 0 : index
    %56 = vector.load %arg4[%c0_41, %c7, %c0_42, %c0_43] : memref<1x16x8x8xbf16, #tpu.memory_space<vmem>>, vector<1x1x8x8xbf16>
    %57 = vector.shape_cast %56 : vector<1x1x8x8xbf16> to vector<8x8xbf16>
    %58 = vector.shape_cast %55 : vector<8x8xbf16> to vector<1x1x8x8xbf16>
    tpu.vector_store %arg4[%c0_41, %c7, %c0_42, %c0_43], %58 {strides = array<i32>} : memref<1x16x8x8xbf16, #tpu.memory_space<vmem>>, vector<1x1x8x8xbf16>,
    %59 = vector.extract_strided_slice %42 {offsets = [32, 0], sizes = [8, 8], strides = [1, 1]} : vector<64x8xbf16> to vector<8x8xbf16>
    %c0_44 = arith.constant 0 : index
    %c9 = arith.constant 9 : index
    %c0_45 = arith.constant 0 : index
    %c0_46 = arith.constant 0 : index
    %60 = vector.load %arg4[%c0_44, %c9, %c0_45, %c0_46] : memref<1x16x8x8xbf16, #tpu.memory_space<vmem>>, vector<1x1x8x8xbf16>
    %61 = vector.shape_cast %60 : vector<1x1x8x8xbf16> to vector<8x8xbf16>
    %62 = vector.shape_cast %59 : vector<8x8xbf16> to vector<1x1x8x8xbf16>
    tpu.vector_store %arg4[%c0_44, %c9, %c0_45, %c0_46], %62 {strides = array<i32>} : memref<1x16x8x8xbf16, #tpu.memory_space<vmem>>, vector<1x1x8x8xbf16>,
    %63 = vector.extract_strided_slice %42 {offsets = [40, 0], sizes = [8, 8], strides = [1, 1]} : vector<64x8xbf16> to vector<8x8xbf16>
    %c0_47 = arith.constant 0 : index
    %c11 = arith.constant 11 : index
    %c0_48 = arith.constant 0 : index
    %c0_49 = arith.constant 0 : index
    %64 = vector.load %arg4[%c0_47, %c11, %c0_48, %c0_49] : memref<1x16x8x8xbf16, #tpu.memory_space<vmem>>, vector<1x1x8x8xbf16>
    %65 = vector.shape_cast %64 : vector<1x1x8x8xbf16> to vector<8x8xbf16>
    %66 = vector.shape_cast %63 : vector<8x8xbf16> to vector<1x1x8x8xbf16>
    tpu.vector_store %arg4[%c0_47, %c11, %c0_48, %c0_49], %66 {strides = array<i32>} : memref<1x16x8x8xbf16, #tpu.memory_space<vmem>>, vector<1x1x8x8xbf16>,
    %67 = vector.extract_strided_slice %42 {offsets = [48, 0], sizes = [8, 8], strides = [1, 1]} : vector<64x8xbf16> to vector<8x8xbf16>
    %c0_50 = arith.constant 0 : index
    %c13 = arith.constant 13 : index
    %c0_51 = arith.constant 0 : index
    %c0_52 = arith.constant 0 : index
    %68 = vector.load %arg4[%c0_50, %c13, %c0_51, %c0_52] : memref<1x16x8x8xbf16, #tpu.memory_space<vmem>>, vector<1x1x8x8xbf16>
    %69 = vector.shape_cast %68 : vector<1x1x8x8xbf16> to vector<8x8xbf16>
    %70 = vector.shape_cast %67 : vector<8x8xbf16> to vector<1x1x8x8xbf16>
    tpu.vector_store %arg4[%c0_50, %c13, %c0_51, %c0_52], %70 {strides = array<i32>} : memref<1x16x8x8xbf16, #tpu.memory_space<vmem>>, vector<1x1x8x8xbf16>,
    %71 = vector.extract_strided_slice %42 {offsets = [56, 0], sizes = [8, 8], strides = [1, 1]} : vector<64x8xbf16> to vector<8x8xbf16>
    %c0_53 = arith.constant 0 : index
    %c15 = arith.constant 15 : index
    %c0_54 = arith.constant 0 : index
    %c0_55 = arith.constant 0 : index
    %72 = vector.load %arg4[%c0_53, %c15, %c0_54, %c0_55] : memref<1x16x8x8xbf16, #tpu.memory_space<vmem>>, vector<1x1x8x8xbf16>
    %73 = vector.shape_cast %72 : vector<1x1x8x8xbf16> to vector<8x8xbf16>
    %74 = vector.shape_cast %71 : vector<8x8xbf16> to vector<1x1x8x8xbf16>
    tpu.vector_store %arg4[%c0_53, %c15, %c0_54, %c0_55], %74 {strides = array<i32>} : memref<1x16x8x8xbf16, #tpu.memory_space<vmem>>, vector<1x1x8x8xbf16>,
    return
  }
  func.func @transform_0(%arg0: i32) -> (i32, i32, i32, i32) {
    %c0_i32 = arith.constant 0 : i32
    %c0_i32_0 = arith.constant 0 : i32
    %c0_i32_1 = arith.constant 0 : i32
    %c0_i32_2 = arith.constant 0 : i32
    return %arg0, %c0_i32, %c0_i32_0, %c0_i32_1 : i32, i32, i32, i32
  }
  func.func @transform_1(%arg0: i32) -> (i32, i32) {
    %c0_i32 = arith.constant 0 : i32
    %c0_i32_0 = arith.constant 0 : i32
    %c0_i32_1 = arith.constant 0 : i32
    return %c0_i32, %c0_i32_0 : i32, i32
  }
  func.func @transform_2(%arg0: i32) -> (i32, i32) {
    %c0_i32 = arith.constant 0 : i32
    %c0_i32_0 = arith.constant 0 : i32
    %c0_i32_1 = arith.constant 0 : i32
    return %c0_i32, %c0_i32_0 : i32, i32
  }
  func.func @transform_3(%arg0: i32) -> (i32, i32, i32, i32) {
    %c0_i32 = arith.constant 0 : i32
    %c0_i32_0 = arith.constant 0 : i32
    %c0_i32_1 = arith.constant 0 : i32
    %c0_i32_2 = arith.constant 0 : i32
    return %arg0, %c0_i32, %c0_i32_0, %c0_i32_1 : i32, i32, i32, i32
  }
}

module attributes {stable_mosaic.version = 11 : i64} {
  func.func @kernel(%arg0: i32, %arg1: memref<1x16x16x4xbf16, #tpu.memory_space<vmem>>, %arg2: memref<1x16x16x4xbf16, #tpu.memory_space<vmem>>, %arg3: memref<72x4xbf16, #tpu.memory_space<vmem>>, %arg4: memref<1x4xf32, #tpu.memory_space<vmem>>, %arg5: memref<1x4xf32, #tpu.memory_space<vmem>>, %arg6: memref<1x16x16x4xbf16, #tpu.memory_space<vmem>>, %arg7: memref<18x18x8xbf16, #tpu.memory_space<vmem>>) attributes {dimension_semantics = [#tpu.dimension_semantics<parallel>], iteration_bounds = array<i64: 2>, scalar_prefetch = 0 : i64, scratch_operands = 1 : i64, tpu.core_type = #tpu.core_type<tc>, window_params = [{transform_indices = @transform_0, window_bounds = array<i64: 1, 16, 16, 4>}, {transform_indices = @transform_1, window_bounds = array<i64: 1, 16, 16, 4>}, {pipeline_mode = #tpu.pipeline_mode<synchronous>, transform_indices = @transform_2, window_bounds = array<i64: 72, 4>}, {pipeline_mode = #tpu.pipeline_mode<synchronous>, transform_indices = @transform_3, window_bounds = array<i64: 1, 4>}, {pipeline_mode = #tpu.pipeline_mode<synchronous>, transform_indices = @transform_4, window_bounds = array<i64: 1, 4>}, {transform_indices = @transform_5, window_bounds = array<i64: 1, 16, 16, 4>}]} {
    %cst = arith.constant 0.000000e+00 : bf16
    %0 = vector.broadcast %cst : bf16 to vector<18x18x8xbf16>
    %c0 = arith.constant 0 : index
    %c0_0 = arith.constant 0 : index
    %c0_1 = arith.constant 0 : index
    %1 = vector.load %arg7[%c0, %c0_0, %c0_1] : memref<18x18x8xbf16, #tpu.memory_space<vmem>>, vector<18x18x8xbf16>
    tpu.vector_store %arg7[%c0, %c0_0, %c0_1], %0 {strides = array<i32>} : memref<18x18x8xbf16, #tpu.memory_space<vmem>>, vector<18x18x8xbf16>,
    %c0_2 = arith.constant 0 : index
    %c0_3 = arith.constant 0 : index
    %c0_4 = arith.constant 0 : index
    %c0_5 = arith.constant 0 : index
    %2 = vector.load %arg1[%c0_2, %c0_3, %c0_4, %c0_5] : memref<1x16x16x4xbf16, #tpu.memory_space<vmem>>, vector<1x16x16x4xbf16>
    %3 = vector.shape_cast %2 : vector<1x16x16x4xbf16> to vector<16x16x4xbf16>
    %c1 = arith.constant 1 : index
    %c1_6 = arith.constant 1 : index
    %c0_7 = arith.constant 0 : index
    %4 = vector.load %arg7[%c1, %c1_6, %c0_7] : memref<18x18x8xbf16, #tpu.memory_space<vmem>>, vector<16x16x4xbf16>
    tpu.vector_store %arg7[%c1, %c1_6, %c0_7], %3 {strides = array<i32>} : memref<18x18x8xbf16, #tpu.memory_space<vmem>>, vector<16x16x4xbf16>,
    %c0_8 = arith.constant 0 : index
    %c0_9 = arith.constant 0 : index
    %c0_10 = arith.constant 0 : index
    %c0_11 = arith.constant 0 : index
    %5 = vector.load %arg2[%c0_8, %c0_9, %c0_10, %c0_11] : memref<1x16x16x4xbf16, #tpu.memory_space<vmem>>, vector<1x16x16x4xbf16>
    %6 = vector.shape_cast %5 : vector<1x16x16x4xbf16> to vector<16x16x4xbf16>
    %c1_12 = arith.constant 1 : index
    %c1_13 = arith.constant 1 : index
    %c4 = arith.constant 4 : index
    %7 = vector.load %arg7[%c1_12, %c1_13, %c4] : memref<18x18x8xbf16, #tpu.memory_space<vmem>>, vector<16x16x4xbf16>
    tpu.vector_store %arg7[%c1_12, %c1_13, %c4], %6 {strides = array<i32>} : memref<18x18x8xbf16, #tpu.memory_space<vmem>>, vector<16x16x4xbf16>,
    %cst_14 = arith.constant 0.000000e+00 : f32
    %8 = vector.broadcast %cst_14 : f32 to vector<256x4xf32>
    %c0_15 = arith.constant 0 : index
    %c0_16 = arith.constant 0 : index
    %c0_17 = arith.constant 0 : index
    %9 = vector.load %arg7[%c0_15, %c0_16, %c0_17] : memref<18x18x8xbf16, #tpu.memory_space<vmem>>, vector<18x16x8xbf16>
    %10 = vector.shape_cast %9 : vector<18x16x8xbf16> to vector<288x8xbf16>
    %11 = vector.extract_strided_slice %10 {offsets = [0, 0], sizes = [256, 8], strides = [1, 1]} : vector<288x8xbf16> to vector<256x8xbf16>
    %c0_18 = arith.constant 0 : index
    %c0_19 = arith.constant 0 : index
    %12 = vector.load %arg3[%c0_18, %c0_19] : memref<72x4xbf16, #tpu.memory_space<vmem>>, vector<8x4xbf16>
    %cst_20 = arith.constant dense<0.000000e+00> : vector<256x4xf32>
    %13 = tpu.matmul %11, %12, %cst_20 {dimension_numbers = #tpu.dot_dimension_numbers<[1], [0], [0], [1], [0, 0, 1, 1], [], []>} : vector<256x8xbf16>, vector<8x4xbf16>, vector<256x4xf32> -> vector<256x4xf32>
    %14 = arith.addf %8, %13 : vector<256x4xf32>
    %15 = vector.extract_strided_slice %10 {offsets = [16, 0], sizes = [256, 8], strides = [1, 1]} : vector<288x8xbf16> to vector<256x8xbf16>
    %c24 = arith.constant 24 : index
    %c0_21 = arith.constant 0 : index
    %16 = vector.load %arg3[%c24, %c0_21] : memref<72x4xbf16, #tpu.memory_space<vmem>>, vector<8x4xbf16>
    %cst_22 = arith.constant dense<0.000000e+00> : vector<256x4xf32>
    %17 = tpu.matmul %15, %16, %cst_22 {dimension_numbers = #tpu.dot_dimension_numbers<[1], [0], [0], [1], [0, 0, 1, 1], [], []>} : vector<256x8xbf16>, vector<8x4xbf16>, vector<256x4xf32> -> vector<256x4xf32>
    %18 = arith.addf %14, %17 : vector<256x4xf32>
    %19 = vector.extract_strided_slice %10 {offsets = [32, 0], sizes = [256, 8], strides = [1, 1]} : vector<288x8xbf16> to vector<256x8xbf16>
    %c48 = arith.constant 48 : index
    %c0_23 = arith.constant 0 : index
    %20 = vector.load %arg3[%c48, %c0_23] : memref<72x4xbf16, #tpu.memory_space<vmem>>, vector<8x4xbf16>
    %cst_24 = arith.constant dense<0.000000e+00> : vector<256x4xf32>
    %21 = tpu.matmul %19, %20, %cst_24 {dimension_numbers = #tpu.dot_dimension_numbers<[1], [0], [0], [1], [0, 0, 1, 1], [], []>} : vector<256x8xbf16>, vector<8x4xbf16>, vector<256x4xf32> -> vector<256x4xf32>
    %22 = arith.addf %18, %21 : vector<256x4xf32>
    %c0_25 = arith.constant 0 : index
    %c1_26 = arith.constant 1 : index
    %c0_27 = arith.constant 0 : index
    %23 = vector.load %arg7[%c0_25, %c1_26, %c0_27] : memref<18x18x8xbf16, #tpu.memory_space<vmem>>, vector<18x16x8xbf16>
    %24 = vector.shape_cast %23 : vector<18x16x8xbf16> to vector<288x8xbf16>
    %25 = vector.extract_strided_slice %24 {offsets = [0, 0], sizes = [256, 8], strides = [1, 1]} : vector<288x8xbf16> to vector<256x8xbf16>
    %c8 = arith.constant 8 : index
    %c0_28 = arith.constant 0 : index
    %26 = vector.load %arg3[%c8, %c0_28] : memref<72x4xbf16, #tpu.memory_space<vmem>>, vector<8x4xbf16>
    %cst_29 = arith.constant dense<0.000000e+00> : vector<256x4xf32>
    %27 = tpu.matmul %25, %26, %cst_29 {dimension_numbers = #tpu.dot_dimension_numbers<[1], [0], [0], [1], [0, 0, 1, 1], [], []>} : vector<256x8xbf16>, vector<8x4xbf16>, vector<256x4xf32> -> vector<256x4xf32>
    %28 = arith.addf %22, %27 : vector<256x4xf32>
    %29 = vector.extract_strided_slice %24 {offsets = [16, 0], sizes = [256, 8], strides = [1, 1]} : vector<288x8xbf16> to vector<256x8xbf16>
    %c32 = arith.constant 32 : index
    %c0_30 = arith.constant 0 : index
    %30 = vector.load %arg3[%c32, %c0_30] : memref<72x4xbf16, #tpu.memory_space<vmem>>, vector<8x4xbf16>
    %cst_31 = arith.constant dense<0.000000e+00> : vector<256x4xf32>
    %31 = tpu.matmul %29, %30, %cst_31 {dimension_numbers = #tpu.dot_dimension_numbers<[1], [0], [0], [1], [0, 0, 1, 1], [], []>} : vector<256x8xbf16>, vector<8x4xbf16>, vector<256x4xf32> -> vector<256x4xf32>
    %32 = arith.addf %28, %31 : vector<256x4xf32>
    %33 = vector.extract_strided_slice %24 {offsets = [32, 0], sizes = [256, 8], strides = [1, 1]} : vector<288x8xbf16> to vector<256x8xbf16>
    %c56 = arith.constant 56 : index
    %c0_32 = arith.constant 0 : index
    %34 = vector.load %arg3[%c56, %c0_32] : memref<72x4xbf16, #tpu.memory_space<vmem>>, vector<8x4xbf16>
    %cst_33 = arith.constant dense<0.000000e+00> : vector<256x4xf32>
    %35 = tpu.matmul %33, %34, %cst_33 {dimension_numbers = #tpu.dot_dimension_numbers<[1], [0], [0], [1], [0, 0, 1, 1], [], []>} : vector<256x8xbf16>, vector<8x4xbf16>, vector<256x4xf32> -> vector<256x4xf32>
    %36 = arith.addf %32, %35 : vector<256x4xf32>
    %c0_34 = arith.constant 0 : index
    %c2 = arith.constant 2 : index
    %c0_35 = arith.constant 0 : index
    %37 = vector.load %arg7[%c0_34, %c2, %c0_35] : memref<18x18x8xbf16, #tpu.memory_space<vmem>>, vector<18x16x8xbf16>
    %38 = vector.shape_cast %37 : vector<18x16x8xbf16> to vector<288x8xbf16>
    %39 = vector.extract_strided_slice %38 {offsets = [0, 0], sizes = [256, 8], strides = [1, 1]} : vector<288x8xbf16> to vector<256x8xbf16>
    %c16 = arith.constant 16 : index
    %c0_36 = arith.constant 0 : index
    %40 = vector.load %arg3[%c16, %c0_36] : memref<72x4xbf16, #tpu.memory_space<vmem>>, vector<8x4xbf16>
    %cst_37 = arith.constant dense<0.000000e+00> : vector<256x4xf32>
    %41 = tpu.matmul %39, %40, %cst_37 {dimension_numbers = #tpu.dot_dimension_numbers<[1], [0], [0], [1], [0, 0, 1, 1], [], []>} : vector<256x8xbf16>, vector<8x4xbf16>, vector<256x4xf32> -> vector<256x4xf32>
    %42 = arith.addf %36, %41 : vector<256x4xf32>
    %43 = vector.extract_strided_slice %38 {offsets = [16, 0], sizes = [256, 8], strides = [1, 1]} : vector<288x8xbf16> to vector<256x8xbf16>
    %c40 = arith.constant 40 : index
    %c0_38 = arith.constant 0 : index
    %44 = vector.load %arg3[%c40, %c0_38] : memref<72x4xbf16, #tpu.memory_space<vmem>>, vector<8x4xbf16>
    %cst_39 = arith.constant dense<0.000000e+00> : vector<256x4xf32>
    %45 = tpu.matmul %43, %44, %cst_39 {dimension_numbers = #tpu.dot_dimension_numbers<[1], [0], [0], [1], [0, 0, 1, 1], [], []>} : vector<256x8xbf16>, vector<8x4xbf16>, vector<256x4xf32> -> vector<256x4xf32>
    %46 = arith.addf %42, %45 : vector<256x4xf32>
    %47 = vector.extract_strided_slice %38 {offsets = [32, 0], sizes = [256, 8], strides = [1, 1]} : vector<288x8xbf16> to vector<256x8xbf16>
    %c64 = arith.constant 64 : index
    %c0_40 = arith.constant 0 : index
    %48 = vector.load %arg3[%c64, %c0_40] : memref<72x4xbf16, #tpu.memory_space<vmem>>, vector<8x4xbf16>
    %cst_41 = arith.constant dense<0.000000e+00> : vector<256x4xf32>
    %49 = tpu.matmul %47, %48, %cst_41 {dimension_numbers = #tpu.dot_dimension_numbers<[1], [0], [0], [1], [0, 0, 1, 1], [], []>} : vector<256x8xbf16>, vector<8x4xbf16>, vector<256x4xf32> -> vector<256x4xf32>
    %50 = arith.addf %46, %49 : vector<256x4xf32>
    %c0_42 = arith.constant 0 : index
    %c0_43 = arith.constant 0 : index
    %51 = vector.load %arg4[%c0_42, %c0_43] : memref<1x4xf32, #tpu.memory_space<vmem>>, vector<1x4xf32>
    %52 = vector.broadcast %51 : vector<1x4xf32> to vector<256x4xf32>
    %53 = arith.mulf %50, %52 : vector<256x4xf32>
    %c0_44 = arith.constant 0 : index
    %c0_45 = arith.constant 0 : index
    %54 = vector.load %arg5[%c0_44, %c0_45] : memref<1x4xf32, #tpu.memory_space<vmem>>, vector<1x4xf32>
    %55 = vector.broadcast %54 : vector<1x4xf32> to vector<256x4xf32>
    %56 = arith.addf %53, %55 : vector<256x4xf32>
    %cst_46 = arith.constant 0.000000e+00 : f32
    %57 = vector.broadcast %cst_46 : f32 to vector<256x4xf32>
    %58 = arith.maximumf %56, %57 : vector<256x4xf32>
    %59 = vector.shape_cast %58 : vector<256x4xf32> to vector<16x16x4xf32>
    %60 = arith.truncf %59 : vector<16x16x4xf32> to vector<16x16x4xbf16>
    %c0_47 = arith.constant 0 : index
    %c0_48 = arith.constant 0 : index
    %c0_49 = arith.constant 0 : index
    %c0_50 = arith.constant 0 : index
    %61 = vector.load %arg6[%c0_47, %c0_48, %c0_49, %c0_50] : memref<1x16x16x4xbf16, #tpu.memory_space<vmem>>, vector<1x16x16x4xbf16>
    %62 = vector.shape_cast %61 : vector<1x16x16x4xbf16> to vector<16x16x4xbf16>
    %63 = vector.shape_cast %60 : vector<16x16x4xbf16> to vector<1x16x16x4xbf16>
    tpu.vector_store %arg6[%c0_47, %c0_48, %c0_49, %c0_50], %63 {strides = array<i32>} : memref<1x16x16x4xbf16, #tpu.memory_space<vmem>>, vector<1x16x16x4xbf16>,
    return
  }
  func.func @transform_0(%arg0: i32) -> (i32, i32, i32, i32) {
    %c0_i32 = arith.constant 0 : i32
    %c0_i32_0 = arith.constant 0 : i32
    %c0_i32_1 = arith.constant 0 : i32
    %c0_i32_2 = arith.constant 0 : i32
    return %arg0, %c0_i32, %c0_i32_0, %c0_i32_1 : i32, i32, i32, i32
  }
  func.func @transform_1(%arg0: i32) -> (i32, i32, i32, i32) {
    %c0_i32 = arith.constant 0 : i32
    %c0_i32_0 = arith.constant 0 : i32
    %c0_i32_1 = arith.constant 0 : i32
    %c0_i32_2 = arith.constant 0 : i32
    return %arg0, %c0_i32, %c0_i32_0, %c0_i32_1 : i32, i32, i32, i32
  }
  func.func @transform_2(%arg0: i32) -> (i32, i32) {
    %c0_i32 = arith.constant 0 : i32
    %c0_i32_0 = arith.constant 0 : i32
    %c0_i32_1 = arith.constant 0 : i32
    return %c0_i32, %c0_i32_0 : i32, i32
  }
  func.func @transform_3(%arg0: i32) -> (i32, i32) {
    %c0_i32 = arith.constant 0 : i32
    %c0_i32_0 = arith.constant 0 : i32
    %c0_i32_1 = arith.constant 0 : i32
    return %c0_i32, %c0_i32_0 : i32, i32
  }
  func.func @transform_4(%arg0: i32) -> (i32, i32) {
    %c0_i32 = arith.constant 0 : i32
    %c0_i32_0 = arith.constant 0 : i32
    %c0_i32_1 = arith.constant 0 : i32
    return %c0_i32, %c0_i32_0 : i32, i32
  }
  func.func @transform_5(%arg0: i32) -> (i32, i32, i32, i32) {
    %c0_i32 = arith.constant 0 : i32
    %c0_i32_0 = arith.constant 0 : i32
    %c0_i32_1 = arith.constant 0 : i32
    %c0_i32_2 = arith.constant 0 : i32
    return %arg0, %c0_i32, %c0_i32_0, %c0_i32_1 : i32, i32, i32, i32
  }
}

module attributes {stable_mosaic.version = 11 : i64} {
  func.func @kernel(%arg0: i32, %arg1: memref<1x16x16x4xbf16, #tpu.memory_space<vmem>>, %arg2: memref<36x4xbf16, #tpu.memory_space<vmem>>, %arg3: memref<1x4xf32, #tpu.memory_space<vmem>>, %arg4: memref<1x4xf32, #tpu.memory_space<vmem>>, %arg5: memref<1x16x16x4xf32, #tpu.memory_space<vmem>>, %arg6: memref<18x18x4xbf16, #tpu.memory_space<vmem>>) attributes {dimension_semantics = [#tpu.dimension_semantics<parallel>], iteration_bounds = array<i64: 2>, scalar_prefetch = 0 : i64, scratch_operands = 1 : i64, tpu.core_type = #tpu.core_type<tc>, window_params = [{transform_indices = @transform_0, window_bounds = array<i64: 1, 16, 16, 4>}, {pipeline_mode = #tpu.pipeline_mode<synchronous>, transform_indices = @transform_1, window_bounds = array<i64: 36, 4>}, {pipeline_mode = #tpu.pipeline_mode<synchronous>, transform_indices = @transform_2, window_bounds = array<i64: 1, 4>}, {pipeline_mode = #tpu.pipeline_mode<synchronous>, transform_indices = @transform_3, window_bounds = array<i64: 1, 4>}, {transform_indices = @transform_4, window_bounds = array<i64: 1, 16, 16, 4>}]} {
    %cst = arith.constant 0.000000e+00 : bf16
    %0 = vector.broadcast %cst : bf16 to vector<18x18x4xbf16>
    %c0 = arith.constant 0 : index
    %c0_0 = arith.constant 0 : index
    %c0_1 = arith.constant 0 : index
    %1 = vector.load %arg6[%c0, %c0_0, %c0_1] : memref<18x18x4xbf16, #tpu.memory_space<vmem>>, vector<18x18x4xbf16>
    tpu.vector_store %arg6[%c0, %c0_0, %c0_1], %0 {strides = array<i32>} : memref<18x18x4xbf16, #tpu.memory_space<vmem>>, vector<18x18x4xbf16>,
    %c0_2 = arith.constant 0 : index
    %c0_3 = arith.constant 0 : index
    %c0_4 = arith.constant 0 : index
    %c0_5 = arith.constant 0 : index
    %2 = vector.load %arg1[%c0_2, %c0_3, %c0_4, %c0_5] : memref<1x16x16x4xbf16, #tpu.memory_space<vmem>>, vector<1x16x16x4xbf16>
    %3 = vector.shape_cast %2 : vector<1x16x16x4xbf16> to vector<16x16x4xbf16>
    %c1 = arith.constant 1 : index
    %c1_6 = arith.constant 1 : index
    %c0_7 = arith.constant 0 : index
    %4 = vector.load %arg6[%c1, %c1_6, %c0_7] : memref<18x18x4xbf16, #tpu.memory_space<vmem>>, vector<16x16x4xbf16>
    tpu.vector_store %arg6[%c1, %c1_6, %c0_7], %3 {strides = array<i32>} : memref<18x18x4xbf16, #tpu.memory_space<vmem>>, vector<16x16x4xbf16>,
    %cst_8 = arith.constant 0.000000e+00 : f32
    %5 = vector.broadcast %cst_8 : f32 to vector<256x4xf32>
    %c0_9 = arith.constant 0 : index
    %c0_10 = arith.constant 0 : index
    %c0_11 = arith.constant 0 : index
    %6 = vector.load %arg6[%c0_9, %c0_10, %c0_11] : memref<18x18x4xbf16, #tpu.memory_space<vmem>>, vector<18x16x4xbf16>
    %7 = vector.shape_cast %6 : vector<18x16x4xbf16> to vector<288x4xbf16>
    %8 = vector.extract_strided_slice %7 {offsets = [0, 0], sizes = [256, 4], strides = [1, 1]} : vector<288x4xbf16> to vector<256x4xbf16>
    %c0_12 = arith.constant 0 : index
    %c0_13 = arith.constant 0 : index
    %9 = vector.load %arg2[%c0_12, %c0_13] : memref<36x4xbf16, #tpu.memory_space<vmem>>, vector<4x4xbf16>
    %cst_14 = arith.constant dense<0.000000e+00> : vector<256x4xf32>
    %10 = tpu.matmul %8, %9, %cst_14 {dimension_numbers = #tpu.dot_dimension_numbers<[1], [0], [0], [1], [0, 0, 1, 1], [], []>} : vector<256x4xbf16>, vector<4x4xbf16>, vector<256x4xf32> -> vector<256x4xf32>
    %11 = arith.addf %5, %10 : vector<256x4xf32>
    %12 = vector.extract_strided_slice %7 {offsets = [16, 0], sizes = [256, 4], strides = [1, 1]} : vector<288x4xbf16> to vector<256x4xbf16>
    %c12 = arith.constant 12 : index
    %c0_15 = arith.constant 0 : index
    %13 = vector.load %arg2[%c12, %c0_15] : memref<36x4xbf16, #tpu.memory_space<vmem>>, vector<4x4xbf16>
    %cst_16 = arith.constant dense<0.000000e+00> : vector<256x4xf32>
    %14 = tpu.matmul %12, %13, %cst_16 {dimension_numbers = #tpu.dot_dimension_numbers<[1], [0], [0], [1], [0, 0, 1, 1], [], []>} : vector<256x4xbf16>, vector<4x4xbf16>, vector<256x4xf32> -> vector<256x4xf32>
    %15 = arith.addf %11, %14 : vector<256x4xf32>
    %16 = vector.extract_strided_slice %7 {offsets = [32, 0], sizes = [256, 4], strides = [1, 1]} : vector<288x4xbf16> to vector<256x4xbf16>
    %c24 = arith.constant 24 : index
    %c0_17 = arith.constant 0 : index
    %17 = vector.load %arg2[%c24, %c0_17] : memref<36x4xbf16, #tpu.memory_space<vmem>>, vector<4x4xbf16>
    %cst_18 = arith.constant dense<0.000000e+00> : vector<256x4xf32>
    %18 = tpu.matmul %16, %17, %cst_18 {dimension_numbers = #tpu.dot_dimension_numbers<[1], [0], [0], [1], [0, 0, 1, 1], [], []>} : vector<256x4xbf16>, vector<4x4xbf16>, vector<256x4xf32> -> vector<256x4xf32>
    %19 = arith.addf %15, %18 : vector<256x4xf32>
    %c0_19 = arith.constant 0 : index
    %c1_20 = arith.constant 1 : index
    %c0_21 = arith.constant 0 : index
    %20 = vector.load %arg6[%c0_19, %c1_20, %c0_21] : memref<18x18x4xbf16, #tpu.memory_space<vmem>>, vector<18x16x4xbf16>
    %21 = vector.shape_cast %20 : vector<18x16x4xbf16> to vector<288x4xbf16>
    %22 = vector.extract_strided_slice %21 {offsets = [0, 0], sizes = [256, 4], strides = [1, 1]} : vector<288x4xbf16> to vector<256x4xbf16>
    %c4 = arith.constant 4 : index
    %c0_22 = arith.constant 0 : index
    %23 = vector.load %arg2[%c4, %c0_22] : memref<36x4xbf16, #tpu.memory_space<vmem>>, vector<4x4xbf16>
    %cst_23 = arith.constant dense<0.000000e+00> : vector<256x4xf32>
    %24 = tpu.matmul %22, %23, %cst_23 {dimension_numbers = #tpu.dot_dimension_numbers<[1], [0], [0], [1], [0, 0, 1, 1], [], []>} : vector<256x4xbf16>, vector<4x4xbf16>, vector<256x4xf32> -> vector<256x4xf32>
    %25 = arith.addf %19, %24 : vector<256x4xf32>
    %26 = vector.extract_strided_slice %21 {offsets = [16, 0], sizes = [256, 4], strides = [1, 1]} : vector<288x4xbf16> to vector<256x4xbf16>
    %c16 = arith.constant 16 : index
    %c0_24 = arith.constant 0 : index
    %27 = vector.load %arg2[%c16, %c0_24] : memref<36x4xbf16, #tpu.memory_space<vmem>>, vector<4x4xbf16>
    %cst_25 = arith.constant dense<0.000000e+00> : vector<256x4xf32>
    %28 = tpu.matmul %26, %27, %cst_25 {dimension_numbers = #tpu.dot_dimension_numbers<[1], [0], [0], [1], [0, 0, 1, 1], [], []>} : vector<256x4xbf16>, vector<4x4xbf16>, vector<256x4xf32> -> vector<256x4xf32>
    %29 = arith.addf %25, %28 : vector<256x4xf32>
    %30 = vector.extract_strided_slice %21 {offsets = [32, 0], sizes = [256, 4], strides = [1, 1]} : vector<288x4xbf16> to vector<256x4xbf16>
    %c28 = arith.constant 28 : index
    %c0_26 = arith.constant 0 : index
    %31 = vector.load %arg2[%c28, %c0_26] : memref<36x4xbf16, #tpu.memory_space<vmem>>, vector<4x4xbf16>
    %cst_27 = arith.constant dense<0.000000e+00> : vector<256x4xf32>
    %32 = tpu.matmul %30, %31, %cst_27 {dimension_numbers = #tpu.dot_dimension_numbers<[1], [0], [0], [1], [0, 0, 1, 1], [], []>} : vector<256x4xbf16>, vector<4x4xbf16>, vector<256x4xf32> -> vector<256x4xf32>
    %33 = arith.addf %29, %32 : vector<256x4xf32>
    %c0_28 = arith.constant 0 : index
    %c2 = arith.constant 2 : index
    %c0_29 = arith.constant 0 : index
    %34 = vector.load %arg6[%c0_28, %c2, %c0_29] : memref<18x18x4xbf16, #tpu.memory_space<vmem>>, vector<18x16x4xbf16>
    %35 = vector.shape_cast %34 : vector<18x16x4xbf16> to vector<288x4xbf16>
    %36 = vector.extract_strided_slice %35 {offsets = [0, 0], sizes = [256, 4], strides = [1, 1]} : vector<288x4xbf16> to vector<256x4xbf16>
    %c8 = arith.constant 8 : index
    %c0_30 = arith.constant 0 : index
    %37 = vector.load %arg2[%c8, %c0_30] : memref<36x4xbf16, #tpu.memory_space<vmem>>, vector<4x4xbf16>
    %cst_31 = arith.constant dense<0.000000e+00> : vector<256x4xf32>
    %38 = tpu.matmul %36, %37, %cst_31 {dimension_numbers = #tpu.dot_dimension_numbers<[1], [0], [0], [1], [0, 0, 1, 1], [], []>} : vector<256x4xbf16>, vector<4x4xbf16>, vector<256x4xf32> -> vector<256x4xf32>
    %39 = arith.addf %33, %38 : vector<256x4xf32>
    %40 = vector.extract_strided_slice %35 {offsets = [16, 0], sizes = [256, 4], strides = [1, 1]} : vector<288x4xbf16> to vector<256x4xbf16>
    %c20 = arith.constant 20 : index
    %c0_32 = arith.constant 0 : index
    %41 = vector.load %arg2[%c20, %c0_32] : memref<36x4xbf16, #tpu.memory_space<vmem>>, vector<4x4xbf16>
    %cst_33 = arith.constant dense<0.000000e+00> : vector<256x4xf32>
    %42 = tpu.matmul %40, %41, %cst_33 {dimension_numbers = #tpu.dot_dimension_numbers<[1], [0], [0], [1], [0, 0, 1, 1], [], []>} : vector<256x4xbf16>, vector<4x4xbf16>, vector<256x4xf32> -> vector<256x4xf32>
    %43 = arith.addf %39, %42 : vector<256x4xf32>
    %44 = vector.extract_strided_slice %35 {offsets = [32, 0], sizes = [256, 4], strides = [1, 1]} : vector<288x4xbf16> to vector<256x4xbf16>
    %c32 = arith.constant 32 : index
    %c0_34 = arith.constant 0 : index
    %45 = vector.load %arg2[%c32, %c0_34] : memref<36x4xbf16, #tpu.memory_space<vmem>>, vector<4x4xbf16>
    %cst_35 = arith.constant dense<0.000000e+00> : vector<256x4xf32>
    %46 = tpu.matmul %44, %45, %cst_35 {dimension_numbers = #tpu.dot_dimension_numbers<[1], [0], [0], [1], [0, 0, 1, 1], [], []>} : vector<256x4xbf16>, vector<4x4xbf16>, vector<256x4xf32> -> vector<256x4xf32>
    %47 = arith.addf %43, %46 : vector<256x4xf32>
    %c0_36 = arith.constant 0 : index
    %c0_37 = arith.constant 0 : index
    %48 = vector.load %arg3[%c0_36, %c0_37] : memref<1x4xf32, #tpu.memory_space<vmem>>, vector<1x4xf32>
    %49 = vector.broadcast %48 : vector<1x4xf32> to vector<256x4xf32>
    %50 = arith.mulf %47, %49 : vector<256x4xf32>
    %c0_38 = arith.constant 0 : index
    %c0_39 = arith.constant 0 : index
    %51 = vector.load %arg4[%c0_38, %c0_39] : memref<1x4xf32, #tpu.memory_space<vmem>>, vector<1x4xf32>
    %52 = vector.broadcast %51 : vector<1x4xf32> to vector<256x4xf32>
    %53 = arith.addf %50, %52 : vector<256x4xf32>
    %cst_40 = arith.constant 0.000000e+00 : f32
    %54 = vector.broadcast %cst_40 : f32 to vector<256x4xf32>
    %55 = arith.maximumf %53, %54 : vector<256x4xf32>
    %56 = vector.shape_cast %55 : vector<256x4xf32> to vector<16x16x4xf32>
    %c0_41 = arith.constant 0 : index
    %c0_42 = arith.constant 0 : index
    %c0_43 = arith.constant 0 : index
    %c0_44 = arith.constant 0 : index
    %57 = vector.load %arg5[%c0_41, %c0_42, %c0_43, %c0_44] : memref<1x16x16x4xf32, #tpu.memory_space<vmem>>, vector<1x16x16x4xf32>
    %58 = vector.shape_cast %57 : vector<1x16x16x4xf32> to vector<16x16x4xf32>
    %59 = vector.shape_cast %56 : vector<16x16x4xf32> to vector<1x16x16x4xf32>
    tpu.vector_store %arg5[%c0_41, %c0_42, %c0_43, %c0_44], %59 {strides = array<i32>} : memref<1x16x16x4xf32, #tpu.memory_space<vmem>>, vector<1x16x16x4xf32>,
    return
  }
  func.func @transform_0(%arg0: i32) -> (i32, i32, i32, i32) {
    %c0_i32 = arith.constant 0 : i32
    %c0_i32_0 = arith.constant 0 : i32
    %c0_i32_1 = arith.constant 0 : i32
    %c0_i32_2 = arith.constant 0 : i32
    return %arg0, %c0_i32, %c0_i32_0, %c0_i32_1 : i32, i32, i32, i32
  }
  func.func @transform_1(%arg0: i32) -> (i32, i32) {
    %c0_i32 = arith.constant 0 : i32
    %c0_i32_0 = arith.constant 0 : i32
    %c0_i32_1 = arith.constant 0 : i32
    return %c0_i32, %c0_i32_0 : i32, i32
  }
  func.func @transform_2(%arg0: i32) -> (i32, i32) {
    %c0_i32 = arith.constant 0 : i32
    %c0_i32_0 = arith.constant 0 : i32
    %c0_i32_1 = arith.constant 0 : i32
    return %c0_i32, %c0_i32_0 : i32, i32
  }
  func.func @transform_3(%arg0: i32) -> (i32, i32) {
    %c0_i32 = arith.constant 0 : i32
    %c0_i32_0 = arith.constant 0 : i32
    %c0_i32_1 = arith.constant 0 : i32
    return %c0_i32, %c0_i32_0 : i32, i32
  }
  func.func @transform_4(%arg0: i32) -> (i32, i32, i32, i32) {
    %c0_i32 = arith.constant 0 : i32
    %c0_i32_0 = arith.constant 0 : i32
    %c0_i32_1 = arith.constant 0 : i32
    %c0_i32_2 = arith.constant 0 : i32
    return %arg0, %c0_i32, %c0_i32_0, %c0_i32_1 : i32, i32, i32, i32
  }
}

</mosaic_0001>

<bundles_post_ra>
// kernel: tile.8
= control target key start
LH: loop header
LB: loop body
LE: loop exit
PB: predicated region body
PF: predicated region fallthrough
CT: control target
= control target key end

     0   :  { %s22_s0 = inlined_call_operand.vmem [shape: f32[4], index: 0, kind: input, shape index: {}]   ;;  %s23_s1 = inlined_call_operand.vmem [shape: f32[4,4], index: 1, kind: output, shape index: {}]  }
   0x1   :  { %v4_v0 = vld [vmem:[%s22_s0] ss:$0 sm:$0xff] }
   0x2   :  { %5 = vst [vmem:[%s23_s1] sm:$0xf] %v4_v0 }

// kernel: tile.9
= control target key start
LH: loop header
LB: loop body
LE: loop exit
PB: predicated region body
PF: predicated region fallthrough
CT: control target
= control target key end

     0   :  { %vm7_vm0 = vcmask 31744   ;;  %s37_s8 = smov 4   ;;  %s38_s9 = smov 8   ;;  %vm13_vm1 = vcmask 130144   ;;  %vm19_vm2 = vcmask 97344   ;;  %vm25_vm3 = vcmask 64544   ;;  %s55_s0 = inlined_call_operand.vmem [shape: f32[4,4], index: 0, kind: input, shape index: {}]   ;;  %s56_s1 = inlined_call_operand.vmem [shape: f32[1,16], index: 1, kind: output, shape index: {}]  }
   0x1   :  { %v4_v0 = vld [vmem:[%s55_s0] sm:$0xf]  ;;  %s36_s0 = smov 12  }
   0x2   :  { %5 = vst [vmem:[#allocation1] sm:$0xf] %v4_v0 }
   0x9   :  { %v10_v1 = vld [vmem:[#allocation1 + $0x3] sm:$0x1]   ;;  %v22_v2 = vld [vmem:[#allocation1 + $0x1] sm:$0x1]   ;;  %v6_v3 = vld [vmem:[#allocation1] sm:$0x1]  }
   0xa   :  { %11 = vrot.lane.b32.xlu0 %v10_v1, %s36_s0  ;;  %23 = vrot.lane.b32.xlu1 %v22_v2, %s37_s8  ;;  %v16_v4 = vld [vmem:[#allocation1 + $0x2] sm:$0x1]   ;;  %8 = vst.msk [vmem:[#allocation0] sm:$0x1] %vm7_vm0, %v6_v3  }
   0xe   :  { %17 = vrot.lane.b32.xlu0 %v16_v4, %s38_s9 }
  0x7c   :  { %v12_v5 = vpop.permute.xlu0 %11   ;;  %v24_v6 = vpop.permute.xlu1 %23  }
  0x7d   :  { %14 = vst.msk [vmem:[#allocation0] sm:$0x1] %vm13_vm1, %v12_v5  }
  0x80   :  { %v18_v7 = vpop.permute.xlu0 %17  }
  0x81   :  { %20 = vst.msk [vmem:[#allocation0] sm:$0x1] %vm19_vm2, %v18_v7  }
  0x82   :  { %26 = vst.msk [vmem:[#allocation0] sm:$0x1] %vm25_vm3, %v24_v6  }
  0x89   :  { %v30_v8 = vld [vmem:[#allocation0] sm:$0x1] }
  0x8a   :  { %32 = vst [vmem:[%s56_s1] sm:$0x1] %v30_v8 }

// kernel: up_forward.3
= control target key start
LH: loop header
LB: loop body
LE: loop exit
PB: predicated region body
PF: predicated region fallthrough
CT: control target
= control target key end

     0   :  { %s543_s12 = smov 0   ;;  %s600_s0 = inlined_call_operand.vmem [shape: bf16[2,8,8,8], index: 0, kind: input, shape index: {}]   ;;  %s601_s1 = inlined_call_operand.vmem [shape: bf16[8,16], index: 1, kind: input, shape index: {}]   ;;  %s602_s2 = inlined_call_operand.vmem [shape: f32[1,16], index: 2, kind: input, shape index: {}]   ;;  %s603_s3 = inlined_call_operand.vmem [shape: bf16[2,16,8,8], index: 3, kind: output, shape index: {}]  }
   0x1 LB: > { %s429_s13 = sadd.s32 4294967295, %s520_s12   ;;  %p433_p0 = scmp.ge.s32.totalorder %s520_s12, 1  ;;  %s520_s12 = sphi %s543_s12, %s13_s12  }
   0x2   : > { %p137_p1 = scmp.lt.s32.totalorder %s520_s12, 3 }
   0x4   : > { %p138_p2 = pnand %p433_p0, %p137_p1 }
   0x5   : > { %v180_v0 = vld [vmem:[%s601_s1] sm:$0xf] (!%p138_p2)  ;;  %vm221_vm0 = vcmask (!%p138_p2), 1043456   ;;  %p161_p3 = scmp.lt.s32.totalorder (!%p138_p2), %s429_s13, 1  ;;  %vm208_vm1 = vcmask (!%p138_p2), 64512   ;;  %vm294_vm2 = vcmask (!%p138_p2), 60416  }
   0x6   : > { %141 = sbr.rel (%p138_p2) target bundleno = 363 (0x16b), region = 32  ;;  %499 = vmatprep.subr.msk.bf16.mxu0 (!%p138_p2), %vm221_vm0, %v180_v0  ;;  %500 = vmatprep.subr.msk.bf16.mxu1 (!%p138_p2), %vm221_vm0, %v180_v0  ;;  %v223_v1 = vsel (!%p138_p2), %vm221_vm0, %v180_v0, 0  ;;  %v438_v6 = vld [vmem:[%s602_s2] ss:$0 sm:$0xff] (!%p138_p2)  ;;  %s522_s26 = smov (!%p138_p2), 120  }
   0x7   : > { %488 = vmatpush3.bf16.msra.mxu0 (!%p138_p2), %v223_v1  ;;  %498 = vmatpush3.bf16.msra.mxu1 (!%p138_p2), %v223_v1 }
   0xd   : > { %s605_s13 = smov (!%p161_p3, %s429_s13), 1 }
   0xe   : > { %s472_s16 = sshll.u32 %s605_s13, 5  ;;  %s473_s22 = sshll.u32 %s605_s13, 6 }
   0xf   : > { %s165_s19 = scalar_lea.vmem %s600_s0, %s472_s16  ;;  %s563_s25 = scalar_lea.vmem %s603_s3, %s473_s22 }
  0x10   : > { %v510_v2 = vld [vmem:[%s165_s19] sm:$0xff]   ;;  %v511_v3 = vld [vmem:[%s165_s19 + $0x8] sm:$0xff]   ;;  %v512_v4 = vld [vmem:[%s165_s19 + $0x10] sm:$0xff]  }
  0x11   : > { %489 = vmatprep.mubr.msk.bf16.mxu0 %vm208_vm1, %v510_v2  ;;  %v513_v5 = vld [vmem:[%s165_s19 + $0x18] sm:$0xff]   ;;  %493 = vmatprep.mubr.msk.bf16.mxu1 %vm208_vm1, %v512_v4 }
  0x12   : > { %490 = vmatmul.mubr.msk.bf16.vlgmr.msra.gmra.mrb[0].mxu0 %vm208_vm1, %v511_v3  ;;  %494 = vmatmul.mubr.msk.bf16.vlgmr.msra.gmra.mrb[0].mxu1 %vm208_vm1, %v513_v5 }
  0xe5   : > { %v491_v7 = vpop.f32.mrb[0].mxu0  ;;  %v495_v11 = vpop.f32.mrb[0].mxu1 }
  0xe6   : > { %v268_v8 = vadd.f32 %v491_v7, %v438_v6  ;;  %v259_v9 = vpop.f32.mrb[1].mxu0  ;;  %v284_v13 = vadd.f32 %v495_v11, %v438_v6  ;;  %v275_v15 = vpop.f32.mrb[1].mxu1 }
  0xe7   : > { %v260_v10 = vadd.f32 %v438_v6, %v259_v9  ;;  %v492_v12 = vpop.f32.mrb[2].mxu0  ;;  %v276_v18 = vadd.f32 %v438_v6, %v275_v15  ;;  %v496_v20 = vpop.f32.mrb[2].mxu1 }
  0xe8   : > { %v271_v14 = vadd.f32 %v492_v12, %v438_v6  ;;  %v262_v16 = vpop.f32.mrb[3].mxu0  ;;  %v479_v17 = vpack.c.bf16 %v268_v8, %v268_v8  ;;  %v287_v24 = vadd.f32 %v496_v20, %v438_v6  ;;  %v278_v25 = vpop.f32.mrb[3].mxu1  ;;  %v481_v34 = vpack.c.bf16 %v284_v13, %v284_v13 }
  0xe9   : > { %v263_v19 = vadd.f32 %v438_v6, %v262_v16  ;;  %v478_v21 = vpack.c.bf16 %v260_v10, %v260_v10  ;;  %v480_v26 = vpack.c.bf16 %v276_v18, %v276_v18  ;;  %v279_v29 = vadd.f32 %v438_v6, %v278_v25 }
  0xea   : > { %v291_v22 = vpack.c.bf16 %v271_v14, %v268_v8  ;;  %v475_v23 = vpack.c.bf16 %v271_v14, %v271_v14  ;;  %340 = vrot.lane.b32.xlu1 %v479_v17, %s522_s26  ;;  %v293_v30 = vpack.c.bf16 %v287_v24, %v284_v13  ;;  %v477_v31 = vpack.c.bf16 %v287_v24, %v287_v24 }
  0xeb   : > { %v290_v27 = vpack.c.bf16 %v263_v19, %v260_v10  ;;  %v474_v28 = vpack.c.bf16 %v263_v19, %v263_v19  ;;  %328 = vrot.lane.b32.xlu0 %v478_v21, %s522_s26  ;;  %v292_v32 = vpack.c.bf16 %v279_v29, %v276_v18  ;;  %v476_v33 = vpack.c.bf16 %v279_v29, %v279_v29 }
  0xec   : > { %449 = vst.msk [vmem:[%s563_s25 + $0x10] sm:$0xf] %vm294_vm2, %v291_v22  ;;  %451 = vst.msk [vmem:[%s563_s25 + $0x18] sm:$0xf] %vm294_vm2, %v475_v23 }
  0xed   : > { %295 = vst.msk [vmem:[%s563_s25] sm:$0xf] %vm294_vm2, %v290_v27  ;;  %448 = vst.msk [vmem:[%s563_s25 + $0x8] sm:$0xf] %vm294_vm2, %v474_v28 }
  0xee   : > { %455 = vst.msk [vmem:[%s563_s25 + $0x30] sm:$0xf] %vm294_vm2, %v293_v30  ;;  %457 = vst.msk [vmem:[%s563_s25 + $0x38] sm:$0xf] %vm294_vm2, %v477_v31  ;;  %345 = vrot.lane.b32.xlu1 %v475_v23, %s522_s26 }
  0xef   : > { %452 = vst.msk [vmem:[%s563_s25 + $0x20] sm:$0xf] %vm294_vm2, %v292_v32  ;;  %454 = vst.msk [vmem:[%s563_s25 + $0x28] sm:$0xf] %vm294_vm2, %v476_v33  ;;  %352 = vrot.lane.b32.xlu0 %v480_v26, %s522_s26 }
  0xf2   : > { %357 = vrot.lane.b32.xlu1 %v476_v33, %s522_s26 }
  0xf3   : > { %333 = vrot.lane.b32.xlu0 %v474_v28, %s522_s26 }
  0xf6   : > { %369 = vrot.lane.b32.xlu1 %v477_v31, %s522_s26 }
  0xf7   : > { %364 = vrot.lane.b32.xlu0 %v481_v34, %s522_s26 }
 0x15c   : > { %v341_v35 = vpop.permute.xlu1 %340 }
 0x15d   : > { %462 = vst.msk [vmem:[%s563_s25 + $0x14] sm:$0xf] %vm294_vm2, %v341_v35  ;;  %v329_v36 = vpop.permute.xlu0 %328 }
 0x15e   : > { %459 = vst.msk [vmem:[%s563_s25 + $0x4] sm:$0xf] %vm294_vm2, %v329_v36 }
 0x160   : > { %v346_v37 = vpop.permute.xlu1 %345 }
 0x161   : > { %463 = vst.msk [vmem:[%s563_s25 + $0x1c] sm:$0xf] %vm294_vm2, %v346_v37  ;;  %v353_v38 = vpop.permute.xlu0 %352 }
 0x162   : > { %465 = vst.msk [vmem:[%s563_s25 + $0x24] sm:$0xf] %vm294_vm2, %v353_v38 }
 0x164   : > { %v358_v39 = vpop.permute.xlu1 %357 }
 0x165   : > { %466 = vst.msk [vmem:[%s563_s25 + $0x2c] sm:$0xf] %vm294_vm2, %v358_v39  ;;  %v334_v40 = vpop.permute.xlu0 %333 }
 0x166   : > { %460 = vst.msk [vmem:[%s563_s25 + $0xc] sm:$0xf] %vm294_vm2, %v334_v40 }
 0x168   : > { %v370_v41 = vpop.permute.xlu1 %369 }
 0x169   : > { %469 = vst.msk [vmem:[%s563_s25 + $0x3c] sm:$0xf] %vm294_vm2, %v370_v41  ;;  %v365_v42 = vpop.permute.xlu0 %364 }
 0x16a   : > { %468 = vst.msk [vmem:[%s563_s25 + $0x34] sm:$0xf] %vm294_vm2, %v365_v42 }
 0x16b PF: > { %s13_s12 = sadd.s32 1, %s520_s12  }
 0x16c   : > { %p10_p4 = scmp.ge.s32.totalorder %s13_s12, 4  }
 0x16e   :  { %12 = sbr.rel (!%p10_p4) target bundleno = 1 (0x1), region = 77 }

// kernel: up_forward.5
= control target key start
LH: loop header
LB: loop body
LE: loop exit
PB: predicated region body
PF: predicated region fallthrough
CT: control target
= control target key end

     0   :  { %s4787_s15 = smov 0   ;;  %s5994_s0 = inlined_call_operand.vmem [shape: bf16[2,16,16,4], index: 0, kind: input, shape index: {}]   ;;  %s5995_s1 = inlined_call_operand.vmem [shape: bf16[36,4], index: 1, kind: input, shape index: {}]   ;;  %s5996_s2 = inlined_call_operand.vmem [shape: f32[1,4], index: 2, kind: input, shape index: {}]   ;;  %s5997_s3 = inlined_call_operand.vmem [shape: f32[1,4], index: 3, kind: input, shape index: {}]   ;;  %s5998_s4 = inlined_call_operand.vmem [shape: f32[2,16,16,4], index: 4, kind: output, shape index: {}]  }
   0x1 LB: > { %s3738_s16 = sadd.s32 4294967295, %s4759_s15   ;;  %p3742_p0 = scmp.ge.s32.totalorder %s4759_s15, 1  ;;  %s4759_s15 = sphi %s4787_s15, %s14_s15  }
   0x2   : > { %p162_p1 = scmp.lt.s32.totalorder %s4759_s15, 3 }
   0x4   : > { %p163_p2 = pnand %p3742_p0, %p162_p1 }
   0x6   : > { %166 = sbr.rel (%p163_p2) target bundleno = 594 (0x252), region = 36 }
   0xd   : > { %v4798_v0 = vld [vmem:[%s5995_s1 + $0x4] ss:$0 sps:$4 sm:$0xcc]   ;;  %vm899_vm0 = vcmask 1041408   ;;  %p4802_p3 = scmp.lt.s32.totalorder %s3738_s16, 1  ;;  %vm199_vm1 = vcmask 27648  }
   0xe   : > { %vm202_vm2 = vcmask 24576   ;;  %v849_v1 = vrot.slane %v4798_v0, 2  ;;  %v4761_v2 = vmov 0   ;;  %v2227_v3 = vld [vmem:[%s5995_s1 + $0x8] sm:$0x3]  ;;  %vm850_vm8 = vcmask 31744  }
   0xf   : > { %204 = vst.msk [vmem:[#allocation2 + $0xc] sm:$0xf] %vm199_vm1, %v4761_v2  ;;  %205 = vst.msk [vmem:[#allocation2 + $0x10] sm:$0xf] %vm199_vm1, %v4761_v2  ;;  %s6091_s16 = smov (!%p4802_p3, %s3738_s16), 1  ;;  %4694 = vmatprep.subr.msk.bf16.mxu0 %vm899_vm0, %v2227_v3  ;;  %v4877_v6 = vsel %vm899_vm0, %v2227_v3, 0 }
  0x10   : > { %200 = vst.msk [vmem:[#allocation2] sm:$0xf] %vm199_vm1, %v4761_v2  ;;  %201 = vst.msk [vmem:[#allocation2 + $0x4] sm:$0xf] %vm199_vm1, %v4761_v2  ;;  %v764_v4 = vld [vmem:[%s5995_s1] sm:$0x3]  ;;  %4690 = vmatprep.subr.msk.bf16.mxu1 %vm899_vm0, %v849_v1  ;;  %4263 = vmatpush3.bf16.msra.mxu0 %v4877_v6 }
  0x11   : > { %203 = vst.msk [vmem:[#allocation2 + $0x8] sm:$0x1] %vm202_vm2, %v4761_v2  ;;  %206 = vst.msk [vmem:[#allocation2 + $0x14] sm:$0x1] %vm202_vm2, %v4761_v2  ;;  %v901_v5 = vsel %vm899_vm0, %v849_v1, 0  ;;  %s3971_s24 = sshll.u32 %s6091_s16, 7 }
  0x12   : > { %207 = vst.msk [vmem:[#allocation2 + $0x18] sm:$0xf] %vm199_vm1, %v4761_v2  ;;  %208 = vst.msk [vmem:[#allocation2 + $0x1c] sm:$0xf] %vm199_vm1, %v4761_v2  ;;  %4127 = vmatpush3.bf16.msra.mxu1 %v901_v5  ;;  %vm287_vm3 = vsmask.f32 256  ;;  %s4884_s27 = scalar_lea.vmem %s5994_s0, %s3971_s24 }
  0x13   : > { %209 = vst.msk [vmem:[#allocation2 + $0x20] sm:$0x1] %vm202_vm2, %v4761_v2  ;;  %212 = vst.msk [vmem:[#allocation2 + $0x2c] sm:$0x1] %vm202_vm2, %v4761_v2  ;;  %vm288_vm4 = vsmask.f32 4368  ;;  %4691 = vmatprep.subr.msk.bf16.mxu1 %vm899_vm0, %v764_v4 }
  0x14   : > { %210 = vst.msk [vmem:[#allocation2 + $0x24] sm:$0xf] %vm199_vm1, %v4761_v2  ;;  %211 = vst.msk [vmem:[#allocation2 + $0x28] sm:$0xf] %vm199_vm1, %v4761_v2  ;;  %vm612_vm5 = vsmask.f32 7938 }
  0x15   : > { %213 = vst.msk [vmem:[#allocation2 + $0x30] sm:$0xf] %vm199_vm1, %v4761_v2  ;;  %214 = vst.msk [vmem:[#allocation2 + $0x34] sm:$0xf] %vm199_vm1, %v4761_v2  ;;  %v4888_v7 = vsel %vm899_vm0, %v764_v4, 0  ;;  %vm2709_vm10 = vcmask 1042432  }
  0x16   : > { %215 = vst.msk [vmem:[#allocation2 + $0x38] sm:$0x1] %vm202_vm2, %v4761_v2  ;;  %218 = vst.msk [vmem:[#allocation2 + $0x44] sm:$0x1] %vm202_vm2, %v4761_v2  ;;  %v255_v8 = vld [vmem:[%s4884_s27] sm:$0xf] }
  0x17   : > { %216 = vst.msk [vmem:[#allocation2 + $0x3c] sm:$0xf] %vm199_vm1, %v4761_v2  ;;  %217 = vst.msk [vmem:[#allocation2 + $0x40] sm:$0xf] %vm199_vm1, %v4761_v2  ;;  %v256_v9 = vld [vmem:[%s4884_s27 + $0x4] sm:$0xf] }
  0x18   : > { %219 = vst.msk [vmem:[#allocation2 + $0x48] sm:$0xf] %vm199_vm1, %v4761_v2  ;;  %220 = vst.msk [vmem:[#allocation2 + $0x4c] sm:$0xf] %vm199_vm1, %v4761_v2  ;;  %v257_v10 = vld [vmem:[%s4884_s27 + $0x8] sm:$0xf] }
  0x19   : > { %221 = vst.msk [vmem:[#allocation2 + $0x50] sm:$0x1] %vm202_vm2, %v4761_v2  ;;  %224 = vst.msk [vmem:[#allocation2 + $0x5c] sm:$0x1] %vm202_vm2, %v4761_v2  ;;  %v291_v11 = vshrl.u32 %v255_v8, 16  ;;  %v294_v12 = vshll.u32 %v255_v8, 16 }
  0x1a   : > { %222 = vst.msk [vmem:[#allocation2 + $0x54] sm:$0xf] %vm199_vm1, %v4761_v2  ;;  %223 = vst.msk [vmem:[#allocation2 + $0x58] sm:$0xf] %vm199_vm1, %v4761_v2  ;;  %v299_v13 = vshrl.u32 %v256_v9, 16  ;;  %v302_v14 = vshll.u32 %v256_v9, 16 }
  0x1b   : > { %225 = vst.msk [vmem:[#allocation2 + $0x60] sm:$0xf] %vm199_vm1, %v4761_v2  ;;  %226 = vst.msk [vmem:[#allocation2 + $0x64] sm:$0xf] %vm199_vm1, %v4761_v2  ;;  %v258_v15 = vld [vmem:[%s4884_s27 + $0xc] sm:$0xf] }
  0x1c   : > { %227 = vst.msk [vmem:[#allocation2 + $0x68] sm:$0x1] %vm202_vm2, %v4761_v2  ;;  %230 = vst.msk [vmem:[#allocation2 + $0x74] sm:$0x1] %vm202_vm2, %v4761_v2  ;;  %v308_v16 = vshrl.u32 %v257_v10, 16  ;;  %v311_v17 = vshll.u32 %v257_v10, 16 }
  0x1d   : > { %228 = vst.msk [vmem:[#allocation2 + $0x6c] sm:$0xf] %vm199_vm1, %v4761_v2  ;;  %229 = vst.msk [vmem:[#allocation2 + $0x70] sm:$0xf] %vm199_vm1, %v4761_v2  ;;  %v316_v18 = vshrl.u32 %v258_v15, 16  ;;  %v319_v19 = vshll.u32 %v258_v15, 16 }
  0x1e   : > { %231 = vst.msk [vmem:[#allocation2 + $0x78] sm:$0xf] %vm199_vm1, %v4761_v2  ;;  %232 = vst.msk [vmem:[#allocation2 + $0x7c] sm:$0xf] %vm199_vm1, %v4761_v2  ;;  %v293_v21 = vrot.slane %v291_v11, 7  ;;  %v301_v22 = vrot.slane %v299_v13, 7 }
  0x1f   : > { %233 = vst.msk [vmem:[#allocation2 + $0x80] sm:$0x1] %vm202_vm2, %v4761_v2  ;;  %236 = vst.msk [vmem:[#allocation2 + $0x8c] sm:$0x1] %vm202_vm2, %v4761_v2  ;;  %v614_v23 = vld [vmem:[#allocation2 + $0xc] sm:$0xf] }
  0x20   : > { %234 = vst.msk [vmem:[#allocation2 + $0x84] sm:$0xf] %vm199_vm1, %v4761_v2  ;;  %235 = vst.msk [vmem:[#allocation2 + $0x88] sm:$0xf] %vm199_vm1, %v4761_v2  ;;  %v259_v24 = vld [vmem:[%s4884_s27 + $0x10] sm:$0xf]  ;;  %v296_v31 = vor.u32 %v294_v12, %v293_v21  ;;  %v304_v33 = vor.u32 %v302_v14, %v301_v22 }
  0x21   : > { %237 = vst.msk [vmem:[#allocation2 + $0x90] sm:$0xf] %vm199_vm1, %v4761_v2  ;;  %238 = vst.msk [vmem:[#allocation2 + $0x94] sm:$0xf] %vm199_vm1, %v4761_v2  ;;  %v310_v26 = vrot.slane %v308_v16, 7  ;;  %v318_v27 = vrot.slane %v316_v18, 7 }
  0x22   : > { %239 = vst.msk [vmem:[#allocation2 + $0x98] sm:$0x1] %vm202_vm2, %v4761_v2  ;;  %242 = vst.msk [vmem:[#allocation2 + $0xa4] sm:$0x1] %vm202_vm2, %v4761_v2  ;;  %v260_v28 = vld [vmem:[%s4884_s27 + $0x14] sm:$0xf] }
  0x23   : > { %240 = vst.msk [vmem:[#allocation2 + $0x9c] sm:$0xf] %vm199_vm1, %v4761_v2  ;;  %241 = vst.msk [vmem:[#allocation2 + $0xa0] sm:$0xf] %vm199_vm1, %v4761_v2  ;;  %v325_v29 = vshrl.u32 %v259_v24, 16  ;;  %v328_v30 = vshll.u32 %v259_v24, 16  ;;  %v313_v37 = vor.u32 %v311_v17, %v310_v26  ;;  %v321_v39 = vor.u32 %v319_v19, %v318_v27 }
  0x24   : > { %243 = vst.msk [vmem:[#allocation2 + $0xa8] sm:$0xf] %vm199_vm1, %v4761_v2  ;;  %244 = vst.msk [vmem:[#allocation2 + $0xac] sm:$0xf] %vm199_vm1, %v4761_v2  ;;  %v297_v32 = vrot.slane %v293_v21, 4  ;;  %v306_v34 = vrot.slane %v301_v22, 4 }
  0x25   : > { %245 = vst.msk [vmem:[#allocation2 + $0xb0] sm:$0x1] %vm202_vm2, %v4761_v2  ;;  %248 = vst.msk [vmem:[#allocation2 + $0xbc] sm:$0x1] %vm202_vm2, %v4761_v2  ;;  %v623_v35 = vld [vmem:[#allocation2 + $0x18] sm:$0xf] }
  0x26   : > { %246 = vst.msk [vmem:[#allocation2 + $0xb4] sm:$0xf] %vm199_vm1, %v4761_v2  ;;  %247 = vst.msk [vmem:[#allocation2 + $0xb8] sm:$0xf] %vm199_vm1, %v4761_v2  ;;  %v261_v36 = vld [vmem:[%s4884_s27 + $0x18] sm:$0xf] }
  0x27   : > { %249 = vst.msk [vmem:[#allocation2 + $0xc0] sm:$0xf] %vm199_vm1, %v4761_v2  ;;  %250 = vst.msk [vmem:[#allocation2 + $0xc4] sm:$0xf] %vm199_vm1, %v4761_v2  ;;  %v314_v38 = vrot.slane %v310_v26, 4  ;;  %v323_v40 = vrot.slane %v318_v27, 4 }
  0x28   : > { %251 = vst.msk [vmem:[#allocation2 + $0xc8] sm:$0x1] %vm202_vm2, %v4761_v2  ;;  %254 = vst.msk [vmem:[#allocation2 + $0xd4] sm:$0x1] %vm202_vm2, %v4761_v2  ;;  %v327_v45 = vrot.slane %v325_v29, 7  ;;  %v333_v46 = vshrl.u32 %v260_v28, 16 }
  0x29   : > { %252 = vst.msk [vmem:[#allocation2 + $0xcc] sm:$0xf] %vm199_vm1, %v4761_v2  ;;  %253 = vst.msk [vmem:[#allocation2 + $0xd0] sm:$0xf] %vm199_vm1, %v4761_v2  ;;  %v262_v47 = vld [vmem:[%s4884_s27 + $0x1c] sm:$0xf] }
  0x2a   : > { %6031 = vst [vmem:[#allocation3_spill] sm:$0xff] %v4877_v6  ;;  %vm4896_vm6 = vmor %vm287_vm3, %vm288_vm4  ;;  %v4714_v41 = vld [vmem:[%s5995_s1 + $0xc] ss:$0 sps:$4 sm:$0xcc]   ;;  %v620_v48 = vld [vmem:[#allocation2 + $0x14] sm:$0x1]  ;;  %v330_v54 = vor.u32 %v328_v30, %v327_v45 }
  0x2b   : > { %vm4903_vm7 = vmand %vm199_vm1, %vm612_vm5  ;;  %v305_v42 = vsel %vm4896_vm6, %v297_v32, %v304_v33  ;;  %vm2710_vm11 = vcmask 1046532   ;;  %v322_v49 = vsel %vm4896_vm6, %v314_v38, %v321_v39  ;;  %v336_v51 = vshll.u32 %v260_v28, 16  ;;  %v630_v52 = vld [vmem:[#allocation2 + $0x24] sm:$0xf]  ;;  %v627_v58 = vld [vmem:[#allocation2 + $0x20] sm:$0x1] }
  0x2c   : > { %v615_v43 = vsel %vm4903_vm7, %v296_v31, %v614_v23  ;;  %vm4918_vm9 = vmand %vm202_vm2, %vm287_vm3  ;;  %617 = vst.msk [vmem:[#allocation2 + $0x10] sm:$0xf] %vm199_vm1, %v305_v42  ;;  %v624_v50 = vsel %vm4903_vm7, %v313_v37, %v623_v35  ;;  %v342_v53 = vshrl.u32 %v261_v36, 16  ;;  %v331_v55 = vrot.slane %v327_v45, 4  ;;  %v263_v63 = vld [vmem:[%s4884_s27 + $0x20] sm:$0xf] }
  0x2d   : > { %616 = vst [vmem:[#allocation2 + $0xc] sm:$0xf] %v615_v43  ;;  %625 = vst [vmem:[#allocation2 + $0x18] sm:$0xf] %v624_v50  ;;  %v335_v56 = vrot.slane %v333_v46, 7  ;;  %v345_v57 = vshll.u32 %v261_v36, 16  ;;  %v621_v62 = vsel %vm4918_vm9, %v306_v34, %v620_v48  ;;  %v631_v2 = vsel %vm4903_vm7, %v330_v54, %v630_v52 }
  0x2e   : > { %626 = vst.msk [vmem:[#allocation2 + $0x1c] sm:$0xf] %vm199_vm1, %v322_v49  ;;  %v344_v59 = vrot.slane %v342_v53, 7  ;;  %v350_v60 = vshrl.u32 %v262_v47, 16  ;;  %v353_v61 = vshll.u32 %v262_v47, 16  ;;  %v2437_v4 = vrot.slane %v4714_v41, 2  ;;  %vm4965_vm14 = vmor %vm2709_vm10, %vm2710_vm11 }
  0x2f   : > { %v338_v0 = vor.u32 %v336_v51, %v335_v56  ;;  %v340_v1 = vrot.slane %v335_v56, 4  ;;  %v637_v3 = vld [vmem:[#allocation2 + $0x30] sm:$0xf]  ;;  %622 = vst [vmem:[#allocation2 + $0x14] sm:$0x1] %v621_v62  ;;  %v628_v11 = vsel %vm4918_vm9, %v323_v40, %v627_v58  ;;  %v359_v15 = vshrl.u32 %v263_v63, 16 }
  0x30   : > { %v4935_v5 = vld [vmem:[%s4884_s27 + $0x24] sm:$0xf]  ;;  %632 = vst [vmem:[#allocation2 + $0x24] sm:$0xf] %v631_v2  ;;  %v347_v8 = vor.u32 %v345_v57, %v344_v59  ;;  %v348_v9 = vrot.slane %v344_v59, 4  ;;  %v352_v10 = vrot.slane %v350_v60, 7  ;;  %4696 = vmatprep.subr.msk.bf16.mxu0 %vm899_vm0, %v2437_v4 }
  0x31   : > { %vm1495_vm12 = vsmask.f32 3328  ;;  %vm1496_vm13 = vsmask.f32 7440  ;;  %v634_v12 = vld [vmem:[#allocation2 + $0x2c] sm:$0x1]  ;;  %v339_v13 = vsel %vm4896_vm6, %v331_v55, %v338_v0 }
  0x32   : > { %629 = vst [vmem:[#allocation2 + $0x20] sm:$0x1] %v628_v11  ;;  %v4943_v14 = vsel %vm899_vm0, %v2437_v4, 0  ;;  %v362_v16 = vshll.u32 %v263_v63, 16  ;;  %v641_v17 = vld [vmem:[#allocation2 + $0x38] sm:$0x1]  ;;  %v355_v18 = vor.u32 %v353_v61, %v352_v10  ;;  %v638_v21 = vsel %vm4903_vm7, %v347_v8, %v637_v3  ;;  %vm4977_vm15 = vmor %vm1495_vm12, %vm1496_vm13 }
  0x33   : > { %633 = vst.msk [vmem:[#allocation2 + $0x28] sm:$0xf] %vm199_vm1, %v339_v13  ;;  %v357_v19 = vrot.slane %v352_v10, 4  ;;  %v367_v22 = vshrl.u32 %v4935_v5, 16  ;;  %639 = vst [vmem:[#allocation2 + $0x30] sm:$0xf] %v638_v21  ;;  %v635_v26 = vsel %vm4918_vm9, %v340_v1, %v634_v12 }
  0x34   : > { %v4710_v23 = vld [vmem:[#allocation2 + $0xc] sm:$0xff]   ;;  %v4949_v24 = vrot.slane %v359_v15, 7  ;;  %v356_v28 = vsel %vm4896_vm6, %v348_v9, %v355_v18  ;;  %636 = vst [vmem:[#allocation2 + $0x2c] sm:$0x1] %v635_v26  ;;  %v644_v35 = vld [vmem:[#allocation2 + $0x3c] sm:$0xf] }
  0x35   : > { %v4711_v27 = vld [vmem:[#allocation2 + $0x18] sm:$0xff]   ;;  %v4955_v29 = vrot.slane %v367_v22, 7  ;;  %v642_v30 = vsel %vm4918_vm9, %v357_v19, %v641_v17  ;;  %4128 = vmatprep.mubr.msk.bf16.mxu1 %vm850_vm8, %v4710_v23  ;;  %640 = vst.msk [vmem:[#allocation2 + $0x34] sm:$0xf] %vm199_vm1, %v356_v28  ;;  %v1444_v31 = vld [vmem:[#allocation2 + $0xc] sm:$0xf] }
  0x36   : > { %v1445_v32 = vld [vmem:[#allocation2 + $0x10] sm:$0xf]  ;;  %v2638_v33 = vld [vmem:[#allocation2 + $0xc] sm:$0xe]  ;;  %v364_v34 = vor.u32 %v362_v16, %v4949_v24  ;;  %643 = vst [vmem:[#allocation2 + $0x38] sm:$0x1] %v642_v30  ;;  %4129 = vmatmul.mubr.msk.bf16.vlgmr.msra.gmra.mrb[0].mxu1 %vm850_vm8, %v4711_v27 }
  0x37   : > { %v1446_v36 = vld [vmem:[#allocation2 + $0x14] sm:$0x1]  ;;  %v1523_v37 = vshrl.u32 %v1444_v31, 16  ;;  %v1526_v38 = vshll.u32 %v1444_v31, 16  ;;  %v1532_v39 = vshll.u32 %v1445_v32, 16  ;;  %v1536_v40 = vshrl.u32 %v1445_v32, 16  ;;  %4161 = vmatpush3.bf16.msra.mxu1 %v4888_v7 }
  0x38   : > { %v1542_v42 = vshll.u32 %v1446_v36, 16  ;;  %v3883_v43 = vrot.slane %v2638_v33, 9  ;;  %v2721_v45 = vrot.slane %v1445_v32, 5  ;;  %v2724_v46 = vrot.slane %v1446_v36, 5  ;;  %v1447_v51 = vld [vmem:[#allocation2 + $0x18] sm:$0xf] }
  0x39   : > { %v1525_v47 = vrot.slane %v1523_v37, 4  ;;  %v1528_v48 = vrot.slane %v1526_v38, 5  ;;  %v1534_v49 = vrot.slane %v1532_v39, 5  ;;  %v1538_v50 = vrot.slane %v1536_v40, 4  ;;  %v1448_v59 = vld [vmem:[#allocation2 + $0x1c] sm:$0xf] }
  0x3a   : > { %v4712_v52 = vld [vmem:[#allocation2 + $0x24] sm:$0xff]   ;;  %v1544_v53 = vrot.slane %v1542_v42, 5  ;;  %v2722_v54 = vsel %vm4965_vm14, %v3883_v43, %v2721_v45  ;;  %v2723_v55 = vrot.slane %v2721_v45, 4  ;;  %v1547_v56 = vshrl.u32 %v1447_v51, 16  ;;  %v1449_v60 = vld [vmem:[#allocation2 + $0x20] sm:$0x1] }
  0x3b   : > { %v1529_v57 = vor.u32 %v1528_v48, %v1525_v47  ;;  %v1539_v58 = vor.u32 %v1538_v50, %v1534_v49  ;;  %v645_v61 = vsel %vm4903_vm7, %v364_v34, %v644_v35  ;;  %4132 = vmatprep.mubr.msk.bf16.mxu1 %vm850_vm8, %v4712_v52  ;;  %v1550_v0 = vshll.u32 %v1447_v51, 16  ;;  %v265_v15 = vld [vmem:[%s4884_s27 + $0x28] sm:$0xf]  ;;  %v266_v21 = vld [vmem:[%s4884_s27 + $0x2c] sm:$0xf]  ;;  %s3972_s22 = sshll.u32 %s6091_s16, 8 }
  0x3c   : > { %v2725_v62 = vsel %vm4965_vm14, %v2723_v55, %v2724_v46  ;;  %v1549_v63 = vrot.slane %v1547_v56, 4  ;;  %v1556_v1 = vshll.u32 %v1448_v59, 16  ;;  %646 = vst [vmem:[#allocation2 + $0x3c] sm:$0xf] %v645_v61  ;;  %v4713_v2 = vld [vmem:[#allocation2 + $0x30] sm:$0xff]   ;;  %v1560_v9 = vshrl.u32 %v1448_v59, 16  ;;  %s5859_s25 = scalar_lea.vmem %s5998_s4, %s3972_s22 }
  0x3d   : > { %v1530_v3 = vrot.slane %v1529_v57, 4  ;;  %v1540_v4 = vrot.slane %v1539_v58, 4  ;;  %v4983_v8 = vcombine.low %v2722_v54, %v2725_v62  ;;  %v1552_v10 = vrot.slane %v1550_v0, 5  ;;  %v1450_v22 = vld [vmem:[#allocation2 + $0x24] sm:$0xf] }
  0x3e   : > { %v1558_v11 = vrot.slane %v1556_v1, 5  ;;  %v1566_v12 = vshll.u32 %v1449_v60, 16  ;;  %v365_v13 = vrot.slane %v4949_v24, 4  ;;  %4133 = vmatmul.mubr.msk.bf16.gmra.mrb[4].mxu1 %vm850_vm8, %v4713_v2  ;;  %v1562_v18 = vrot.slane %v1560_v9, 4  ;;  %v1451_v33 = vld [vmem:[#allocation2 + $0x28] sm:$0xf] }
  0x3f   : > { %v1535_v16 = vsel %vm4977_vm15, %v1530_v3, %v1534_v49  ;;  %v1545_v17 = vsel %vm4977_vm15, %v1540_v4, %v1544_v53  ;;  %v370_v19 = vshll.u32 %v4935_v5, 16  ;;  %v1553_v26 = vor.u32 %v1552_v10, %v1549_v63  ;;  %v651_v36 = vld [vmem:[#allocation2 + $0x48] sm:$0xf]  ;;  %v1452_v46 = vld [vmem:[#allocation2 + $0x2c] sm:$0x1] }
  0x40   : > { %v4994_v23 = vcombine.low %v1535_v16, %v1545_v17  ;;  %v1568_v27 = vrot.slane %v1566_v12, 5  ;;  %v374_v24 = vrot.slane %v4955_v29, 4  ;;  %v1563_v28 = vor.u32 %v1562_v18, %v1558_v11  ;;  %v1453_v53 = vld [vmem:[#allocation2 + $0x30] sm:$0xf]  ;;  %v1454_v54 = vld [vmem:[#allocation2 + $0x34] sm:$0xf] }
  0x41   : > { %v372_v30 = vor.u32 %v370_v19, %v4955_v29  ;;  %v376_v31 = vshrl.u32 %v265_v15, 16  ;;  %v379_v32 = vshll.u32 %v265_v15, 16  ;;  %v1554_v34 = vrot.slane %v1553_v26, 4  ;;  %v1455_v63 = vld [vmem:[#allocation2 + $0x38] sm:$0x1] }
  0x42   : > { %6042 = vst [vmem:[#allocation4_spill] sm:$0xff] %v4994_v23  ;;  %4264 = vmatprep.mubr.msk.bf16.mxu0 %vm850_vm8, %v4994_v23  ;;  %v384_v35 = vshrl.u32 %v266_v21, 16  ;;  %v387_v5 = vshll.u32 %v266_v21, 16  ;;  %v1571_v37 = vshrl.u32 %v1450_v22, 16  ;;  %v1564_v38 = vrot.slane %v1563_v28, 4 }
  0x43   : > { %v373_v39 = vsel %vm4896_vm6, %v365_v13, %v372_v30  ;;  %v378_v40 = vrot.slane %v376_v31, 7  ;;  %v1574_v42 = vshll.u32 %v1450_v22, 16  ;;  %v1559_v43 = vsel %vm4977_vm15, %v1554_v34, %v1558_v11  ;;  %v5018_v0 = vld [vmem:[%s5995_s1 + $0x4] sm:$0x3]  ;;  %v267_v9 = vld [vmem:[%s4884_s27 + $0x30] sm:$0xf] }
  0x44   : > { %647 = vst.msk [vmem:[#allocation2 + $0x40] sm:$0xf] %vm199_vm1, %v373_v39  ;;  %v5005_v45 = vrot.slane %v384_v35, 7  ;;  %v1573_v47 = vrot.slane %v1571_v37, 4  ;;  %v1580_v48 = vshll.u32 %v1451_v33, 16  ;;  %v1569_v49 = vsel %vm4977_vm15, %v1564_v38, %v1568_v27 }
  0x45   : > { %v381_v50 = vor.u32 %v379_v32, %v378_v40  ;;  %v382_v51 = vrot.slane %v378_v40, 4  ;;  %v1576_v52 = vrot.slane %v1574_v42, 5  ;;  %v5009_v55 = vcombine.low %v1559_v43, %v1569_v49  ;;  %v268_v15 = vld [vmem:[%s4884_s27 + $0x34] sm:$0xf]  ;;  %v269_v21 = vld [vmem:[%s4884_s27 + $0x38] sm:$0xf] }
  0x46   : > { %v389_v56 = vor.u32 %v387_v5, %v5005_v45  ;;  %v391_v57 = vrot.slane %v5005_v45, 4  ;;  %v1582_v58 = vrot.slane %v1580_v48, 5  ;;  %v1584_v61 = vshrl.u32 %v1451_v33, 16  ;;  %v658_v37 = vld [vmem:[#allocation2 + $0x54] sm:$0xf] }
  0x47   : > { %6043 = vst [vmem:[#allocation5_spill] sm:$0xff] %v5009_v55  ;;  %v652_v59 = vsel %vm4903_vm7, %v381_v50, %v651_v36  ;;  %v1577_v60 = vor.u32 %v1576_v52, %v1573_v47  ;;  %v1590_v62 = vshll.u32 %v1452_v46, 16  ;;  %4265 = vmatmul.mubr.msk.bf16.vlgmr.msra.gmra.mrb[0].mxu0 %vm850_vm8, %v5009_v55  ;;  %v1595_v2 = vshrl.u32 %v1453_v53, 16  ;;  %v270_v40 = vld [vmem:[%s4884_s27 + $0x3c] sm:$0xf] }
  0x48   : > { %v390_v1 = vsel %vm4896_vm6, %v382_v51, %v389_v56  ;;  %653 = vst [vmem:[#allocation2 + $0x48] sm:$0xf] %v652_v59  ;;  %v1598_v3 = vshll.u32 %v1453_v53, 16  ;;  %v1604_v4 = vshll.u32 %v1454_v54, 16  ;;  %4297 = vmatpush3.bf16.msra.mxu0 %v4943_v14  ;;  %v1586_v11 = vrot.slane %v1584_v61, 4 }
  0x49   : > { %654 = vst.msk [vmem:[#allocation2 + $0x4c] sm:$0xf] %vm199_vm1, %v390_v1  ;;  %v1578_v10 = vrot.slane %v1577_v60, 4  ;;  %v1592_v12 = vrot.slane %v1590_v62, 5  ;;  %v1608_v13 = vshrl.u32 %v1454_v54, 16  ;;  %v1597_v16 = vrot.slane %v1595_v2, 4  ;;  %4697 = vmatprep.subr.msk.bf16.mxu0 %vm899_vm0, %v5018_v0 }
  0x4a   : > { %v1600_v17 = vrot.slane %v1598_v3, 5  ;;  %v1606_v18 = vrot.slane %v1604_v4, 5  ;;  %v1614_v19 = vshll.u32 %v1455_v63, 16  ;;  %v1587_v14 = vor.u32 %v1586_v11, %v1582_v58  ;;  %v648_v50 = vld [vmem:[#allocation2 + $0x44] sm:$0x1] }
  0x4b   : > { %v4715_v22 = vld [vmem:[#allocation2 + $0x3c] sm:$0xff]   ;;  %v1583_v26 = vsel %vm4977_vm15, %v1578_v10, %v1582_v58  ;;  %v1610_v27 = vrot.slane %v1608_v13, 4  ;;  %v393_v28 = vshrl.u32 %v267_v9, 16  ;;  %v396_v32 = vshll.u32 %v267_v9, 16  ;;  %v655_v1 = vld [vmem:[#allocation2 + $0x50] sm:$0x1] }
  0x4c   : > { %v1601_v30 = vor.u32 %v1600_v17, %v1597_v16  ;;  %v1616_v31 = vrot.slane %v1614_v19, 5  ;;  %v401_v33 = vshrl.u32 %v268_v15, 16  ;;  %4136 = vmatprep.mubr.msk.bf16.mxu1 %vm850_vm8, %v4715_v22  ;;  %v1588_v34 = vrot.slane %v1587_v14, 4  ;;  %v1456_v58 = vld [vmem:[#allocation2 + $0x3c] sm:$0xf] }
  0x4d   : > { %v1611_v35 = vor.u32 %v1610_v27, %v1606_v18  ;;  %v395_v5 = vrot.slane %v393_v28, 7  ;;  %v404_v36 = vshll.u32 %v268_v15, 16  ;;  %v410_v42 = vshrl.u32 %v269_v21, 16  ;;  %v1457_v63 = vld [vmem:[#allocation2 + $0x40] sm:$0xf] }
  0x4e   : > { %v1602_v38 = vrot.slane %v1601_v30, 4  ;;  %v5034_v39 = vrot.slane %v401_v33, 7  ;;  %v413_v43 = vshll.u32 %v269_v21, 16  ;;  %v1593_v46 = vsel %vm4977_vm15, %v1588_v34, %v1592_v12  ;;  %v665_v9 = vld [vmem:[#allocation2 + $0x60] sm:$0xf] }
  0x4f   : > { %v1612_v47 = vrot.slane %v1611_v35, 4  ;;  %v398_v48 = vor.u32 %v396_v32, %v395_v5  ;;  %v399_v49 = vrot.slane %v395_v5, 4  ;;  %v5039_v52 = vcombine.low %v1583_v26, %v1593_v46  ;;  %v1459_v16 = vld [vmem:[#allocation2 + $0x48] sm:$0xf]  ;;  %v271_v27 = vld [vmem:[%s4884_s27 + $0x40] sm:$0xf] }
  0x50   : > { %v4716_v51 = vld [vmem:[#allocation2 + $0x48] sm:$0xff]   ;;  %v1607_v53 = vsel %vm4977_vm15, %v1602_v38, %v1606_v18  ;;  %v406_v54 = vor.u32 %v404_v36, %v5034_v39  ;;  %v408_v56 = vrot.slane %v5034_v39, 4  ;;  %v412_v61 = vrot.slane %v410_v42, 7  ;;  %v662_v33 = vld [vmem:[#allocation2 + $0x5c] sm:$0x1] }
  0x51   : > { %6044 = vst [vmem:[#allocation6_spill] sm:$0xff] %v5039_v52  ;;  %v1617_v59 = vsel %vm4977_vm15, %v1612_v47, %v1616_v31  ;;  %v659_v60 = vsel %vm4903_vm7, %v398_v48, %v658_v37  ;;  %v418_v62 = vshrl.u32 %v270_v40, 16  ;;  %4137 = vmatmul.mubr.msk.bf16.gmra.mrb[8].mxu1 %vm850_vm8, %v4716_v51  ;;  %4268 = vmatprep.mubr.msk.bf16.mxu0 %vm850_vm8, %v5039_v52  ;;  %v421_v4 = vshll.u32 %v270_v40, 16  ;;  %v669_v5 = vld [vmem:[#allocation2 + $0x68] sm:$0x1] }
  0x52   : > { %v5052_v2 = vcombine.low %v1607_v53, %v1617_v59  ;;  %v407_v3 = vsel %vm4896_vm6, %v399_v49, %v406_v54  ;;  %660 = vst [vmem:[#allocation2 + $0x54] sm:$0xf] %v659_v60  ;;  %v649_v10 = vsel %vm4918_vm9, %v374_v24, %v648_v50  ;;  %v415_v11 = vor.u32 %v413_v43, %v412_v61  ;;  %v1460_v24 = vld [vmem:[#allocation2 + $0x4c] sm:$0xf]  ;;  %v272_v39 = vld [vmem:[%s4884_s27 + $0x44] sm:$0xf] }
  0x53   : > { %661 = vst.msk [vmem:[#allocation2 + $0x58] sm:$0xf] %vm199_vm1, %v407_v3  ;;  %v416_v12 = vrot.slane %v412_v61, 4  ;;  %v420_v13 = vrot.slane %v418_v62, 7  ;;  %650 = vst [vmem:[#allocation2 + $0x44] sm:$0x1] %v649_v10  ;;  %v656_v29 = vsel %vm4918_vm9, %v391_v57, %v655_v1  ;;  %v663_v51 = vsel %vm4918_vm9, %v408_v56, %v662_v33 }
  0x54   : > { %6045 = vst [vmem:[#allocation7_spill] sm:$0xff] %v5052_v2  ;;  %v1619_v15 = vshrl.u32 %v1456_v58, 16  ;;  %4269 = vmatmul.mubr.msk.bf16.gmra.mrb[4].mxu0 %vm850_vm8, %v5052_v2  ;;  %v1622_v17 = vshll.u32 %v1456_v58, 16  ;;  %v1628_v18 = vshll.u32 %v1457_v63, 16  ;;  %v1632_v19 = vshrl.u32 %v1457_v63, 16 }
  0x55   : > { %v423_v21 = vor.u32 %v421_v4, %v420_v13  ;;  %v425_v22 = vrot.slane %v420_v13, 4  ;;  %v666_v26 = vsel %vm4903_vm7, %v415_v11, %v665_v9  ;;  %657 = vst [vmem:[#allocation2 + $0x50] sm:$0x1] %v656_v29  ;;  %v1643_v32 = vshrl.u32 %v1459_v16, 16  ;;  %v672_v61 = vld [vmem:[#allocation2 + $0x6c] sm:$0xf] }
  0x56   : > { %v1621_v14 = vrot.slane %v1619_v15, 4  ;;  %667 = vst [vmem:[#allocation2 + $0x60] sm:$0xf] %v666_v26  ;;  %v1624_v28 = vrot.slane %v1622_v17, 5  ;;  %v1630_v30 = vrot.slane %v1628_v18, 5  ;;  %v1634_v31 = vrot.slane %v1632_v19, 4 }
  0x57   : > { %v424_v45 = vsel %vm4896_vm6, %v416_v12, %v423_v21  ;;  %v1646_v57 = vshll.u32 %v1459_v16, 16  ;;  %v1652_v34 = vshll.u32 %v1460_v24, 16  ;;  %v1656_v35 = vshrl.u32 %v1460_v24, 16  ;;  %v273_v62 = vld [vmem:[%s4884_s27 + $0x48] sm:$0xf] }
  0x58   : > { %668 = vst.msk [vmem:[#allocation2 + $0x64] sm:$0xf] %vm199_vm1, %v424_v45  ;;  %v1625_v36 = vor.u32 %v1624_v28, %v1621_v14  ;;  %v1635_v37 = vor.u32 %v1634_v31, %v1630_v30  ;;  %v1645_v38 = vrot.slane %v1643_v32, 4  ;;  %v427_v40 = vshrl.u32 %v271_v27, 16  ;;  %664 = vst [vmem:[#allocation2 + $0x5c] sm:$0x1] %v663_v51 }
  0x59   : > { %v1648_v42 = vrot.slane %v1646_v57, 5  ;;  %v1654_v43 = vrot.slane %v1652_v34, 5  ;;  %v1658_v46 = vrot.slane %v1656_v35, 4  ;;  %v430_v47 = vshll.u32 %v271_v27, 16  ;;  %v274_v9 = vld [vmem:[%s4884_s27 + $0x4c] sm:$0xf] }
  0x5a   : > { %v5074_v48 = vld [vmem:[#allocation2 + $0x54] sm:$0xff]   ;;  %v5076_v49 = vld [vmem:[#allocation2 + $0x44] sm:$0x1]  ;;  %v1626_v50 = vrot.slane %v1625_v36, 4  ;;  %v670_v53 = vsel %vm4918_vm9, %v425_v22, %v669_v5  ;;  %v1636_v54 = vrot.slane %v1635_v37, 4  ;;  %v429_v1 = vrot.slane %v427_v40, 7 }
  0x5b   : > { %v1638_v58 = vshll.u32 %v5076_v49, 16  ;;  %v1649_v59 = vor.u32 %v1648_v42, %v1645_v38  ;;  %v1659_v60 = vor.u32 %v1658_v46, %v1654_v43  ;;  %671 = vst [vmem:[#allocation2 + $0x68] sm:$0x1] %v670_v53  ;;  %4140 = vmatprep.mubr.msk.bf16.mxu1 %vm850_vm8, %v5074_v48  ;;  %v435_v3 = vshrl.u32 %v272_v39, 16  ;;  %v1462_v19 = vld [vmem:[#allocation2 + $0x54] sm:$0xf] }
  0x5c   : > { %v1631_v63 = vsel %vm4977_vm15, %v1626_v50, %v1630_v30  ;;  %v1461_v56 = vld [vmem:[#allocation2 + $0x50] sm:$0x1]  ;;  %v438_v4 = vshll.u32 %v272_v39, 16  ;;  %v432_v15 = vor.u32 %v430_v47, %v429_v1  ;;  %v433_v16 = vrot.slane %v429_v1, 4  ;;  %v5103_v31 = vld [vmem:[#allocation2 + $0x58] sm:$0xf] }
  0x5d   : > { %v1640_v10 = vrot.slane %v1638_v58, 5  ;;  %v1650_v11 = vrot.slane %v1649_v59, 4  ;;  %v1660_v12 = vrot.slane %v1659_v60, 4  ;;  %v1662_v13 = vshll.u32 %v1461_v56, 16  ;;  %v679_v5 = vld [vmem:[#allocation2 + $0x78] sm:$0xf] }
  0x5e   : > { %v5089_v17 = vrot.slane %v435_v3, 7  ;;  %v444_v18 = vshrl.u32 %v273_v62, 16  ;;  %v447_v26 = vshll.u32 %v273_v62, 16  ;;  %v673_v30 = vsel %vm4903_vm7, %v432_v15, %v672_v61  ;;  %v1465_v46 = vld [vmem:[#allocation2 + $0x60] sm:$0xf] }
  0x5f   : > { %v5091_v29 = vld [vmem:[#allocation2 + $0x60] sm:$0xff]   ;;  %v1641_v24 = vsel %vm4977_vm15, %v1636_v54, %v1640_v10  ;;  %v1655_v21 = vsel %vm4977_vm15, %v1650_v11, %v1654_v43  ;;  %v1664_v22 = vrot.slane %v1662_v13, 5  ;;  %674 = vst [vmem:[#allocation2 + $0x6c] sm:$0xf] %v673_v30  ;;  %v452_v45 = vshrl.u32 %v274_v9, 16 }
  0x60   : > { %v5097_v14 = vcombine.low %v1631_v63, %v1641_v24  ;;  %v440_v27 = vor.u32 %v438_v4, %v5089_v17  ;;  %v442_v28 = vrot.slane %v5089_v17, 4  ;;  %4141 = vmatmul.mubr.msk.bf16.gmra.mrb[12].mxu1 %vm850_vm8, %v5091_v29  ;;  %v446_v33 = vrot.slane %v444_v18, 7  ;;  %v5115_v36 = vld [vmem:[#allocation2 + $0x5c] sm:$0x1]  ;;  %v1466_v54 = vld [vmem:[#allocation2 + $0x64] sm:$0xf] }
  0x61   : > { %v1665_v32 = vsel %vm4977_vm15, %v1660_v12, %v1664_v22  ;;  %v455_v57 = vshll.u32 %v274_v9, 16  ;;  %v1667_v37 = vshrl.u32 %v1462_v19, 16  ;;  %v1670_v38 = vshll.u32 %v1462_v19, 16  ;;  %v275_v58 = vld [vmem:[%s4884_s27 + $0x50] sm:$0xf] }
  0x62   : > { %6046 = vst [vmem:[#allocation8_spill] sm:$0xff] %v5097_v14  ;;  %4272 = vmatprep.mubr.msk.bf16.mxu0 %vm850_vm8, %v5097_v14  ;;  %v5111_v34 = vcombine.low %v1655_v21, %v1665_v32  ;;  %v441_v35 = vsel %vm4896_vm6, %v433_v16, %v440_v27  ;;  %v449_v39 = vor.u32 %v447_v26, %v446_v33  ;;  %v450_v40 = vrot.slane %v446_v33, 4  ;;  %v1467_v63 = vld [vmem:[#allocation2 + $0x68] sm:$0x1]  ;;  %v276_v13 = vld [vmem:[%s4884_s27 + $0x54] sm:$0xf] }
  0x63   : > { %675 = vst.msk [vmem:[#allocation2 + $0x70] sm:$0xf] %vm199_vm1, %v441_v35  ;;  %v5118_v42 = vrot.slane %v452_v45, 7  ;;  %v1676_v43 = vshll.u32 %v5103_v31, 16  ;;  %v1669_v47 = vrot.slane %v1667_v37, 4  ;;  %v1672_v50 = vrot.slane %v1670_v38, 5 }
  0x64   : > { %6047 = vst [vmem:[#allocation9_spill] sm:$0xff] %v5111_v34  ;;  %4273 = vmatmul.mubr.msk.bf16.gmra.mrb[8].mxu0 %vm850_vm8, %v5111_v34  ;;  %v1680_v51 = vshrl.u32 %v5103_v31, 16  ;;  %v1686_v53 = vshll.u32 %v5115_v36, 16  ;;  %v680_v61 = vsel %vm4903_vm7, %v449_v39, %v679_v5  ;;  %v1691_v4 = vshrl.u32 %v1465_v46, 16  ;;  %v277_v27 = vld [vmem:[%s4884_s27 + $0x58] sm:$0xf] }
  0x65   : > { %v457_v59 = vor.u32 %v455_v57, %v5118_v42  ;;  %v459_v60 = vrot.slane %v5118_v42, 4  ;;  %v1678_v62 = vrot.slane %v1676_v43, 5  ;;  %681 = vst [vmem:[#allocation2 + $0x78] sm:$0xf] %v680_v61  ;;  %v1673_v56 = vor.u32 %v1672_v50, %v1669_v47  ;;  %v278_v39 = vld [vmem:[%s4884_s27 + $0x5c] sm:$0xf] }
  0x66   : > { %v1682_v1 = vrot.slane %v1680_v51, 4  ;;  %v1688_v3 = vrot.slane %v1686_v53, 5  ;;  %v1694_v10 = vshll.u32 %v1465_v46, 16  ;;  %v1700_v11 = vshll.u32 %v1466_v54, 16  ;;  %v686_v47 = vld [vmem:[#allocation2 + $0x84] sm:$0xf] }
  0x67   : > { %v458_v9 = vsel %vm4896_vm6, %v450_v40, %v457_v59  ;;  %v1704_v12 = vshrl.u32 %v1466_v54, 16  ;;  %v1674_v15 = vrot.slane %v1673_v56, 4  ;;  %v1693_v18 = vrot.slane %v1691_v4, 4  ;;  %v5143_v40 = vld [vmem:[%s5995_s1 + $0xc] sm:$0x3] }
  0x68   : > { %682 = vst.msk [vmem:[#allocation2 + $0x7c] sm:$0xf] %vm199_vm1, %v458_v9  ;;  %v1683_v16 = vor.u32 %v1682_v1, %v1678_v62  ;;  %v1710_v19 = vshll.u32 %v1467_v63, 16  ;;  %v1696_v24 = vrot.slane %v1694_v10, 5  ;;  %v1702_v21 = vrot.slane %v1700_v11, 5  ;;  %4692 = vmatprep.subr.msk.bf16.mxu1 %vm899_vm0, %v5143_v40 }
  0x69   : > { %v1706_v22 = vrot.slane %v1704_v12, 4  ;;  %v461_v26 = vshrl.u32 %v275_v58, 16  ;;  %v1679_v32 = vsel %vm4977_vm15, %v1674_v15, %v1678_v62  ;;  %v464_v57 = vshll.u32 %v275_v58, 16  ;;  %v693_v61 = vld [vmem:[#allocation2 + $0x90] sm:$0xf] }
  0x6a   : > { %v5135_v30 = vld [vmem:[#allocation2 + $0x6c] sm:$0xff]   ;;  %v1684_v33 = vrot.slane %v1683_v16, 4  ;;  %v1712_v45 = vrot.slane %v1710_v19, 5  ;;  %v1697_v35 = vor.u32 %v1696_v24, %v1693_v18  ;;  %v469_v38 = vshrl.u32 %v276_v13, 16  ;;  %v281_v24 = vld [vmem:[%s4884_s27 + $0x68] sm:$0xf] }
  0x6b   : > { %v1707_v5 = vor.u32 %v1706_v22, %v1702_v21  ;;  %v463_v37 = vrot.slane %v461_v26, 7  ;;  %4144 = vmatprep.mubr.msk.bf16.mxu1 %vm850_vm8, %v5135_v30  ;;  %v472_v46 = vshll.u32 %v276_v13, 16  ;;  %v478_v50 = vshrl.u32 %v277_v27, 16  ;;  %v280_v13 = vld [vmem:[%s4884_s27 + $0x64] sm:$0xf] }
  0x6c   : > { %v1689_v43 = vsel %vm4977_vm15, %v1684_v33, %v1688_v3  ;;  %v481_v51 = vshll.u32 %v277_v27, 16  ;;  %v1698_v54 = vrot.slane %v1697_v35, 4  ;;  %v5153_v63 = vrot.slane %v469_v38, 7  ;;  %v279_v3 = vld [vmem:[%s4884_s27 + $0x60] sm:$0xf] }
  0x6d   : > { %v5151_v53 = vcombine.low %v1679_v32, %v1689_v43  ;;  %v1708_v58 = vrot.slane %v1707_v5, 4  ;;  %v466_v59 = vor.u32 %v464_v57, %v463_v37  ;;  %v467_v62 = vrot.slane %v463_v37, 4  ;;  %v282_v32 = vld [vmem:[%s4884_s27 + $0x6c] sm:$0xf]  ;;  %v700_v5 = vld [vmem:[#allocation2 + $0x9c] sm:$0xf] }
  0x6e   : > { %v480_v56 = vrot.slane %v478_v50, 7  ;;  %v486_v1 = vshrl.u32 %v278_v39, 16  ;;  %v1703_v9 = vsel %vm4977_vm15, %v1698_v54, %v1702_v21  ;;  %v489_v12 = vshll.u32 %v278_v39, 16  ;;  %v283_v43 = vld [vmem:[%s4884_s27 + $0x70] sm:$0xf] }
  0x6f   : > { %6048 = vst [vmem:[#allocation10_spill] sm:$0xff] %v5151_v53  ;;  %v5156_v4 = vld [vmem:[#allocation2 + $0x78] sm:$0xff]   ;;  %4276 = vmatprep.mubr.msk.bf16.mxu0 %vm850_vm8, %v5151_v53  ;;  %v1713_v10 = vsel %vm4977_vm15, %v1708_v58, %v1712_v45  ;;  %v687_v11 = vsel %vm4903_vm7, %v466_v59, %v686_v47  ;;  %v474_v16 = vor.u32 %v472_v46, %v5153_v63  ;;  %v476_v18 = vrot.slane %v5153_v63, 4  ;;  %v284_v54 = vld [vmem:[%s4884_s27 + $0x74] sm:$0xf] }
  0x70   : > { %v5167_v15 = vcombine.low %v1703_v9, %v1713_v10  ;;  %688 = vst [vmem:[#allocation2 + $0x84] sm:$0xf] %v687_v11  ;;  %v483_v19 = vor.u32 %v481_v51, %v480_v56  ;;  %4145 = vmatmul.mubr.msk.bf16.gmra.mrb[16].mxu1 %vm850_vm8, %v5156_v4  ;;  %v484_v21 = vrot.slane %v480_v56, 4  ;;  %v5174_v22 = vrot.slane %v486_v1, 7  ;;  %v707_v56 = vld [vmem:[#allocation2 + $0xa8] sm:$0xf] }
  0x71   : > { %v2936_v26 = vsel %vm899_vm0, %v5018_v0, 0  ;;  %v495_v27 = vshrl.u32 %v279_v3, 16  ;;  %v475_v33 = vsel %vm4896_vm6, %v467_v62, %v474_v16  ;;  %v498_v57 = vshll.u32 %v279_v3, 16  ;;  %v285_v1 = vld [vmem:[%s4884_s27 + $0x78] sm:$0xf] }
  0x72   : > { %6049 = vst [vmem:[#allocation11_spill] sm:$0xff] %v5167_v15  ;;  %4277 = vmatmul.mubr.msk.bf16.gmra.mrb[12].mxu0 %vm850_vm8, %v5167_v15  ;;  %v694_v45 = vsel %vm4903_vm7, %v483_v19, %v693_v61  ;;  %v503_v35 = vshrl.u32 %v280_v13, 16  ;;  %689 = vst.msk [vmem:[#allocation2 + $0x88] sm:$0xf] %vm199_vm1, %v475_v33  ;;  %v491_v0 = vor.u32 %v489_v12, %v5174_v22  ;;  %v493_v37 = vrot.slane %v5174_v22, 4 }
  0x73   : > { %695 = vst [vmem:[#allocation2 + $0x90] sm:$0xf] %v694_v45  ;;  %4298 = vmatprep.mubr.msk.bf16.mxu0 %vm850_vm8, %v5009_v55  ;;  %v497_v38 = vrot.slane %v495_v27, 7  ;;  %v506_v39 = vshll.u32 %v280_v13, 16  ;;  %v512_v47 = vshrl.u32 %v281_v24, 16  ;;  %v515_v50 = vshll.u32 %v281_v24, 16 }
  0x74   : > { %v5191_v46 = vrot.slane %v503_v35, 7  ;;  %v520_v51 = vshrl.u32 %v282_v32, 16  ;;  %v492_v58 = vsel %vm4896_vm6, %v484_v21, %v491_v0  ;;  %v523_v62 = vshll.u32 %v282_v32, 16  ;;  %v676_v12 = vld [vmem:[#allocation2 + $0x74] sm:$0x1] }
  0x75   : > { %v500_v59 = vor.u32 %v498_v57, %v497_v38  ;;  %v501_v61 = vrot.slane %v497_v38, 4  ;;  %696 = vst.msk [vmem:[#allocation2 + $0x94] sm:$0xf] %vm199_vm1, %v492_v58  ;;  %v514_v10 = vrot.slane %v512_v47, 7  ;;  %v529_v16 = vshrl.u32 %v283_v43, 16 }
  0x76   : > { %v508_v3 = vor.u32 %v506_v39, %v5191_v46  ;;  %v510_v9 = vrot.slane %v5191_v46, 4  ;;  %v5200_v11 = vrot.slane %v520_v51, 7  ;;  %v532_v19 = vshll.u32 %v283_v43, 16  ;;  %v714_v45 = vld [vmem:[#allocation2 + $0xb4] sm:$0xf] }
  0x77   : > { %v701_v13 = vsel %vm4903_vm7, %v500_v59, %v700_v5  ;;  %v537_v24 = vshrl.u32 %v284_v54, 16  ;;  %v517_v27 = vor.u32 %v515_v50, %v514_v10  ;;  %v518_v32 = vrot.slane %v514_v10, 4  ;;  %v286_v57 = vld [vmem:[%s4884_s27 + $0x7c] sm:$0xf]  ;;  %v1468_v35 = vld [vmem:[#allocation2 + $0x6c] sm:$0xf] }
  0x78   : > { %v509_v21 = vsel %vm4896_vm6, %v501_v61, %v508_v3  ;;  %702 = vst [vmem:[#allocation2 + $0x9c] sm:$0xf] %v701_v13  ;;  %v525_v33 = vor.u32 %v523_v62, %v5200_v11  ;;  %v527_v0 = vrot.slane %v5200_v11, 4  ;;  %v531_v38 = vrot.slane %v529_v16, 7  ;;  %v5229_v3 = vld [vmem:[#allocation2 + $0x70] sm:$0xf] }
  0x79   : > { %703 = vst.msk [vmem:[#allocation2 + $0xa0] sm:$0xf] %vm199_vm1, %v509_v21  ;;  %v5210_v5 = vrot.slane %v537_v24, 7  ;;  %v540_v39 = vshll.u32 %v284_v54, 16  ;;  %v5212_v43 = vld [vmem:[#allocation2 + $0x84] sm:$0xff]   ;;  %v708_v50 = vsel %vm4903_vm7, %v517_v27, %v707_v56  ;;  %v546_v51 = vshrl.u32 %v285_v1, 16 }
  0x7a   : > { %4299 = vmatmul.mubr.msk.bf16.vlgmr.msra.gmra.mrb[0].mxu0 %vm850_vm8, %v5039_v52  ;;  %v526_v47 = vsel %vm4896_vm6, %v518_v32, %v525_v33  ;;  %v677_v58 = vsel %vm4918_vm9, %v442_v28, %v676_v12  ;;  %709 = vst [vmem:[#allocation2 + $0xa8] sm:$0xf] %v708_v50  ;;  %v534_v54 = vor.u32 %v532_v19, %v531_v38  ;;  %v535_v59 = vrot.slane %v531_v38, 4  ;;  %v721_v56 = vld [vmem:[#allocation2 + $0xc0] sm:$0xf] }
  0x7b   : > { %4331 = vmatpush3.bf16.msra.mxu0 %v2936_v26  ;;  %710 = vst.msk [vmem:[#allocation2 + $0xac] sm:$0xf] %vm199_vm1, %v526_v47  ;;  %4302 = vmatprep.mubr.msk.bf16.mxu0 %vm850_vm8, %v5052_v2  ;;  %v542_v61 = vor.u32 %v540_v39, %v5210_v5  ;;  %v544_v62 = vrot.slane %v5210_v5, 4  ;;  %678 = vst [vmem:[#allocation2 + $0x74] sm:$0x1] %v677_v58  ;;  %v548_v28 = vrot.slane %v546_v51, 7 }
  0x7c   : > { %v683_v17 = vld [vmem:[#allocation2 + $0x80] sm:$0x1]  ;;  %4148 = vmatprep.mubr.msk.bf16.mxu1 %vm850_vm8, %v5212_v43  ;;  %v549_v26 = vshll.u32 %v285_v1, 16  ;;  %v554_v10 = vshrl.u32 %v286_v57, 16  ;;  %v557_v12 = vshll.u32 %v286_v57, 16  ;;  %v5233_v16 = vld [vmem:[#allocation2 + $0x90] sm:$0xff]   ;;  %v715_v24 = vsel %vm4903_vm7, %v534_v54, %v714_v45 }
  0x7d   : > { %v1471_v13 = vld [vmem:[#allocation2 + $0x78] sm:$0xf]  ;;  %v543_v19 = vsel %vm4896_vm6, %v535_v59, %v542_v61  ;;  %v1715_v21 = vshrl.u32 %v1468_v35, 16  ;;  %v1718_v27 = vshll.u32 %v1468_v35, 16  ;;  %v5239_v32 = vld [vmem:[#allocation2 + $0x7c] sm:$0xf]  ;;  %4149 = vmatmul.mubr.msk.bf16.gmra.mrb[20].mxu1 %vm850_vm8, %v5233_v16  ;;  %v684_v51 = vsel %vm4918_vm9, %v459_v60, %v683_v17 }
  0x7e   : > { %v690_v33 = vld [vmem:[#allocation2 + $0x8c] sm:$0x1]  ;;  %716 = vst [vmem:[#allocation2 + $0xb4] sm:$0xf] %v715_v24  ;;  %717 = vst.msk [vmem:[#allocation2 + $0xb8] sm:$0xf] %vm199_vm1, %v543_v19  ;;  %v551_v1 = vor.u32 %v549_v26, %v548_v28 }
  0x7f   : > { %v552_v38 = vrot.slane %v548_v28, 4  ;;  %v5242_v57 = vrot.slane %v554_v10, 7  ;;  %v1724_v39 = vshll.u32 %v5229_v3, 16  ;;  %v697_v47 = vld [vmem:[#allocation2 + $0x98] sm:$0x1]  ;;  %v1717_v50 = vrot.slane %v1715_v21, 4 }
  0x80   : > { %v1720_v45 = vrot.slane %v1718_v27, 5  ;;  %v1728_v35 = vshrl.u32 %v5229_v3, 16  ;;  %v5252_v58 = vld [vmem:[#allocation2 + $0x9c] sm:$0xff]   ;;  %v722_v61 = vsel %vm4903_vm7, %v551_v1, %v721_v56  ;;  %685 = vst [vmem:[#allocation2 + $0x80] sm:$0x1] %v684_v51  ;;  %v1739_v24 = vshrl.u32 %v1471_v13, 16 }
  0x81   : > { %v559_v54 = vor.u32 %v557_v12, %v5242_v57  ;;  %v1726_v28 = vrot.slane %v1724_v39, 5  ;;  %v704_v26 = vld [vmem:[#allocation2 + $0xa4] sm:$0x1]  ;;  %723 = vst [vmem:[#allocation2 + $0xc0] sm:$0xf] %v722_v61  ;;  %v1742_v42 = vshll.u32 %v1471_v13, 16  ;;  %4152 = vmatprep.mubr.msk.bf16.mxu1 %vm850_vm8, %v5252_v58  ;;  %v691_v56 = vsel %vm4918_vm9, %v476_v18, %v690_v33 }
  0x82   : > { %v1721_v10 = vor.u32 %v1720_v45, %v1717_v50  ;;  %v1730_v19 = vrot.slane %v1728_v35, 4  ;;  %v1474_v21 = vld [vmem:[#allocation2 + $0x84] sm:$0xf]  ;;  %4303 = vmatmul.mubr.msk.bf16.gmra.mrb[4].mxu0 %vm850_vm8, %v5097_v14  ;;  %v1748_v25 = vshll.u32 %v5239_v32, 16  ;;  %v5269_v17 = vld [vmem:[#allocation2 + $0x88] sm:$0xf]  ;;  %v698_v12 = vsel %vm4918_vm9, %v493_v37, %v697_v47 }
  0x83   : > { %v560_v60 = vsel %vm4896_vm6, %v552_v38, %v559_v54  ;;  %v5275_v13 = vld [vmem:[#allocation2 + $0xa8] sm:$0xff]   ;;  %4306 = vmatprep.mubr.msk.bf16.mxu0 %vm850_vm8, %v5111_v34  ;;  %v5280_v20 = vld [vmem:[#allocation2 + $0x74] sm:$0x1]  ;;  %v1741_v1 = vrot.slane %v1739_v24, 4  ;;  %v1744_v18 = vrot.slane %v1742_v42, 5  ;;  %v1752_v37 = vshrl.u32 %v5239_v32, 16 }
  0x84   : > { %724 = vst.msk [vmem:[#allocation2 + $0xc4] sm:$0xf] %vm199_vm1, %v560_v60  ;;  %v1722_v63 = vrot.slane %v1721_v10, 4  ;;  %v1731_v27 = vor.u32 %v1730_v19, %v1726_v28  ;;  %692 = vst [vmem:[#allocation2 + $0x8c] sm:$0x1] %v691_v56  ;;  %v1734_v22 = vshll.u32 %v5280_v20, 16  ;;  %v705_v51 = vsel %vm4918_vm9, %v510_v9, %v704_v26 }
  0x85   : > { %699 = vst [vmem:[#allocation2 + $0x98] sm:$0x1] %v698_v12  ;;  %v1750_v33 = vrot.slane %v1748_v25, 5  ;;  %v5286_v38 = vsel %vm899_vm0, %v5143_v40, 0  ;;  %v1477_v39 = vld [vmem:[#allocation2 + $0x90] sm:$0xf]  ;;  %v1745_v35 = vor.u32 %v1744_v18, %v1741_v1  ;;  %4153 = vmatmul.mubr.msk.bf16.gmra.mrb[24].mxu1 %vm850_vm8, %v5275_v13 }
  0x86   : > { %v5288_v47 = vld [vmem:[#allocation2 + $0xb4] sm:$0xff]   ;;  %v1727_v50 = vsel %vm4977_vm15, %v1722_v63, %v1726_v28  ;;  %v1732_v45 = vrot.slane %v1731_v27, 4  ;;  %v1736_v54 = vrot.slane %v1734_v22, 5  ;;  %v1754_v61 = vrot.slane %v1752_v37, 4  ;;  %706 = vst [vmem:[#allocation2 + $0xa4] sm:$0x1] %v705_v51 }
  0x87   : > { %v1763_v10 = vshrl.u32 %v1474_v21, 16  ;;  %v1766_v19 = vshll.u32 %v1474_v21, 16  ;;  %v711_v40 = vld [vmem:[#allocation2 + $0xb0] sm:$0x1]  ;;  %v5298_v24 = vld [vmem:[#allocation2 + $0x80] sm:$0x1]  ;;  %4156 = vmatprep.mubr.msk.bf16.mxu1 %vm850_vm8, %v5288_v47 }
  0x88   : > { %v1746_v42 = vrot.slane %v1745_v35, 4  ;;  %v1772_v28 = vshll.u32 %v5269_v17, 16  ;;  %v1776_v60 = vshrl.u32 %v5269_v17, 16  ;;  %v1787_v46 = vshrl.u32 %v1477_v39, 16  ;;  %v718_v56 = vld [vmem:[#allocation2 + $0xbc] sm:$0x1] }
  0x89   : > { %v1737_v9 = vsel %vm4977_vm15, %v1732_v45, %v1736_v54  ;;  %v1755_v26 = vor.u32 %v1754_v61, %v1750_v33  ;;  %v1758_v21 = vshll.u32 %v5298_v24, 16  ;;  %v1765_v25 = vrot.slane %v1763_v10, 4  ;;  %v5311_v18 = vld [vmem:[#allocation2 + $0x94] sm:$0xf]  ;;  %v4727_v11 = vld [vmem:[#allocation2] sm:$0xff]   ;;  %v5375_v14 = vld [vmem:[#allocation2 + $0x18] sm:$0xff]  }
  0x8a   : > { %v5307_v12 = vcombine.low %v1727_v50, %v1737_v9  ;;  %v1751_v63 = vsel %vm4977_vm15, %v1746_v42, %v1750_v33  ;;  %v1768_v27 = vrot.slane %v1766_v19, 5  ;;  %v1774_v1 = vrot.slane %v1772_v28, 5  ;;  %4307 = vmatmul.mubr.msk.bf16.gmra.mrb[8].mxu0 %vm850_vm8, %v5151_v53  ;;  %v4731_v53 = vld [vmem:[#allocation2 + $0xc] sm:$0xff]   ;;  %v725_v34 = vld [vmem:[#allocation2 + $0xc8] sm:$0x1] }
  0x8b   : > { %v5313_v22 = vld [vmem:[#allocation2 + $0xc0] sm:$0xff]   ;;  %v1756_v37 = vrot.slane %v1755_v26, 4  ;;  %v1760_v45 = vrot.slane %v1758_v21, 5  ;;  %v1778_v35 = vrot.slane %v1776_v60, 4  ;;  %v712_v50 = vsel %vm4918_vm9, %v527_v0, %v711_v40  ;;  %4310 = vmatprep.mubr.msk.bf16.mxu0 %vm850_vm8, %v5167_v15  ;;  %v5323_v33 = vld [vmem:[#allocation2 + $0x8c] sm:$0x1] }
  0x8c   : > { %6050 = vst [vmem:[#allocation12_spill] sm:$0xff] %v5307_v12  ;;  %6051 = vst [vmem:[#allocation13_spill] sm:$0xff] %v5313_v22  ;;  %v1769_v51 = vor.u32 %v1768_v27, %v1765_v25  ;;  %v5325_v54 = vld [vmem:[#allocation2 + $0x98] sm:$0x1]  ;;  %v1789_v61 = vrot.slane %v1787_v46, 4  ;;  %v1790_v10 = vshll.u32 %v1477_v39, 16  ;;  %v719_v19 = vsel %vm4918_vm9, %v544_v62, %v718_v56 }
  0x8d   : > { %713 = vst [vmem:[#allocation2 + $0xb0] sm:$0x1] %v712_v50  ;;  %v1761_v0 = vsel %vm4977_vm15, %v1756_v37, %v1760_v45  ;;  %v1779_v40 = vor.u32 %v1778_v35, %v1774_v1  ;;  %v1782_v42 = vshll.u32 %v5323_v33, 16  ;;  %v1796_v28 = vshll.u32 %v5311_v18, 16  ;;  %v1480_v60 = vld [vmem:[#allocation2 + $0x9c] sm:$0xf]  ;;  %4157 = vmatmul.mubr.msk.bf16.gmra.mrb[28].mxu1 %vm850_vm8, %v5313_v22 }
  0x8e   : > { %720 = vst [vmem:[#allocation2 + $0xbc] sm:$0x1] %v719_v19  ;;  %v5335_v9 = vcombine.low %v1751_v63, %v1761_v0  ;;  %v1770_v39 = vrot.slane %v1769_v51, 4  ;;  %v1792_v46 = vrot.slane %v1790_v10, 5  ;;  %v1800_v5 = vshrl.u32 %v5311_v18, 16  ;;  %4162 = vmatprep.mubr.msk.bf16.mxu1 %vm850_vm8, %v4727_v11 }
  0x8f   : > { %v5338_v26 = vld [vmem:[#allocation2 + $0xa0] sm:$0xf]  ;;  %v1780_v62 = vrot.slane %v1779_v40, 4  ;;  %v1784_v21 = vrot.slane %v1782_v42, 5  ;;  %v1798_v25 = vrot.slane %v1796_v28, 5  ;;  %v1806_v56 = vshll.u32 %v5325_v54, 16 }
  0x90   : > { %6052 = vst [vmem:[#allocation14_spill] sm:$0xff] %v5335_v9  ;;  %v1775_v27 = vsel %vm4977_vm15, %v1770_v39, %v1774_v1  ;;  %v1793_v37 = vor.u32 %v1792_v46, %v1789_v61  ;;  %v1802_v63 = vrot.slane %v1800_v5, 4  ;;  %v5345_v45 = vld [vmem:[#allocation2 + $0xa4] sm:$0x1]  ;;  %v1811_v35 = vshrl.u32 %v1480_v60, 16 }
  0x91   : > { %v1785_v50 = vsel %vm4977_vm15, %v1780_v62, %v1784_v21  ;;  %v1808_v51 = vrot.slane %v1806_v56, 5  ;;  %v1814_v10 = vshll.u32 %v1480_v60, 16  ;;  %v1820_v19 = vshll.u32 %v5338_v26, 16  ;;  %v1483_v0 = vld [vmem:[#allocation2 + $0xa8] sm:$0xf] }
  0x92   : > { %v5351_v40 = vcombine.low %v1775_v27, %v1785_v50  ;;  %v1794_v42 = vrot.slane %v1793_v37, 4  ;;  %v1803_v28 = vor.u32 %v1802_v63, %v1798_v25  ;;  %v1813_v1 = vrot.slane %v1811_v35, 4  ;;  %v5353_v61 = vld [vmem:[#allocation2 + $0xac] sm:$0xf]  ;;  %4311 = vmatmul.mubr.msk.bf16.gmra.mrb[12].mxu0 %vm850_vm8, %v5307_v12  ;;  %v1486_v60 = vld [vmem:[#allocation2 + $0xb4] sm:$0xf] }
  0x93   : > { %v1816_v39 = vrot.slane %v1814_v10, 5  ;;  %v1822_v11 = vrot.slane %v1820_v19, 5  ;;  %v1824_v46 = vshrl.u32 %v5338_v26, 16  ;;  %v1830_v5 = vshll.u32 %v5345_v45, 16  ;;  %4314 = vmatprep.mubr.msk.bf16.mxu0 %vm850_vm8, %v5335_v9  ;;  %v5363_v37 = vld [vmem:[#allocation2 + $0xb8] sm:$0xf] }
  0x94   : > { %6053 = vst [vmem:[#allocation15_spill] sm:$0xff] %v5351_v40  ;;  %v1799_v62 = vsel %vm4977_vm15, %v1794_v42, %v1798_v25  ;;  %v1804_v21 = vrot.slane %v1803_v28, 4  ;;  %v1835_v56 = vshrl.u32 %v1483_v0, 16  ;;  %v1838_v27 = vshll.u32 %v1483_v0, 16  ;;  %v5365_v10 = vld [vmem:[#allocation2 + $0xb0] sm:$0x1] }
  0x95   : > { %v1817_v63 = vor.u32 %v1816_v39, %v1813_v1  ;;  %v1826_v35 = vrot.slane %v1824_v46, 4  ;;  %v1832_v50 = vrot.slane %v1830_v5, 5  ;;  %v1844_v19 = vshll.u32 %v5353_v61, 16  ;;  %4163 = vmatmul.mubr.msk.bf16.vlgmr.msra.gmra.mrb[0].mxu1 %vm850_vm8, %v4731_v53  ;;  %v4738_v6 = vld [vmem:[#allocation2 + $0x28] sm:$0xf] }
  0x96   : > { %v1809_v59 = vsel %vm4977_vm15, %v1804_v21, %v1808_v51  ;;  %v1837_v12 = vrot.slane %v1835_v56, 4  ;;  %v1840_v9 = vrot.slane %v1838_v27, 5  ;;  %v1848_v15 = vshrl.u32 %v5353_v61, 16  ;;  %4166 = vmatprep.mubr.msk.bf16.mxu1 %vm850_vm8, %v5375_v14  ;;  %4195 = vmatpush3.bf16.msra.mxu1 %v5286_v38  ;;  %v1489_v27 = vld [vmem:[#allocation2 + $0xc0] sm:$0xf] }
  0x97   : > { %v5371_v25 = vcombine.low %v1799_v62, %v1809_v59  ;;  %v1818_v42 = vrot.slane %v1817_v63, 4  ;;  %v1827_v0 = vor.u32 %v1826_v35, %v1822_v11  ;;  %v1846_v28 = vrot.slane %v1844_v19, 5  ;;  %v5382_v62 = vld [vmem:[#allocation2 + $0xbc] sm:$0x1]  ;;  %v5390_v19 = vld [vmem:[#allocation2 + $0xc4] sm:$0xf] }
  0x98   : > { %v1841_v1 = vor.u32 %v1840_v9, %v1837_v12  ;;  %v1850_v39 = vrot.slane %v1848_v15, 4  ;;  %v1854_v46 = vshll.u32 %v5365_v10, 16  ;;  %v1859_v5 = vshrl.u32 %v1486_v60, 16  ;;  %v2642_v23 = vld [vmem:[#allocation2 + $0x3c] sm:$0xe] }
  0x99   : > { %6054 = vst [vmem:[#allocation16_spill] sm:$0xff] %v5371_v25  ;;  %v1823_v59 = vsel %vm4977_vm15, %v1818_v42, %v1822_v11  ;;  %v1828_v51 = vrot.slane %v1827_v0, 4  ;;  %v1862_v53 = vshll.u32 %v1486_v60, 16  ;;  %v1868_v15 = vshll.u32 %v5363_v37, 16  ;;  %v4741_v22 = vld [vmem:[#allocation2 + $0x2c] sm:$0x1] }
  0x9a   : > { %v1842_v12 = vrot.slane %v1841_v1, 4  ;;  %v1851_v9 = vor.u32 %v1850_v39, %v1846_v28  ;;  %v1856_v21 = vrot.slane %v1854_v46, 5  ;;  %v1861_v56 = vrot.slane %v1859_v5, 4  ;;  %4315 = vmatmul.mubr.msk.bf16.gmra.mrb[16].mxu0 %vm850_vm8, %v5351_v40 }
  0x9b   : > { %v1833_v38 = vsel %vm4977_vm15, %v1828_v51, %v1832_v50  ;;  %v1864_v63 = vrot.slane %v1862_v53, 5  ;;  %v1870_v35 = vrot.slane %v1868_v15, 5  ;;  %v1872_v11 = vshrl.u32 %v5363_v37, 16  ;;  %4318 = vmatprep.mubr.msk.bf16.mxu0 %vm850_vm8, %v5371_v25  ;;  %v1492_v53 = vld [vmem:[#allocation2 + $0xcc] sm:$0xf] }
  0x9c   : > { %v5394_v60 = vcombine.low %v1823_v59, %v1833_v38  ;;  %v1847_v42 = vsel %vm4977_vm15, %v1842_v12, %v1846_v28  ;;  %v1852_v0 = vrot.slane %v1851_v9, 4  ;;  %v1878_v1 = vshll.u32 %v5382_v62, 16  ;;  %v5406_v12 = vld [vmem:[#allocation2 + $0xd0] sm:$0xf] }
  0x9d   : > { %v1865_v39 = vor.u32 %v1864_v63, %v1861_v56  ;;  %v1874_v46 = vrot.slane %v1872_v11, 4  ;;  %v6056_v50 = vrot.slane %v5242_v57, 4  ;;  %v1883_v51 = vshrl.u32 %v1489_v27, 16  ;;  %6057 = vst [vmem:[#allocation18_spill] sm:$0xff] %v5406_v12  ;;  %v5410_v11 = vld [vmem:[#allocation2 + $0x24] sm:$0xff]  }
  0x9e   : > { %6055 = vst [vmem:[#allocation17_spill] sm:$0xff] %v5394_v60  ;;  %v1857_v15 = vsel %vm4977_vm15, %v1852_v0, %v1856_v21  ;;  %v1880_v59 = vrot.slane %v1878_v1, 5  ;;  %v1886_v38 = vshll.u32 %v1489_v27, 16  ;;  %v1892_v28 = vshll.u32 %v5390_v19, 16  ;;  %6059 = vst [vmem:[#allocation20_spill] sm:$0xff] %v5410_v11  ;;  %4167 = vmatmul.mubr.msk.bf16.gmra.mrb[4].mxu1 %vm850_vm8, %v5410_v11  ;;  %v5417_v1 = vld [vmem:[#allocation2 + $0x30] sm:$0xff]  }
  0x9f   : > { %v726_v5 = vsel %vm4918_vm9, %v6056_v50, %v725_v34  ;;  %v5408_v9 = vcombine.low %v1847_v42, %v1857_v15  ;;  %v1866_v56 = vrot.slane %v1865_v39, 4  ;;  %v1875_v63 = vor.u32 %v1874_v46, %v1870_v35  ;;  %v5415_v0 = vld [vmem:[#allocation2 + $0xd4] sm:$0x1]  ;;  %6061 = vst [vmem:[#allocation22_spill] sm:$0xff] %v5417_v1  ;;  %4170 = vmatprep.mubr.msk.bf16.mxu1 %vm850_vm8, %v5417_v1 }
  0xa0   : > { %727 = vst [vmem:[#allocation2 + $0xc8] sm:$0x1] %v726_v5  ;;  %v1885_v57 = vrot.slane %v1883_v51, 4  ;;  %v1888_v44 = vrot.slane %v1886_v38, 5  ;;  %v1894_v34 = vrot.slane %v1892_v28, 5  ;;  %v1896_v21 = vshrl.u32 %v5390_v19, 16 }
  0xa1   : > { %6058 = vst [vmem:[#allocation19_spill] sm:$0xff] %v5408_v9  ;;  %6060 = vst [vmem:[#allocation21_spill] sm:$0xff] %v5415_v0  ;;  %v1907_v27 = vshrl.u32 %v1492_v53, 16  ;;  %v1876_v42 = vrot.slane %v1875_v63, 4  ;;  %v1910_v39 = vshll.u32 %v1492_v53, 16  ;;  %v1916_v46 = vshll.u32 %v5406_v12, 16 }
  0xa2   : > { %v1889_v50 = vor.u32 %v1888_v44, %v1885_v57  ;;  %v1898_v5 = vrot.slane %v1896_v21, 4  ;;  %v1920_v15 = vshrl.u32 %v5406_v12, 16  ;;  %v5423_v38 = vld [vmem:[#allocation2 + $0x4] sm:$0xf]  ;;  %4319 = vmatmul.mubr.msk.bf16.gmra.mrb[20].mxu0 %vm850_vm8, %v5394_v60  ;;  %v1871_v28 = vsel %vm4977_vm15, %v1866_v56, %v1870_v35  ;;  %v2637_v53 = vld [vmem:[#allocation2] sm:$0xe] }
  0xa3   : > { %v1909_v51 = vrot.slane %v1907_v27, 4  ;;  %v1912_v25 = vrot.slane %v1910_v39, 5  ;;  %v1918_v40 = vrot.slane %v1916_v46, 5  ;;  %v1926_v63 = vshll.u32 %v5415_v0, 16  ;;  %4322 = vmatprep.mubr.msk.bf16.mxu0 %vm850_vm8, %v5408_v9  ;;  %v5443_v60 = vld [vmem:[#allocation2 + $0x8] sm:$0x1] }
  0xa4   : > { %v1881_v57 = vsel %vm4977_vm15, %v1876_v42, %v1880_v59  ;;  %v1890_v44 = vrot.slane %v1889_v50, 4  ;;  %v1899_v21 = vor.u32 %v1898_v5, %v1894_v34  ;;  %v1922_v27 = vrot.slane %v1920_v15, 4  ;;  %v5437_v12 = vld [vmem:[%s5995_s1 + $0x8] ss:$0 sps:$4 sm:$0xcc]   ;;  %v5449_v15 = vld [vmem:[#allocation2 + $0x3c] sm:$0xff]  }
  0xa5   : > { %v1913_v56 = vor.u32 %v1912_v25, %v1909_v51  ;;  %v2714_v39 = vrot.slane %v5423_v38, 5  ;;  %v5445_v59 = vcombine.low %v1871_v28, %v1881_v57  ;;  %v1928_v50 = vrot.slane %v1926_v63, 5  ;;  %6063 = vst [vmem:[#allocation24_spill] sm:$0xff] %v5449_v15  ;;  %v2639_v63 = vld [vmem:[#allocation2 + $0x18] sm:$0xe] }
  0xa6   : > { %v1900_v46 = vrot.slane %v1899_v21, 4  ;;  %v1923_v9 = vor.u32 %v1922_v27, %v1918_v40  ;;  %v1895_v42 = vsel %vm4977_vm15, %v1890_v44, %v1894_v34  ;;  %v3882_v5 = vrot.slane %v2637_v53, 9  ;;  %4171 = vmatmul.mubr.msk.bf16.gmra.mrb[8].mxu1 %vm850_vm8, %v5449_v15  ;;  %v5454_v27 = vld [vmem:[#allocation2 + $0x48] sm:$0xff]   ;;  %v4737_v53 = vld [vmem:[#allocation2 + $0x1c] sm:$0xf] }
  0xa7   : > { %v5439_v35 = vld [vmem:[#allocation2 + $0xc8] sm:$0x1]  ;;  %6062 = vst [vmem:[#allocation23_spill] sm:$0xff] %v5445_v59  ;;  %v1914_v51 = vrot.slane %v1913_v56, 4  ;;  %v3138_v2 = vrot.slane %v5437_v12, 2  ;;  %6064 = vst [vmem:[#allocation25_spill] sm:$0xff] %v5454_v27  ;;  %4174 = vmatprep.mubr.msk.bf16.mxu1 %vm850_vm8, %v5454_v27 }
  0xa8   : > { %v1902_v0 = vshll.u32 %v5439_v35, 16  ;;  %v1924_v21 = vrot.slane %v1923_v9, 4  ;;  %v2716_v28 = vrot.slane %v2714_v39, 4  ;;  %v2717_v34 = vrot.slane %v5443_v60, 5 }
  0xa9   : > { %v2728_v57 = vrot.slane %v4737_v53, 5  ;;  %4698 = vmatprep.subr.msk.bf16.mxu0 %vm899_vm0, %v3138_v2  ;;  %v2715_v9 = vsel %vm4965_vm14, %v3882_v5, %v2714_v39  ;;  %v1919_v56 = vsel %vm4977_vm15, %v1914_v51, %v1918_v40  ;;  %v3884_v52 = vrot.slane %v2639_v63, 9  ;;  %v4740_v5 = vld [vmem:[#allocation2 + $0x34] sm:$0xf] }
  0xaa   : > { %v1904_v25 = vrot.slane %v1902_v0, 5  ;;  %4323 = vmatmul.mubr.msk.bf16.gmra.mrb[24].mxu0 %vm850_vm8, %v5445_v59  ;;  %v2640_v0 = vld [vmem:[#allocation2 + $0x24] sm:$0xe]  ;;  %v1929_v53 = vsel %vm4977_vm15, %v1924_v21, %v1928_v50  ;;  %v4739_v59 = vld [vmem:[#allocation2 + $0x20] sm:$0x1]  ;;  %v2742_v55 = vrot.slane %v4740_v5, 5 }
  0xab   : > { %v2731_v39 = vrot.slane %v4739_v59, 5  ;;  %v3885_v40 = vrot.slane %v2640_v0, 9  ;;  %v2738_v50 = vrot.slane %v4741_v22, 5  ;;  %v4742_v21 = vld [vmem:[#allocation2 + $0x40] sm:$0xf]  ;;  %v3864_v27 = vcombine.low %v1919_v56, %v1929_v53 }
  0xac   : > { %v1905_v44 = vsel %vm4977_vm15, %v1900_v46, %v1904_v25  ;;  %v2735_v46 = vrot.slane %v4738_v6, 5  ;;  %v2641_v25 = vld [vmem:[#allocation2 + $0x30] sm:$0xe]  ;;  %v2749_v63 = vrot.slane %v4742_v21, 5  ;;  %v2643_v6 = vld [vmem:[#allocation2 + $0x48] sm:$0xe]  ;;  %v2729_v56 = vsel %vm4965_vm14, %v3884_v52, %v2728_v57 }
  0xad   : > { %v5464_v12 = vcombine.low %v1895_v42, %v1905_v44  ;;  %v2718_v42 = vsel %vm4965_vm14, %v2716_v28, %v2717_v34  ;;  %v2730_v44 = vrot.slane %v2728_v57, 4  ;;  %v3886_v15 = vrot.slane %v2641_v25, 9  ;;  %v5479_v28 = vld [vmem:[%s5995_s1] ss:$0 sps:$4 sm:$0xcc]  }
  0xae   : > { %v2737_v51 = vrot.slane %v2735_v46, 4  ;;  %v2744_v1 = vrot.slane %v2742_v55, 4  ;;  %4175 = vmatmul.mubr.msk.bf16.gmra.mrb[12].mxu1 %vm850_vm8, %v5074_v48  ;;  %v3900_v59 = vcombine.low %v2715_v9, %v2718_v42  ;;  %v3887_v34 = vrot.slane %v2642_v23, 9  ;;  %v4744_v53 = vld [vmem:[#allocation2 + $0x4c] sm:$0xf] }
  0xaf   : > { %6065 = vst [vmem:[#allocation26_spill] sm:$0xff] %v5464_v12  ;;  %4326 = vmatprep.mubr.msk.bf16.mxu0 %vm850_vm8, %v5464_v12  ;;  %v4743_v12 = vld [vmem:[#allocation2 + $0x38] sm:$0x1]  ;;  %v2751_v0 = vrot.slane %v2749_v63, 4  ;;  %v2752_v22 = vrot.slane %v5076_v49, 5  ;;  %4178 = vmatprep.mubr.msk.bf16.mxu1 %vm850_vm8, %v5091_v29  ;;  %v2756_v25 = vrot.slane %v4744_v53, 5  ;;  %v2736_v5 = vsel %vm4965_vm14, %v3885_v40, %v2735_v46 }
  0xb0   : > { %v2745_v11 = vrot.slane %v4743_v12, 5  ;;  %v2732_v12 = vsel %vm4965_vm14, %v2730_v44, %v2731_v39  ;;  %v2739_v23 = vsel %vm4965_vm14, %v2737_v51, %v2738_v50  ;;  %v3888_v48 = vrot.slane %v2643_v6, 9  ;;  %v5494_v9 = vld [vmem:[#allocation2 + $0x54] sm:$0xe]  ;;  %v2646_v57 = vld [vmem:[#allocation2 + $0x6c] sm:$0xe] }
  0xb1   : > { %v2743_v49 = vsel %vm4965_vm14, %v3886_v15, %v2742_v55  ;;  %v1982_v29 = vrot.slane %v5479_v28, 2  ;;  %v3143_v46 = vsel %vm899_vm0, %v3138_v2, 0  ;;  %v5504_v42 = vcombine.low %v2729_v56, %v2732_v12  ;;  %v2647_v39 = vld [vmem:[#allocation2 + $0x78] sm:$0xe]  ;;  %v6068_v28 = vld [vmem:[#allocation24_spill] sm:$0xff] }
  0xb2   : > { %4327 = vmatmul.mubr.msk.bf16.gmra.mrb[28].mxu0 %vm850_vm8, %v3864_v27  ;;  %v2746_v52 = vsel %vm4965_vm14, %v2744_v1, %v2745_v11  ;;  %v2750_v44 = vsel %vm4965_vm14, %v3887_v34, %v2749_v63  ;;  %v2753_v27 = vsel %vm4965_vm14, %v2751_v0, %v2752_v22  ;;  %v5510_v55 = vcombine.low %v2736_v5, %v2739_v23  ;;  %v4745_v11 = vld [vmem:[#allocation2 + $0x50] sm:$0x1]  ;;  %v2648_v0 = vld [vmem:[#allocation2 + $0x84] sm:$0xe]  ;;  %v2650_v5 = vld [vmem:[#allocation2 + $0x9c] sm:$0xe] }
  0xb3   : > { %4332 = vmatprep.mubr.msk.bf16.mxu0 %vm850_vm8, %v3900_v59  ;;  %v2758_v15 = vrot.slane %v2756_v25, 4  ;;  %v2759_v1 = vrot.slane %v4745_v11, 5  ;;  %v3889_v40 = vrot.slane %v5494_v9, 9  ;;  %4693 = vmatprep.subr.msk.bf16.mxu1 %vm899_vm0, %v1982_v29  ;;  %v5516_v2 = vcombine.low %v2743_v49, %v2746_v52 }
  0xb4   : > { %v5520_v51 = vsel %vm4965_vm14, %v3888_v48, %v2756_v25  ;;  %v3891_v50 = vrot.slane %v2646_v57, 9  ;;  %v2777_v21 = vrot.slane %v5229_v3, 5  ;;  %v5523_v63 = vcombine.low %v2750_v44, %v2753_v27  ;;  %v2649_v3 = vld [vmem:[#allocation2 + $0x90] sm:$0xe] }
  0xb5   : > { %v2780_v6 = vrot.slane %v5280_v20, 5  ;;  %v3892_v59 = vrot.slane %v2647_v39, 9  ;;  %v2784_v34 = vrot.slane %v5239_v32, 5  ;;  %v2763_v22 = vrot.slane %v5103_v31, 5  ;;  %v2651_v39 = vld [vmem:[#allocation2 + $0xa8] sm:$0xe] }
  0xb6   : > { %4179 = vmatmul.mubr.msk.bf16.gmra.mrb[16].mxu1 %vm850_vm8, %v5135_v30  ;;  %v2766_v56 = vrot.slane %v5115_v36, 5  ;;  %v2778_v12 = vsel %vm4965_vm14, %v3891_v50, %v2777_v21  ;;  %v2779_v53 = vrot.slane %v2777_v21, 4  ;;  %v5537_v20 = vsel %vm4965_vm14, %v2758_v15, %v2759_v1  ;;  %v6066_v36 = vld [vmem:[#allocation20_spill] sm:$0xff] }
  0xb7   : > { %4182 = vmatprep.mubr.msk.bf16.mxu1 %vm850_vm8, %v5156_v4  ;;  %v2785_v32 = vsel %vm4965_vm14, %v3892_v59, %v2784_v34  ;;  %v2786_v30 = vrot.slane %v2784_v34, 4  ;;  %v2787_v25 = vrot.slane %v5298_v24, 5  ;;  %v3893_v48 = vrot.slane %v2648_v0, 9  ;;  %v5549_v4 = vld [vmem:[%s5995_s1 + $0x10] sm:$0x3] }
  0xb8   : > { %v2781_v23 = vsel %vm4965_vm14, %v2779_v53, %v2780_v6  ;;  %v2791_v49 = vrot.slane %v5269_v17, 5  ;;  %v2794_v52 = vrot.slane %v5323_v33, 5  ;;  %v3894_v44 = vrot.slane %v2649_v3, 9  ;;  %v2652_v0 = vld [vmem:[#allocation2 + $0xb4] sm:$0xe] }
  0xb9   : > { %v5553_v57 = vcombine.low %v2778_v12, %v2781_v23  ;;  %v2788_v24 = vsel %vm4965_vm14, %v2786_v30, %v2787_v25  ;;  %v2798_v27 = vrot.slane %v5311_v18, 5  ;;  %v2801_v11 = vrot.slane %v5325_v54, 5  ;;  %v1441_v3 = vld [vmem:[#allocation2] sm:$0xf] }
  0xba   : > { %4333 = vmatmul.mubr.msk.bf16.vlgmr.msra.gmra.mrb[0].mxu0 %vm850_vm8, %v4983_v8  ;;  %v5560_v17 = vcombine.low %v2785_v32, %v2788_v24  ;;  %v2792_v33 = vsel %vm4965_vm14, %v3893_v48, %v2791_v49  ;;  %v2793_v15 = vrot.slane %v2791_v49, 4  ;;  %v3895_v21 = vrot.slane %v2650_v5, 9  ;;  %v4746_v49 = vld [vmem:[#allocation2 + $0x64] sm:$0xf] }
  0xbb   : > { %4365 = vmatpush3.bf16.msra.mxu0 %v3143_v46  ;;  %4336 = vmatprep.mubr.msk.bf16.mxu0 %vm850_vm8, %v5504_v42  ;;  %v2799_v1 = vsel %vm4965_vm14, %v3894_v44, %v2798_v27  ;;  %v2800_v50 = vrot.slane %v2798_v27, 4  ;;  %v2805_v18 = vrot.slane %v5338_v26, 5  ;;  %v2808_v6 = vrot.slane %v5345_v45, 5 }
  0xbc   : > { %4699 = vmatprep.subr.msk.bf16.mxu0 %vm899_vm0, %v5549_v4  ;;  %v2795_v46 = vsel %vm4965_vm14, %v2793_v15, %v2794_v52  ;;  %v3896_v59 = vrot.slane %v2651_v39, 9  ;;  %v2812_v34 = vrot.slane %v5353_v61, 5  ;;  %v2815_v30 = vrot.slane %v5365_v10, 5  ;;  %v2653_v10 = vld [vmem:[#allocation2 + $0xc0] sm:$0xe] }
  0xbd   : > { %v5574_v54 = vcombine.low %v2792_v33, %v2795_v46  ;;  %v2802_v12 = vsel %vm4965_vm14, %v2800_v50, %v2801_v11  ;;  %v2806_v26 = vsel %vm4965_vm14, %v3895_v21, %v2805_v18  ;;  %v2807_v53 = vrot.slane %v2805_v18, 4  ;;  %v2645_v39 = vld [vmem:[#allocation2 + $0x60] sm:$0xe] }
  0xbe   : > { %4183 = vmatmul.mubr.msk.bf16.gmra.mrb[20].mxu1 %vm850_vm8, %v5212_v43  ;;  %v5582_v32 = vcombine.low %v2799_v1, %v2802_v12  ;;  %v2813_v45 = vsel %vm4965_vm14, %v3896_v59, %v2812_v34  ;;  %v2814_v61 = vrot.slane %v2812_v34, 4  ;;  %v3897_v5 = vrot.slane %v2652_v0, 9 }
  0xbf   : > { %4186 = vmatprep.mubr.msk.bf16.mxu1 %vm850_vm8, %v5233_v16  ;;  %v2809_v25 = vsel %vm4965_vm14, %v2807_v53, %v2808_v6  ;;  %v2819_v23 = vrot.slane %v5363_v37, 5  ;;  %v2822_v48 = vrot.slane %v5382_v62, 5  ;;  %v2770_v52 = vrot.slane %v4746_v49, 5 }
  0xc0   : > { %v5593_v24 = vcombine.low %v2806_v26, %v2809_v25  ;;  %v2816_v44 = vsel %vm4965_vm14, %v2814_v61, %v2815_v30  ;;  %v1499_v27 = vshrl.u32 %v1441_v3, 16  ;;  %v1502_v62 = vshll.u32 %v1441_v3, 16 }
  0xc1   : > { %v5599_v33 = vcombine.low %v2813_v45, %v2816_v44  ;;  %v2820_v37 = vsel %vm4965_vm14, %v3897_v5, %v2819_v23  ;;  %v2821_v15 = vrot.slane %v2819_v23, 4  ;;  %v1508_v1 = vshll.u32 %v5423_v38, 16  ;;  %v4747_v5 = vld [vmem:[#allocation2 + $0x68] sm:$0x1] }
  0xc2   : > { %4337 = vmatmul.mubr.msk.bf16.gmra.mrb[4].mxu0 %vm850_vm8, %v5510_v55  ;;  %v1501_v11 = vrot.slane %v1499_v27, 4  ;;  %v1512_v50 = vshrl.u32 %v5423_v38, 16  ;;  %v1518_v21 = vshll.u32 %v5443_v60, 16  ;;  %v1504_v46 = vrot.slane %v1502_v62, 5  ;;  %v4752_v62 = vld [vmem:[#allocation2 + $0x78] sm:$0xff]  }
  0xc3   : > { %4340 = vmatprep.mubr.msk.bf16.mxu0 %vm850_vm8, %v5516_v2  ;;  %v2823_v18 = vsel %vm4965_vm14, %v2821_v15, %v2822_v48  ;;  %v3898_v6 = vrot.slane %v2653_v10, 9  ;;  %v2826_v59 = vrot.slane %v5390_v19, 5  ;;  %v3890_v34 = vrot.slane %v2645_v39, 9 }
  0xc4   : > { %v5611_v0 = vcombine.low %v2820_v37, %v2823_v18  ;;  %v1510_v12 = vrot.slane %v1508_v1, 5  ;;  %v1514_v26 = vrot.slane %v1512_v50, 4  ;;  %v1505_v53 = vor.u32 %v1504_v46, %v1501_v11  ;;  %v6076_v1 = vld [vmem:[#allocation8_spill] sm:$0xff]  ;;  %v6077_v50 = vld [vmem:[#allocation9_spill] sm:$0xff]  ;;  %v6079_v18 = vld [vmem:[#allocation11_spill] sm:$0xff] }
  0xc5   : > { %v2827_v3 = vsel %vm4965_vm14, %v3898_v6, %v2826_v59  ;;  %v2828_v45 = vrot.slane %v2826_v59, 4  ;;  %v2829_v38 = vrot.slane %v5439_v35, 5  ;;  %v5620_v60 = vcombine.low %v5520_v51, %v5537_v20  ;;  %v6080_v46 = vld [vmem:[#allocation12_spill] sm:$0xff]  ;;  %v6081_v6 = vld [vmem:[#allocation14_spill] sm:$0xff]  ;;  %v6082_v59 = vld [vmem:[#allocation15_spill] sm:$0xff] }
  0xc6   : > { %4187 = vmatmul.mubr.msk.bf16.gmra.mrb[24].mxu1 %vm850_vm8, %v5252_v58  ;;  %v2765_v19 = vrot.slane %v2763_v22, 4  ;;  %v1515_v61 = vor.u32 %v1514_v26, %v1510_v12  ;;  %v1520_v30 = vrot.slane %v1518_v21, 5  ;;  %v2772_v25 = vrot.slane %v2770_v52, 4  ;;  %v6078_v21 = vld [vmem:[#allocation10_spill] sm:$0xff] }
  0xc7   : > { %4190 = vmatprep.mubr.msk.bf16.mxu1 %vm850_vm8, %v5275_v13  ;;  %v2773_v23 = vrot.slane %v4747_v5, 5  ;;  %v1506_v48 = vrot.slane %v1505_v53, 4  ;;  %v2830_v35 = vsel %vm4965_vm14, %v2828_v45, %v2829_v38  ;;  %v2764_v20 = vsel %vm4965_vm14, %v3889_v40, %v2763_v22  ;;  %v6067_v40 = vld [vmem:[#allocation22_spill] sm:$0xff] }
  0xc8   : > { %v1516_v49 = vrot.slane %v1515_v61, 4  ;;  %v5628_v44 = vcombine.low %v2827_v3, %v2830_v35  ;;  %v2767_v27 = vsel %vm4965_vm14, %v2765_v19, %v2766_v56  ;;  %v2771_v39 = vsel %vm4965_vm14, %v3890_v34, %v2770_v52  ;;  %v4749_v22 = vld [vmem:[#allocation2 + $0x54] sm:$0xff]   ;;  %v4750_v56 = vld [vmem:[#allocation2 + $0x60] sm:$0xff]   ;;  %v4751_v52 = vld [vmem:[#allocation2 + $0x6c] sm:$0xff]  }
  0xc9   : > { %v1511_v51 = vsel %vm4977_vm15, %v1506_v48, %v1510_v12  ;;  %v2774_v37 = vsel %vm4965_vm14, %v2772_v25, %v2773_v23  ;;  %v5652_v15 = vcombine.low %v2764_v20, %v2767_v27  ;;  %v2032_v7 = vsel %vm899_vm0, %v1982_v29, 0  ;;  %v6069_v29 = vld [vmem:[#allocation25_spill] sm:$0xff]  ;;  %v6083_v34 = vld [vmem:[#allocation16_spill] sm:$0xff]  ;;  %v6085_v12 = vld [vmem:[#allocation19_spill] sm:$0xff] }
  0xca   : > { %4341 = vmatmul.mubr.msk.bf16.gmra.mrb[8].mxu0 %vm850_vm8, %v5523_v63  ;;  %v1521_v10 = vsel %vm4977_vm15, %v1516_v49, %v1520_v30  ;;  %v5656_v9 = vcombine.low %v2771_v39, %v2774_v37  ;;  %v3346_v11 = vsel %vm899_vm0, %v5549_v4, 0  ;;  %v6075_v4 = vld [vmem:[#allocation7_spill] sm:$0xff]  ;;  %v6089_v3 = vld [vmem:[#allocation26_spill] sm:$0xff]  ;;  %v5844_v27 = vld [vmem:[%s5996_s2] ss:$0 sm:$0xff] }
  0xcb   : > { %4344 = vmatprep.mubr.msk.bf16.mxu0 %vm850_vm8, %v5620_v60  ;;  %v3814_v31 = vcombine.low %v1511_v51, %v1521_v10  ;;  %v5849_v37 = vld [vmem:[%s5997_s3] ss:$0 sm:$0xff] }
  0xce   : > { %4191 = vmatmul.mubr.msk.bf16.gmra.mrb[28].mxu1 %vm850_vm8, %v5288_v47 }
  0xcf   : > { %4196 = vmatprep.mubr.msk.bf16.mxu1 %vm850_vm8, %v5375_v14  ;;  %v4748_v14 = vld [vmem:[%s5995_s1 + $0x8] sm:$0x3] }
  0xd2   : > { %4345 = vmatmul.mubr.msk.bf16.gmra.mrb[12].mxu0 %vm850_vm8, %v5652_v15 }
  0xd3   : > { %4348 = vmatprep.mubr.msk.bf16.mxu0 %vm850_vm8, %v5656_v9 }
  0xd6   : > { %4197 = vmatmul.mubr.msk.bf16.vlgmr.msra.gmra.mrb[0].mxu1 %vm850_vm8, %v6066_v36 }
  0xd7   : > { %4200 = vmatprep.mubr.msk.bf16.mxu1 %vm850_vm8, %v6067_v40  ;;  %4229 = vmatpush3.bf16.msra.mxu1 %v2032_v7 }
  0xd8   : > { %4695 = vmatprep.subr.msk.bf16.mxu1 %vm899_vm0, %v4748_v14 }
  0xda   : > { %4349 = vmatmul.mubr.msk.bf16.gmra.mrb[16].mxu0 %vm850_vm8, %v5553_v57 }
  0xdb   : > { %4352 = vmatprep.mubr.msk.bf16.mxu0 %vm850_vm8, %v5560_v17 }
  0xde   : > { %4201 = vmatmul.mubr.msk.bf16.gmra.mrb[4].mxu1 %vm850_vm8, %v6068_v28 }
  0xdf   : > { %4204 = vmatprep.mubr.msk.bf16.mxu1 %vm850_vm8, %v6069_v29 }
  0xe2   : > { %4353 = vmatmul.mubr.msk.bf16.gmra.mrb[20].mxu0 %vm850_vm8, %v5574_v54 }
  0xe3   : > { %4356 = vmatprep.mubr.msk.bf16.mxu0 %vm850_vm8, %v5582_v32 }
  0xe6   : > { %4205 = vmatmul.mubr.msk.bf16.gmra.mrb[8].mxu1 %vm850_vm8, %v4749_v22 }
  0xe7   : > { %4208 = vmatprep.mubr.msk.bf16.mxu1 %vm850_vm8, %v4750_v56 }
  0xea   : > { %4357 = vmatmul.mubr.msk.bf16.gmra.mrb[24].mxu0 %vm850_vm8, %v5593_v24 }
  0xeb   : > { %4360 = vmatprep.mubr.msk.bf16.mxu0 %vm850_vm8, %v5599_v33 }
  0xee   : > { %4209 = vmatmul.mubr.msk.bf16.gmra.mrb[12].mxu1 %vm850_vm8, %v4751_v52 }
  0xef   : > { %4212 = vmatprep.mubr.msk.bf16.mxu1 %vm850_vm8, %v4752_v62 }
  0xf2   : > { %4361 = vmatmul.mubr.msk.bf16.gmra.mrb[28].mxu0 %vm850_vm8, %v5611_v0 }
  0xf3   : > { %4366 = vmatprep.mubr.msk.bf16.mxu0 %vm850_vm8, %v4983_v8  ;;  %v6070_v8 = vld [vmem:[#allocation13_spill] sm:$0xff] }
  0xf6   : > { %4213 = vmatmul.mubr.msk.bf16.gmra.mrb[16].mxu1 %vm850_vm8, %v5212_v43  ;;  %v4730_v43 = vld [vmem:[#allocation2 + $0xcc] sm:$0xff]  }
  0xf7   : > { %4216 = vmatprep.mubr.msk.bf16.mxu1 %vm850_vm8, %v5233_v16  ;;  %v6071_v16 = vld [vmem:[#allocation4_spill] sm:$0xff] }
  0xfa   : > { %4367 = vmatmul.mubr.msk.bf16.vlgmr.msra.gmra.mrb[0].mxu0 %vm850_vm8, %v5504_v42 }
  0xfb   : > { %4399 = vmatpush3.bf16.msra.mxu0 %v3346_v11  ;;  %4370 = vmatprep.mubr.msk.bf16.mxu0 %vm850_vm8, %v5510_v55 }
  0xfe   : > { %4217 = vmatmul.mubr.msk.bf16.gmra.mrb[20].mxu1 %vm850_vm8, %v5252_v58  ;;  %v6072_v58 = vld [vmem:[#allocation5_spill] sm:$0xff] }
  0xff   : > { %4220 = vmatprep.mubr.msk.bf16.mxu1 %vm850_vm8, %v5275_v13  ;;  %v6073_v13 = vld [vmem:[#allocation3_spill] sm:$0xff] }
 0x102   : > { %4371 = vmatmul.mubr.msk.bf16.gmra.mrb[4].mxu0 %vm850_vm8, %v5516_v2 }
 0x103   : > { %4374 = vmatprep.mubr.msk.bf16.mxu0 %vm850_vm8, %v5523_v63 }
 0x106   : > { %4221 = vmatmul.mubr.msk.bf16.gmra.mrb[24].mxu1 %vm850_vm8, %v5288_v47  ;;  %v6074_v47 = vld [vmem:[#allocation6_spill] sm:$0xff] }
 0x107   : > { %4224 = vmatprep.mubr.msk.bf16.mxu1 %vm850_vm8, %v6070_v8 }
 0x10a   : > { %4375 = vmatmul.mubr.msk.bf16.gmra.mrb[8].mxu0 %vm850_vm8, %v5620_v60 }
 0x10b   : > { %4378 = vmatprep.mubr.msk.bf16.mxu0 %vm850_vm8, %v5652_v15 }
 0x10e   : > { %4225 = vmatmul.mubr.msk.bf16.gmra.mrb[28].mxu1 %vm850_vm8, %v4730_v43 }
 0x10f   : > { %4230 = vmatprep.mubr.msk.bf16.mxu1 %vm850_vm8, %v3814_v31 }
 0x112   : > { %4379 = vmatmul.mubr.msk.bf16.gmra.mrb[12].mxu0 %vm850_vm8, %v5656_v9 }
 0x113   : > { %4382 = vmatprep.mubr.msk.bf16.mxu0 %vm850_vm8, %v5553_v57 }
 0x116   : > { %4231 = vmatmul.mubr.msk.bf16.vlgmr.msra.gmra.mrb[0].mxu1 %vm850_vm8, %v6071_v16 }
 0x117   : > { %4234 = vmatprep.mubr.msk.bf16.mxu1 %vm850_vm8, %v6072_v58  ;;  %4433 = vmatpush3.bf16.msra.mxu1 %v6073_v13 }
 0x11a   : > { %4383 = vmatmul.mubr.msk.bf16.gmra.mrb[16].mxu0 %vm850_vm8, %v5560_v17 }
 0x11b   : > { %4386 = vmatprep.mubr.msk.bf16.mxu0 %vm850_vm8, %v5574_v54 }
 0x11e   : > { %4235 = vmatmul.mubr.msk.bf16.gmra.mrb[4].mxu1 %vm850_vm8, %v6074_v47 }
 0x11f   : > { %4238 = vmatprep.mubr.msk.bf16.mxu1 %vm850_vm8, %v6075_v4 }
 0x122   : > { %4387 = vmatmul.mubr.msk.bf16.gmra.mrb[20].mxu0 %vm850_vm8, %v5582_v32 }
 0x123   : > { %4390 = vmatprep.mubr.msk.bf16.mxu0 %vm850_vm8, %v5593_v24 }
 0x126   : > { %4239 = vmatmul.mubr.msk.bf16.gmra.mrb[8].mxu1 %vm850_vm8, %v6076_v1 }
 0x127   : > { %4242 = vmatprep.mubr.msk.bf16.mxu1 %vm850_vm8, %v6077_v50 }
 0x12a   : > { %4391 = vmatmul.mubr.msk.bf16.gmra.mrb[24].mxu0 %vm850_vm8, %v5599_v33 }
 0x12b   : > { %4394 = vmatprep.mubr.msk.bf16.mxu0 %vm850_vm8, %v5611_v0 }
 0x12e   : > { %4243 = vmatmul.mubr.msk.bf16.gmra.mrb[12].mxu1 %vm850_vm8, %v6078_v21 }
 0x12f   : > { %4246 = vmatprep.mubr.msk.bf16.mxu1 %vm850_vm8, %v6079_v18 }
 0x132   : > { %4395 = vmatmul.mubr.msk.bf16.gmra.mrb[28].mxu0 %vm850_vm8, %v5628_v44 }
 0x133   : > { %4400 = vmatprep.mubr.msk.bf16.mxu0 %vm850_vm8, %v5504_v42  ;;  %v6084_v42 = vld [vmem:[#allocation17_spill] sm:$0xff] }
 0x136   : > { %4247 = vmatmul.mubr.msk.bf16.gmra.mrb[16].mxu1 %vm850_vm8, %v6080_v46 }
 0x137   : > { %4250 = vmatprep.mubr.msk.bf16.mxu1 %vm850_vm8, %v6081_v6 }
 0x13a   : > { %4401 = vmatmul.mubr.msk.bf16.vlgmr.msra.gmra.mrb[0].mxu0 %vm850_vm8, %v5510_v55  ;;  %v6086_v55 = vld [vmem:[#allocation23_spill] sm:$0xff] }
 0x13b   : > { %4404 = vmatprep.mubr.msk.bf16.mxu0 %vm850_vm8, %v5516_v2  ;;  %v6087_v2 = vld [vmem:[#allocation18_spill] sm:$0xff] }
 0x13e   : > { %4251 = vmatmul.mubr.msk.bf16.gmra.mrb[20].mxu1 %vm850_vm8, %v6082_v59 }
 0x13f   : > { %4254 = vmatprep.mubr.msk.bf16.mxu1 %vm850_vm8, %v6083_v34 }
 0x142   : > { %4405 = vmatmul.mubr.msk.bf16.gmra.mrb[4].mxu0 %vm850_vm8, %v5523_v63  ;;  %v2833_v63 = vrot.slane %v6087_v2, 5 }
 0x143   : > { %4408 = vmatprep.mubr.msk.bf16.mxu0 %vm850_vm8, %v5620_v60 }
 0x146   : > { %4255 = vmatmul.mubr.msk.bf16.gmra.mrb[24].mxu1 %vm850_vm8, %v6084_v42 }
 0x147   : > { %4258 = vmatprep.mubr.msk.bf16.mxu1 %vm850_vm8, %v6085_v12 }
 0x14a   : > { %4409 = vmatmul.mubr.msk.bf16.gmra.mrb[8].mxu0 %vm850_vm8, %v5652_v15 }
 0x14b   : > { %4412 = vmatprep.mubr.msk.bf16.mxu0 %vm850_vm8, %v5656_v9 }
 0x14e   : > { %4259 = vmatmul.mubr.msk.bf16.gmra.mrb[28].mxu1 %vm850_vm8, %v6086_v55 }
 0x14f   : > { %4280 = vmatprep.mubr.msk.bf16.mxu1 %vm850_vm8, %v6080_v46 }
 0x152   : > { %4413 = vmatmul.mubr.msk.bf16.gmra.mrb[12].mxu0 %vm850_vm8, %v5553_v57  ;;  %v2654_v57 = vld [vmem:[#allocation2 + $0xcc] sm:$0xe] }
 0x153   : > { %4416 = vmatprep.mubr.msk.bf16.mxu0 %vm850_vm8, %v5560_v17  ;;  %v3899_v17 = vrot.slane %v2654_v57, 9 }
 0x156   : > { %4281 = vmatmul.mubr.msk.bf16.vlgmr.msra.gmra.mrb[16].mxu1 %vm850_vm8, %v6081_v6 }
 0x157   : > { %4284 = vmatprep.mubr.msk.bf16.mxu1 %vm850_vm8, %v6082_v59 }
 0x15a   : > { %4417 = vmatmul.mubr.msk.bf16.gmra.mrb[16].mxu0 %vm850_vm8, %v5574_v54  ;;  %v2835_v54 = vrot.slane %v2833_v63, 4 }
 0x15b   : > { %4420 = vmatprep.mubr.msk.bf16.mxu0 %vm850_vm8, %v5582_v32  ;;  %v6088_v32 = vld [vmem:[#allocation21_spill] sm:$0xff] }
 0x15c   : > { %v2836_v26 = vrot.slane %v6088_v32, 5 }
 0x15e   : > { %4285 = vmatmul.mubr.msk.bf16.gmra.mrb[20].mxu1 %vm850_vm8, %v6083_v34 }
 0x15f   : > { %4288 = vmatprep.mubr.msk.bf16.mxu1 %vm850_vm8, %v6084_v42 }
 0x162   : > { %4421 = vmatmul.mubr.msk.bf16.gmra.mrb[20].mxu0 %vm850_vm8, %v5593_v24  ;;  %v2834_v24 = vsel %vm4965_vm14, %v3899_v17, %v2833_v63 }
 0x163   : > { %4424 = vmatprep.mubr.msk.bf16.mxu0 %vm850_vm8, %v5599_v33  ;;  %v2837_v33 = vsel %vm4965_vm14, %v2835_v54, %v2836_v26 }
 0x164   : > { %v3950_v53 = vcombine.low %v2834_v24, %v2837_v33 }
 0x166   : > { %4289 = vmatmul.mubr.msk.bf16.gmra.mrb[24].mxu1 %vm850_vm8, %v6085_v12 }
 0x167   : > { %4292 = vmatprep.mubr.msk.bf16.mxu1 %vm850_vm8, %v6086_v55 }
 0x16a   : > { %4425 = vmatmul.mubr.msk.bf16.gmra.mrb[24].mxu0 %vm850_vm8, %v5611_v0 }
 0x16b   : > { %4428 = vmatprep.mubr.msk.bf16.mxu0 %vm850_vm8, %v5628_v44 }
 0x16e   : > { %4293 = vmatmul.mubr.msk.bf16.gmra.mrb[28].mxu1 %vm850_vm8, %v6089_v3 }
 0x172   : > { %4429 = vmatmul.mubr.msk.bf16.gmra.mrb[28].mxu0 %vm850_vm8, %v3950_v53 }
 0x1e9   : > { %v4232_v45 = vpop.f32.mrb[0].mxu1 }
 0x1ea   : > { %v2068_v38 = vpop.f32.mrb[1].mxu1 }
 0x1eb   : > { %v4233_v60 = vpop.f32.mrb[2].mxu1 }
 0x1ec   : > { %v2071_v19 = vpop.f32.mrb[3].mxu1 }
 0x1f1   : > { %v4236_v0 = vpop.f32.mrb[4].mxu1 }
 0x1f2   : > { %v2084_v61 = vpop.f32.mrb[5].mxu1 }
 0x1f3   : > { %v4237_v30 = vpop.f32.mrb[6].mxu1 }
 0x1f4   : > { %v2087_v25 = vpop.f32.mrb[7].mxu1 }
 0x1f9   : > { %v4240_v5 = vpop.f32.mrb[8].mxu1 }
 0x1fa   : > { %v2100_v23 = vpop.f32.mrb[9].mxu1 }
 0x1fb   : > { %v5829_v48 = vpop.f32.mrb[10].mxu1 }
 0x1fc   : > { %v5831_v41 = vpop.f32.mrb[11].mxu1 }
 0x201   : > { %v5833_v35 = vpop.f32.mrb[12].mxu1 }
 0x202   : > { %v5835_v49 = vpop.f32.mrb[13].mxu1 }
 0x203   : > { %v5837_v44 = vpop.f32.mrb[14].mxu1 }
 0x204   : > { %v5839_v51 = vpop.f32.mrb[15].mxu1 }
 0x20d   : > { %v4402_v20 = vpop.f32.mrb[0].mxu0 }
 0x20e   : > { %v4434_v10 = vadd.f32 %v4402_v20, %v4232_v45  ;;  %v3382_v39 = vpop.f32.mrb[1].mxu0 }
 0x20f   : > { %v4435_v31 = vadd.f32 %v3382_v39, %v2068_v38  ;;  %v4403_v15 = vpop.f32.mrb[2].mxu0 }
 0x210   : > { %v3550_v9 = vmul.f32 %v4434_v10, %v5844_v27  ;;  %v4436_v7 = vadd.f32 %v4403_v15, %v4233_v60  ;;  %v3385_v36 = vpop.f32.mrb[3].mxu0 }
 0x211   : > { %v3548_v40 = vmul.f32 %v4435_v31, %v5844_v27  ;;  %v4437_v14 = vadd.f32 %v3385_v36, %v2071_v19 }
 0x212   : > { %v3589_v28 = vadd.f32 %v5849_v37, %v3550_v9  ;;  %v3551_v29 = vmul.f32 %v4436_v7, %v5844_v27 }
 0x213   : > { %v3587_v22 = vadd.f32 %v5849_v37, %v3548_v40  ;;  %v3549_v56 = vmul.f32 %v4437_v14, %v5844_v27 }
 0x214   : > { %v3621_v52 = vmax.f32 %v3589_v28, 0.0  ;;  %v3590_v62 = vadd.f32 %v5849_v37, %v3551_v29 }
 0x215   : > { %v3619_v11 = vmax.f32 %v3587_v22, 0.0  ;;  %v3588_v8 = vadd.f32 %v5849_v37, %v3549_v56  ;;  %v4406_v43 = vpop.f32.mrb[4].mxu0 }
 0x216   : > { %3653 = vst.msk [vmem:[%s5859_s25 + $0x10] sm:$0xff] %vm850_vm8, %v3621_v52  ;;  %v3622_v16 = vmax.f32 %v3590_v62, 0.0  ;;  %v4438_v58 = vadd.f32 %v4406_v43, %v4236_v0  ;;  %v3398_v13 = vpop.f32.mrb[5].mxu0 }
 0x217   : > { %3651 = vst.msk [vmem:[%s5859_s25] sm:$0xff] %vm850_vm8, %v3619_v11  ;;  %v3620_v47 = vmax.f32 %v3588_v8, 0.0  ;;  %v4439_v4 = vadd.f32 %v3398_v13, %v2084_v61  ;;  %v4407_v1 = vpop.f32.mrb[6].mxu0 }
 0x218   : > { %3654 = vst.msk [vmem:[%s5859_s25 + $0x18] sm:$0xff] %vm850_vm8, %v3622_v16  ;;  %v3554_v50 = vmul.f32 %v4438_v58, %v5844_v27  ;;  %v4440_v21 = vadd.f32 %v4407_v1, %v4237_v30  ;;  %v3401_v18 = vpop.f32.mrb[7].mxu0 }
 0x219   : > { %3652 = vst.msk [vmem:[%s5859_s25 + $0x8] sm:$0xff] %vm850_vm8, %v3620_v47  ;;  %v3552_v46 = vmul.f32 %v4439_v4, %v5844_v27  ;;  %v4441_v6 = vadd.f32 %v3401_v18, %v2087_v25 }
 0x21a   : > { %v3593_v59 = vadd.f32 %v5849_v37, %v3554_v50  ;;  %v3555_v34 = vmul.f32 %v4440_v21, %v5844_v27 }
 0x21b   : > { %v3591_v42 = vadd.f32 %v5849_v37, %v3552_v46  ;;  %v3553_v12 = vmul.f32 %v4441_v6, %v5844_v27 }
 0x21c   : > { %v3625_v55 = vmax.f32 %v3593_v59, 0.0  ;;  %v3594_v2 = vadd.f32 %v5849_v37, %v3555_v34 }
 0x21d   : > { %v3623_v63 = vmax.f32 %v3591_v42, 0.0  ;;  %v3592_v57 = vadd.f32 %v5849_v37, %v3553_v12  ;;  %v4410_v17 = vpop.f32.mrb[8].mxu0 }
 0x21e   : > { %3657 = vst.msk [vmem:[%s5859_s25 + $0x30] sm:$0xff] %vm850_vm8, %v3625_v55  ;;  %v3626_v54 = vmax.f32 %v3594_v2, 0.0  ;;  %v4442_v32 = vadd.f32 %v4410_v17, %v4240_v5  ;;  %v3414_v26 = vpop.f32.mrb[9].mxu0 }
 0x21f   : > { %3655 = vst.msk [vmem:[%s5859_s25 + $0x20] sm:$0xff] %vm850_vm8, %v3623_v63  ;;  %v3624_v24 = vmax.f32 %v3592_v57, 0.0  ;;  %v4443_v33 = vadd.f32 %v3414_v26, %v2100_v23  ;;  %v4411_v53 = vpop.f32.mrb[10].mxu0 }
 0x220   : > { %3658 = vst.msk [vmem:[%s5859_s25 + $0x38] sm:$0xff] %vm850_vm8, %v3626_v54  ;;  %v3558_v3 = vmul.f32 %v4442_v32, %v5844_v27  ;;  %v4444_v45 = vadd.f32 %v4411_v53, %v5829_v48  ;;  %v3417_v38 = vpop.f32.mrb[11].mxu0 }
 0x221   : > { %3656 = vst.msk [vmem:[%s5859_s25 + $0x28] sm:$0xff] %vm850_vm8, %v3624_v24  ;;  %v3556_v60 = vmul.f32 %v4443_v33, %v5844_v27  ;;  %v4445_v19 = vadd.f32 %v3417_v38, %v5831_v41 }
 0x222   : > { %v3597_v0 = vadd.f32 %v5849_v37, %v3558_v3  ;;  %v3559_v61 = vmul.f32 %v4444_v45, %v5844_v27 }
 0x223   : > { %v3595_v30 = vadd.f32 %v5849_v37, %v3556_v60  ;;  %v3557_v25 = vmul.f32 %v4445_v19, %v5844_v27 }
 0x224   : > { %v3629_v5 = vmax.f32 %v3597_v0, 0.0  ;;  %v3598_v23 = vadd.f32 %v5849_v37, %v3559_v61 }
 0x225   : > { %v3627_v48 = vmax.f32 %v3595_v30, 0.0  ;;  %v3596_v20 = vadd.f32 %v5849_v37, %v3557_v25  ;;  %v4414_v10 = vpop.f32.mrb[12].mxu0 }
 0x226   : > { %3661 = vst.msk [vmem:[%s5859_s25 + $0x50] sm:$0xff] %vm850_vm8, %v3629_v5  ;;  %v3630_v41 = vmax.f32 %v3598_v23, 0.0  ;;  %v4446_v39 = vadd.f32 %v4414_v10, %v5833_v35  ;;  %v3430_v31 = vpop.f32.mrb[13].mxu0 }
 0x227   : > { %3659 = vst.msk [vmem:[%s5859_s25 + $0x40] sm:$0xff] %vm850_vm8, %v3627_v48  ;;  %v3628_v15 = vmax.f32 %v3596_v20, 0.0  ;;  %v4447_v9 = vadd.f32 %v3430_v31, %v5835_v49  ;;  %v4415_v7 = vpop.f32.mrb[14].mxu0 }
 0x228   : > { %3662 = vst.msk [vmem:[%s5859_s25 + $0x58] sm:$0xff] %vm850_vm8, %v3630_v41  ;;  %v3562_v36 = vmul.f32 %v4446_v39, %v5844_v27  ;;  %v4448_v40 = vadd.f32 %v4415_v7, %v5837_v44  ;;  %v3433_v14 = vpop.f32.mrb[15].mxu0 }
 0x229   : > { %3660 = vst.msk [vmem:[%s5859_s25 + $0x48] sm:$0xff] %vm850_vm8, %v3628_v15  ;;  %v3560_v28 = vmul.f32 %v4447_v9, %v5844_v27  ;;  %v4449_v35 = vadd.f32 %v3433_v14, %v5839_v51  ;;  %v4282_v29 = vpop.f32.mrb[16].mxu1 }
 0x22a   : > { %v3601_v22 = vadd.f32 %v5849_v37, %v3562_v36  ;;  %v3563_v49 = vmul.f32 %v4448_v40, %v5844_v27  ;;  %v2335_v56 = vpop.f32.mrb[17].mxu1 }
 0x22b   : > { %v3599_v52 = vadd.f32 %v5849_v37, %v3560_v28  ;;  %v3561_v62 = vmul.f32 %v4449_v35, %v5844_v27  ;;  %v4283_v11 = vpop.f32.mrb[18].mxu1 }
 0x22c   : > { %v3633_v44 = vmax.f32 %v3601_v22, 0.0  ;;  %v3602_v8 = vadd.f32 %v5849_v37, %v3563_v49  ;;  %v2338_v16 = vpop.f32.mrb[19].mxu1 }
 0x22d   : > { %v3631_v43 = vmax.f32 %v3599_v52, 0.0  ;;  %v3600_v51 = vadd.f32 %v5849_v37, %v3561_v62  ;;  %v4418_v58 = vpop.f32.mrb[16].mxu0 }
 0x22e   : > { %3665 = vst.msk [vmem:[%s5859_s25 + $0x70] sm:$0xff] %vm850_vm8, %v3633_v44  ;;  %v3634_v13 = vmax.f32 %v3602_v8, 0.0  ;;  %v4450_v47 = vadd.f32 %v4418_v58, %v4282_v29  ;;  %v3446_v4 = vpop.f32.mrb[17].mxu0 }
 0x22f   : > { %3663 = vst.msk [vmem:[%s5859_s25 + $0x60] sm:$0xff] %vm850_vm8, %v3631_v43  ;;  %v3632_v1 = vmax.f32 %v3600_v51, 0.0  ;;  %v4451_v50 = vadd.f32 %v3446_v4, %v2335_v56  ;;  %v4419_v21 = vpop.f32.mrb[18].mxu0 }
 0x230   : > { %3666 = vst.msk [vmem:[%s5859_s25 + $0x78] sm:$0xff] %vm850_vm8, %v3634_v13  ;;  %v3566_v18 = vmul.f32 %v4450_v47, %v5844_v27  ;;  %v4452_v46 = vadd.f32 %v4419_v21, %v4283_v11  ;;  %v3449_v6 = vpop.f32.mrb[19].mxu0 }
 0x231   : > { %3664 = vst.msk [vmem:[%s5859_s25 + $0x68] sm:$0xff] %vm850_vm8, %v3632_v1  ;;  %v3564_v59 = vmul.f32 %v4451_v50, %v5844_v27  ;;  %v4453_v34 = vadd.f32 %v3449_v6, %v2338_v16  ;;  %v4286_v42 = vpop.f32.mrb[20].mxu1 }
 0x232   : > { %v3605_v12 = vadd.f32 %v5849_v37, %v3566_v18  ;;  %v3567_v55 = vmul.f32 %v4452_v46, %v5844_v27  ;;  %v2351_v2 = vpop.f32.mrb[21].mxu1 }
 0x233   : > { %v3603_v63 = vadd.f32 %v5849_v37, %v3564_v59  ;;  %v3565_v57 = vmul.f32 %v4453_v34, %v5844_v27  ;;  %v4287_v54 = vpop.f32.mrb[22].mxu1 }
 0x234   : > { %v3637_v17 = vmax.f32 %v3605_v12, 0.0  ;;  %v3606_v32 = vadd.f32 %v5849_v37, %v3567_v55  ;;  %v2354_v24 = vpop.f32.mrb[23].mxu1 }
 0x235   : > { %v3635_v26 = vmax.f32 %v3603_v63, 0.0  ;;  %v3604_v33 = vadd.f32 %v5849_v37, %v3565_v57  ;;  %v4422_v53 = vpop.f32.mrb[20].mxu0 }
 0x236   : > { %3669 = vst.msk [vmem:[%s5859_s25 + $0x90] sm:$0xff] %vm850_vm8, %v3637_v17  ;;  %v3638_v3 = vmax.f32 %v3606_v32, 0.0  ;;  %v4454_v45 = vadd.f32 %v4422_v53, %v4286_v42  ;;  %v3462_v38 = vpop.f32.mrb[21].mxu0 }
 0x237   : > { %3667 = vst.msk [vmem:[%s5859_s25 + $0x80] sm:$0xff] %vm850_vm8, %v3635_v26  ;;  %v3636_v60 = vmax.f32 %v3604_v33, 0.0  ;;  %v4455_v19 = vadd.f32 %v3462_v38, %v2351_v2  ;;  %v4423_v0 = vpop.f32.mrb[22].mxu0 }
 0x238   : > { %3670 = vst.msk [vmem:[%s5859_s25 + $0x98] sm:$0xff] %vm850_vm8, %v3638_v3  ;;  %v3570_v61 = vmul.f32 %v4454_v45, %v5844_v27  ;;  %v4456_v30 = vadd.f32 %v4423_v0, %v4287_v54  ;;  %v3465_v25 = vpop.f32.mrb[23].mxu0 }
 0x239   : > { %3668 = vst.msk [vmem:[%s5859_s25 + $0x88] sm:$0xff] %vm850_vm8, %v3636_v60  ;;  %v3568_v5 = vmul.f32 %v4455_v19, %v5844_v27  ;;  %v4457_v23 = vadd.f32 %v3465_v25, %v2354_v24  ;;  %v4290_v48 = vpop.f32.mrb[24].mxu1 }
 0x23a   : > { %v3609_v20 = vadd.f32 %v5849_v37, %v3570_v61  ;;  %v3571_v10 = vmul.f32 %v4456_v30, %v5844_v27  ;;  %v2367_v41 = vpop.f32.mrb[25].mxu1 }
 0x23b   : > { %v3607_v39 = vadd.f32 %v5849_v37, %v3568_v5  ;;  %v3569_v31 = vmul.f32 %v4457_v23, %v5844_v27  ;;  %v4291_v9 = vpop.f32.mrb[26].mxu1 }
 0x23c   : > { %v3641_v15 = vmax.f32 %v3609_v20, 0.0  ;;  %v3610_v7 = vadd.f32 %v5849_v37, %v3571_v10  ;;  %v2370_v40 = vpop.f32.mrb[27].mxu1 }
 0x23d   : > { %v3639_v36 = vmax.f32 %v3607_v39, 0.0  ;;  %v3608_v14 = vadd.f32 %v5849_v37, %v3569_v31  ;;  %v4426_v28 = vpop.f32.mrb[24].mxu0 }
 0x23e   : > { %3673 = vst.msk [vmem:[%s5859_s25 + $0xb0] sm:$0xff] %vm850_vm8, %v3641_v15  ;;  %v3642_v35 = vmax.f32 %v3610_v7, 0.0  ;;  %v4458_v29 = vadd.f32 %v4426_v28, %v4290_v48  ;;  %v3478_v22 = vpop.f32.mrb[25].mxu0 }
 0x23f   : > { %3671 = vst.msk [vmem:[%s5859_s25 + $0xa0] sm:$0xff] %vm850_vm8, %v3639_v36  ;;  %v3640_v49 = vmax.f32 %v3608_v14, 0.0  ;;  %v4459_v56 = vadd.f32 %v3478_v22, %v2367_v41  ;;  %v4427_v52 = vpop.f32.mrb[26].mxu0 }
 0x240   : > { %3674 = vst.msk [vmem:[%s5859_s25 + $0xb8] sm:$0xff] %vm850_vm8, %v3642_v35  ;;  %v3574_v62 = vmul.f32 %v4458_v29, %v5844_v27  ;;  %v4460_v44 = vadd.f32 %v4427_v52, %v4291_v9  ;;  %v3481_v11 = vpop.f32.mrb[27].mxu0 }
 0x241   : > { %3672 = vst.msk [vmem:[%s5859_s25 + $0xa8] sm:$0xff] %vm850_vm8, %v3640_v49  ;;  %v3572_v8 = vmul.f32 %v4459_v56, %v5844_v27  ;;  %v4461_v43 = vadd.f32 %v3481_v11, %v2370_v40  ;;  %v4294_v16 = vpop.f32.mrb[28].mxu1 }
 0x242   : > { %v3613_v51 = vadd.f32 %v5849_v37, %v3574_v62  ;;  %v3575_v58 = vmul.f32 %v4460_v44, %v5844_v27  ;;  %v2383_v13 = vpop.f32.mrb[29].mxu1 }
 0x243   : > { %v3611_v47 = vadd.f32 %v5849_v37, %v3572_v8  ;;  %v3573_v4 = vmul.f32 %v4461_v43, %v5844_v27  ;;  %v4295_v50 = vpop.f32.mrb[30].mxu1 }
 0x244   : > { %v3645_v1 = vmax.f32 %v3613_v51, 0.0  ;;  %v3614_v21 = vadd.f32 %v5849_v37, %v3575_v58  ;;  %v2386_v46 = vpop.f32.mrb[31].mxu1 }
 0x245   : > { %v3643_v18 = vmax.f32 %v3611_v47, 0.0  ;;  %v3612_v6 = vadd.f32 %v5849_v37, %v3573_v4  ;;  %v4430_v59 = vpop.f32.mrb[28].mxu0 }
 0x246   : > { %3677 = vst.msk [vmem:[%s5859_s25 + $0xd0] sm:$0xff] %vm850_vm8, %v3645_v1  ;;  %v3646_v34 = vmax.f32 %v3614_v21, 0.0  ;;  %v4462_v42 = vadd.f32 %v4430_v59, %v4294_v16  ;;  %v3494_v12 = vpop.f32.mrb[29].mxu0 }
 0x247   : > { %3675 = vst.msk [vmem:[%s5859_s25 + $0xc0] sm:$0xff] %vm850_vm8, %v3643_v18  ;;  %v3644_v55 = vmax.f32 %v3612_v6, 0.0  ;;  %v4463_v2 = vadd.f32 %v3494_v12, %v2383_v13  ;;  %v4431_v63 = vpop.f32.mrb[30].mxu0 }
 0x248   : > { %3678 = vst.msk [vmem:[%s5859_s25 + $0xd8] sm:$0xff] %vm850_vm8, %v3646_v34  ;;  %v3578_v57 = vmul.f32 %v4462_v42, %v5844_v27  ;;  %v4464_v17 = vadd.f32 %v4431_v63, %v4295_v50  ;;  %v3497_v54 = vpop.f32.mrb[31].mxu0 }
 0x249   : > { %3676 = vst.msk [vmem:[%s5859_s25 + $0xc8] sm:$0xff] %vm850_vm8, %v3644_v55  ;;  %v3576_v32 = vmul.f32 %v4463_v2, %v5844_v27  ;;  %v4465_v26 = vadd.f32 %v3497_v54, %v2386_v46 }
 0x24a   : > { %v3617_v24 = vadd.f32 %v5849_v37, %v3578_v57  ;;  %v3579_v33 = vmul.f32 %v4464_v17, %v5844_v27 }
 0x24b   : > { %v3615_v53 = vadd.f32 %v5849_v37, %v3576_v32  ;;  %v3577_v3 = vmul.f32 %v4465_v26, %v5844_v27 }
 0x24c   : > { %v3649_v45 = vmax.f32 %v3617_v24, 0.0  ;;  %v3618_v38 = vadd.f32 %v5849_v37, %v3579_v33 }
 0x24d   : > { %v3647_v60 = vmax.f32 %v3615_v53, 0.0  ;;  %v3616_v19 = vadd.f32 %v5849_v37, %v3577_v3 }
 0x24e   : > { %3681 = vst.msk [vmem:[%s5859_s25 + $0xf0] sm:$0xff] %vm850_vm8, %v3649_v45  ;;  %v3650_v0 = vmax.f32 %v3618_v38, 0.0 }
 0x24f   : > { %3679 = vst.msk [vmem:[%s5859_s25 + $0xe0] sm:$0xff] %vm850_vm8, %v3647_v60  ;;  %v3648_v61 = vmax.f32 %v3616_v19, 0.0 }
 0x250   : > { %3682 = vst.msk [vmem:[%s5859_s25 + $0xf8] sm:$0xff] %vm850_vm8, %v3650_v0 }
 0x251   : > { %3680 = vst.msk [vmem:[%s5859_s25 + $0xe8] sm:$0xff] %vm850_vm8, %v3648_v61 }
 0x252 PF: > { %s14_s15 = sadd.s32 1, %s4759_s15  }
 0x253   : > { %p11_p4 = scmp.ge.s32.totalorder %s14_s15, 4  }
 0x255   :  { %13 = sbr.rel (!%p11_p4) target bundleno = 1 (0x1), region = 67 }

// kernel: up_forward.4
= control target key start
LH: loop header
LB: loop body
LE: loop exit
PB: predicated region body
PF: predicated region fallthrough
CT: control target
= control target key end

     0   :  { %s5578_s18 = smov 0   ;;  %s7396_s0 = inlined_call_operand.vmem [shape: bf16[2,16,16,4], index: 0, kind: input, shape index: {}]   ;;  %s7397_s1 = inlined_call_operand.vmem [shape: bf16[2,16,16,4], index: 1, kind: input, shape index: {}]   ;;  %s7398_s2 = inlined_call_operand.vmem [shape: bf16[72,4], index: 2, kind: input, shape index: {}]   ;;  %s7399_s3 = inlined_call_operand.vmem [shape: f32[1,4], index: 3, kind: input, shape index: {}]   ;;  %s7400_s4 = inlined_call_operand.vmem [shape: f32[1,4], index: 4, kind: input, shape index: {}]   ;;  %s7401_s5 = inlined_call_operand.vmem [shape: bf16[2,16,16,4], index: 5, kind: output, shape index: {}]  }
   0x1 LB: > { %s4475_s19 = sadd.s32 4294967295, %s5544_s18   ;;  %p4479_p0 = scmp.ge.s32.totalorder %s5544_s18, 1  ;;  %s5544_s18 = sphi %s5578_s18, %s15_s18  }
   0x2   : > { %p197_p1 = scmp.lt.s32.totalorder %s5544_s18, 3 }
   0x4   : > { %p198_p2 = pnand %p4479_p0, %p197_p1 }
   0x6   : > { %201 = sbr.rel (%p198_p2) target bundleno = 702 (0x2be), region = 40 }
   0xd   : > { %p230_p3 = scmp.lt.s32.totalorder %s4475_s19, 1  ;;  %vm246_vm0 = vcmask 60416   ;;  %v5546_v0 = vmov 0   ;;  %vm249_vm1 = vcmask 57344   ;;  %vm334_vm2 = vsmask.f32 256 }
   0xe   : > { %254 = vst.msk [vmem:[#allocation2 + $0x18] sm:$0xf] %vm246_vm0, %v5546_v0  ;;  %247 = vst.msk [vmem:[#allocation2] sm:$0xf] %vm246_vm0, %v5546_v0  ;;  %vm335_vm3 = vsmask.f32 4368 }
   0xf   : > { %s7527_s19 = smov (!%p230_p3, %s4475_s19), 1  ;;  %248 = vst.msk [vmem:[#allocation2 + $0x4] sm:$0xf] %vm246_vm0, %v5546_v0  ;;  %251 = vst.msk [vmem:[#allocation2 + $0xc] sm:$0xf] %vm246_vm0, %v5546_v0  ;;  %s5547_s24 = smov 4  }
  0x10   : > { %252 = vst.msk [vmem:[#allocation2 + $0x10] sm:$0xf] %vm246_vm0, %v5546_v0  ;;  %255 = vst.msk [vmem:[#allocation2 + $0x1c] sm:$0xf] %vm246_vm0, %v5546_v0  ;;  %s5643_s20 = sshll.u32 %s7527_s19, 7  ;;  %vm658_vm5 = vcmask 27648  }
  0x11   : > { %257 = vst.msk [vmem:[#allocation2 + $0x24] sm:$0xf] %vm246_vm0, %v5546_v0  ;;  %258 = vst.msk [vmem:[#allocation2 + $0x28] sm:$0xf] %vm246_vm0, %v5546_v0  ;;  %s5649_s23 = scalar_lea.vmem %s7397_s1, %s5643_s20  ;;  %vm659_vm6 = vsmask.f32 7938  ;;  %s5814_s27 = scalar_lea.vmem %s7396_s0, %s5643_s20 }
  0x12   : > { %260 = vst.msk [vmem:[#allocation2 + $0x30] sm:$0xf] %vm246_vm0, %v5546_v0  ;;  %261 = vst.msk [vmem:[#allocation2 + $0x34] sm:$0xf] %vm246_vm0, %v5546_v0  ;;  %v778_v1 = vld [vmem:[%s5649_s23 + $0x8] sm:$0xf]  ;;  %s7263_s6 = scalar_lea.vmem %s7401_s5, %s5643_s20 }
  0x13   : > { %263 = vst.msk [vmem:[#allocation2 + $0x3c] sm:$0xf] %vm246_vm0, %v5546_v0  ;;  %264 = vst.msk [vmem:[#allocation2 + $0x40] sm:$0xf] %vm246_vm0, %v5546_v0  ;;  %v776_v2 = vld [vmem:[%s5649_s23] sm:$0xf] }
  0x14   : > { %266 = vst.msk [vmem:[#allocation2 + $0x48] sm:$0xf] %vm246_vm0, %v5546_v0  ;;  %267 = vst.msk [vmem:[#allocation2 + $0x4c] sm:$0xf] %vm246_vm0, %v5546_v0  ;;  %v779_v3 = vld [vmem:[%s5649_s23 + $0xc] sm:$0xf] }
  0x15   : > { %269 = vst.msk [vmem:[#allocation2 + $0x54] sm:$0xf] %vm246_vm0, %v5546_v0  ;;  %270 = vst.msk [vmem:[#allocation2 + $0x58] sm:$0xf] %vm246_vm0, %v5546_v0  ;;  %v826_v4 = vshrl.u32 %v778_v1, 16  ;;  %v829_v5 = vshll.u32 %v778_v1, 16 }
  0x16   : > { %272 = vst.msk [vmem:[#allocation2 + $0x60] sm:$0xf] %vm246_vm0, %v5546_v0  ;;  %273 = vst.msk [vmem:[#allocation2 + $0x64] sm:$0xf] %vm246_vm0, %v5546_v0  ;;  %v809_v6 = vshrl.u32 %v776_v2, 16  ;;  %v812_v7 = vshll.u32 %v776_v2, 16 }
  0x17   : > { %275 = vst.msk [vmem:[#allocation2 + $0x6c] sm:$0xf] %vm246_vm0, %v5546_v0  ;;  %276 = vst.msk [vmem:[#allocation2 + $0x70] sm:$0xf] %vm246_vm0, %v5546_v0  ;;  %v777_v8 = vld [vmem:[%s5649_s23 + $0x4] sm:$0xf] }
  0x18   : > { %278 = vst.msk [vmem:[#allocation2 + $0x78] sm:$0xf] %vm246_vm0, %v5546_v0  ;;  %279 = vst.msk [vmem:[#allocation2 + $0x7c] sm:$0xf] %vm246_vm0, %v5546_v0  ;;  %v834_v9 = vshrl.u32 %v779_v3, 16  ;;  %v817_v10 = vshrl.u32 %v777_v8, 16 }
  0x19   : > { %281 = vst.msk [vmem:[#allocation2 + $0x84] sm:$0xf] %vm246_vm0, %v5546_v0  ;;  %282 = vst.msk [vmem:[#allocation2 + $0x88] sm:$0xf] %vm246_vm0, %v5546_v0  ;;  %v780_v11 = vld [vmem:[%s5649_s23 + $0x10] sm:$0xf] }
  0x1a   : > { %284 = vst.msk [vmem:[#allocation2 + $0x90] sm:$0xf] %vm246_vm0, %v5546_v0  ;;  %285 = vst.msk [vmem:[#allocation2 + $0x94] sm:$0xf] %vm246_vm0, %v5546_v0  ;;  %v828_v12 = vrot.slane %v826_v4, 7  ;;  %v811_v13 = vrot.slane %v809_v6, 7 }
  0x1b   : > { %287 = vst.msk [vmem:[#allocation2 + $0x9c] sm:$0xf] %vm246_vm0, %v5546_v0  ;;  %288 = vst.msk [vmem:[#allocation2 + $0xa0] sm:$0xf] %vm246_vm0, %v5546_v0  ;;  %v843_v14 = vshrl.u32 %v780_v11, 16  ;;  %v836_v16 = vrot.slane %v834_v9, 7 }
  0x1c   : > { %290 = vst.msk [vmem:[#allocation2 + $0xa8] sm:$0xf] %vm246_vm0, %v5546_v0  ;;  %291 = vst.msk [vmem:[#allocation2 + $0xac] sm:$0xf] %vm246_vm0, %v5546_v0  ;;  %v781_v15 = vld [vmem:[%s5649_s23 + $0x14] sm:$0xf]  ;;  %v831_v21 = vor.u32 %v829_v5, %v828_v12  ;;  %v814_v22 = vor.u32 %v812_v7, %v811_v13 }
  0x1d   : > { %293 = vst.msk [vmem:[#allocation2 + $0xb4] sm:$0xf] %vm246_vm0, %v5546_v0  ;;  %294 = vst.msk [vmem:[#allocation2 + $0xb8] sm:$0xf] %vm246_vm0, %v5546_v0  ;;  %v819_v17 = vrot.slane %v817_v10, 7  ;;  %v837_v18 = vshll.u32 %v779_v3, 16 }
  0x1e   : > { %296 = vst.msk [vmem:[#allocation2 + $0xc0] sm:$0xf] %vm246_vm0, %v5546_v0  ;;  %297 = vst.msk [vmem:[#allocation2 + $0xc4] sm:$0xf] %vm246_vm0, %v5546_v0  ;;  %v851_v19 = vshrl.u32 %v781_v15, 16  ;;  %v820_v23 = vshll.u32 %v777_v8, 16  ;;  %1086 = vrot.lane.b32.xlu1 %v831_v21, %s5547_s24  ;;  %1080 = vrot.lane.b32.xlu0 %v814_v22, %s5547_s24 }
  0x1f   : > { %299 = vst.msk [vmem:[#allocation2 + $0xcc] sm:$0xf] %vm246_vm0, %v5546_v0  ;;  %300 = vst.msk [vmem:[#allocation2 + $0xd0] sm:$0xf] %vm246_vm0, %v5546_v0  ;;  %v782_v20 = vld [vmem:[%s5649_s23 + $0x18] sm:$0xf]  ;;  %v839_v36 = vor.u32 %v837_v18, %v836_v16 }
  0x20   : > { %256 = vst.msk [vmem:[#allocation2 + $0x20] sm:$0x1] %vm249_vm1, %v5546_v0  ;;  %250 = vst.msk [vmem:[#allocation2 + $0x8] sm:$0x1] %vm249_vm1, %v5546_v0  ;;  %v783_v24 = vld [vmem:[%s5649_s23 + $0x1c] sm:$0xf]  ;;  %v822_v49 = vor.u32 %v820_v23, %v819_v17 }
  0x21   : > { %253 = vst.msk [vmem:[#allocation2 + $0x14] sm:$0x1] %vm249_vm1, %v5546_v0  ;;  %259 = vst.msk [vmem:[#allocation2 + $0x2c] sm:$0x1] %vm249_vm1, %v5546_v0  ;;  %v841_v25 = vrot.slane %v836_v16, 4  ;;  %v824_v26 = vrot.slane %v819_v17, 4 }
  0x22   : > { %262 = vst.msk [vmem:[#allocation2 + $0x38] sm:$0x1] %vm249_vm1, %v5546_v0  ;;  %265 = vst.msk [vmem:[#allocation2 + $0x44] sm:$0x1] %vm249_vm1, %v5546_v0  ;;  %v846_v27 = vshll.u32 %v780_v11, 16  ;;  %v854_v28 = vshll.u32 %v781_v15, 16 }
  0x23   : > { %268 = vst.msk [vmem:[#allocation2 + $0x50] sm:$0x1] %vm249_vm1, %v5546_v0  ;;  %271 = vst.msk [vmem:[#allocation2 + $0x5c] sm:$0x1] %vm249_vm1, %v5546_v0  ;;  %v784_v29 = vld [vmem:[%s5649_s23 + $0x20] sm:$0xf]  ;;  %1090 = vrot.lane.b32.xlu1 %v841_v25, %s5547_s24  ;;  %1084 = vrot.lane.b32.xlu0 %v824_v26, %s5547_s24 }
  0x24   : > { %274 = vst.msk [vmem:[#allocation2 + $0x68] sm:$0x1] %vm249_vm1, %v5546_v0  ;;  %277 = vst.msk [vmem:[#allocation2 + $0x74] sm:$0x1] %vm249_vm1, %v5546_v0  ;;  %v845_v30 = vrot.slane %v843_v14, 7  ;;  %v5662_v31 = vrot.slane %v851_v19, 7 }
  0x25   : > { %280 = vst.msk [vmem:[#allocation2 + $0x80] sm:$0x1] %vm249_vm1, %v5546_v0  ;;  %283 = vst.msk [vmem:[#allocation2 + $0x8c] sm:$0x1] %vm249_vm1, %v5546_v0  ;;  %v860_v32 = vshrl.u32 %v782_v20, 16  ;;  %v868_v33 = vshrl.u32 %v783_v24, 16 }
  0x26   : > { %286 = vst.msk [vmem:[#allocation2 + $0x98] sm:$0x1] %vm249_vm1, %v5546_v0  ;;  %289 = vst.msk [vmem:[#allocation2 + $0xa4] sm:$0x1] %vm249_vm1, %v5546_v0  ;;  %v785_v34 = vld [vmem:[%s5649_s23 + $0x24] sm:$0xf]  ;;  %v848_v46 = vor.u32 %v846_v27, %v845_v30  ;;  %v856_v48 = vor.u32 %v854_v28, %v5662_v31 }
  0x27   : > { %292 = vst.msk [vmem:[#allocation2 + $0xb0] sm:$0x1] %vm249_vm1, %v5546_v0  ;;  %295 = vst.msk [vmem:[#allocation2 + $0xbc] sm:$0x1] %vm249_vm1, %v5546_v0  ;;  %v832_v35 = vrot.slane %v828_v12, 4  ;;  %v815_v37 = vrot.slane %v811_v13, 4 }
  0x28   : > { %298 = vst.msk [vmem:[#allocation2 + $0xc8] sm:$0x1] %vm249_vm1, %v5546_v0  ;;  %301 = vst.msk [vmem:[#allocation2 + $0xd4] sm:$0x1] %vm249_vm1, %v5546_v0  ;;  %v862_v39 = vrot.slane %v860_v32, 7  ;;  %v5671_v40 = vrot.slane %v868_v33, 7  ;;  %1092 = vrot.lane.b32.xlu0 %v848_v46, %s5547_s24 }
  0x29   : > { %vm5667_vm4 = vmor %vm334_vm2, %vm335_vm3  ;;  %v871_v41 = vshll.u32 %v783_v24, 16  ;;  %v877_v42 = vshrl.u32 %v784_v29, 16  ;;  %v885_v43 = vshrl.u32 %v785_v34, 16  ;;  %v5674_v44 = vld [vmem:[%s5649_s23 + $0x28] sm:$0xf]  ;;  %v849_v47 = vrot.slane %v845_v30, 4 }
  0x2a   : > { %v787_v45 = vld [vmem:[%s5649_s23 + $0x2c] sm:$0xf]  ;;  %v840_v50 = vsel %vm5667_vm4, %v832_v35, %v839_v36  ;;  %v866_v51 = vrot.slane %v862_v39, 4  ;;  %v863_v52 = vshll.u32 %v782_v20, 16  ;;  %v5683_v53 = vld [vmem:[%s5649_s23 + $0x30] sm:$0xf]  ;;  %v823_v63 = vsel %vm5667_vm4, %v815_v37, %v822_v49  ;;  %vm5894_vm8 = vmand %vm658_vm5, %vm659_vm6 }
  0x2b   : > { %v873_v54 = vor.u32 %v871_v41, %v5671_v40  ;;  %v879_v55 = vrot.slane %v877_v42, 7  ;;  %v894_v56 = vshrl.u32 %v5674_v44, 16  ;;  %v902_v57 = vshrl.u32 %v787_v45, 16  ;;  %v789_v58 = vld [vmem:[%s5649_s23 + $0x34] sm:$0xf]  ;;  %1088 = vrot.lane.b32.xlu1 %v840_v50, %s5547_s24 }
  0x2c   : > { %v5688_v59 = vrot.slane %v885_v43, 7  ;;  %v888_v60 = vshll.u32 %v785_v34, 16  ;;  %v880_v61 = vshll.u32 %v784_v29, 16  ;;  %v857_v62 = vsel %vm5667_vm4, %v849_v47, %v856_v48  ;;  %v790_v2 = vld [vmem:[%s5649_s23 + $0x38] sm:$0xf]  ;;  %1082 = vrot.lane.b32.xlu0 %v823_v63, %s5547_s24 }
  0x2d   : > { %v858_v0 = vrot.slane %v5662_v31, 4  ;;  %v905_v1 = vshll.u32 %v787_v45, 16  ;;  %v896_v3 = vrot.slane %v894_v56, 7  ;;  %v5698_v4 = vrot.slane %v902_v57, 7  ;;  %v791_v7 = vld [vmem:[%s5649_s23 + $0x3c] sm:$0xf] }
  0x2e   : > { %v911_v5 = vshrl.u32 %v5683_v53, 16  ;;  %v919_v6 = vshrl.u32 %v789_v58, 16  ;;  %v874_v8 = vsel %vm5667_vm4, %v866_v51, %v873_v54  ;;  %v865_v9 = vor.u32 %v863_v52, %v862_v39  ;;  %v5710_v16 = vld [vmem:[%s5649_s23 + $0x40] sm:$0xf]  ;;  %v793_v17 = vld [vmem:[%s5649_s23 + $0x44] sm:$0xf] }
  0x2f   : > { %v875_v10 = vrot.slane %v5671_v40, 4  ;;  %v883_v11 = vrot.slane %v879_v55, 4  ;;  %v890_v12 = vor.u32 %v888_v60, %v5688_v59  ;;  %v5706_v13 = vor.u32 %v880_v61, %v879_v55  ;;  %1094 = vrot.lane.b32.xlu1 %v857_v62, %s5547_s24  ;;  %v5723_v30 = vld [vmem:[%s5649_s23 + $0x48] sm:$0xf]  ;;  %v795_v35 = vld [vmem:[%s5649_s23 + $0x4c] sm:$0xf] }
  0x30   : > { %v897_v14 = vshll.u32 %v5674_v44, 16  ;;  %v928_v15 = vshrl.u32 %v790_v2, 16  ;;  %v913_v18 = vrot.slane %v911_v5, 7  ;;  %v5715_v19 = vrot.slane %v919_v6, 7  ;;  %1098 = vrot.lane.b32.xlu0 %v865_v9, %s5547_s24  ;;  %v5735_v41 = vld [vmem:[%s5649_s23 + $0x50] sm:$0xf] }
  0x31   : > { %v922_v20 = vshll.u32 %v789_v58, 16  ;;  %v936_v21 = vshrl.u32 %v791_v7, 16  ;;  %v900_v22 = vrot.slane %v896_v3, 4  ;;  %v907_v23 = vor.u32 %v905_v1, %v5698_v4  ;;  %v797_v46 = vld [vmem:[%s5649_s23 + $0x54] sm:$0xf] }
  0x32   : > { %v930_v24 = vrot.slane %v928_v15, 7  ;;  %v939_v25 = vshll.u32 %v791_v7, 16  ;;  %v914_v26 = vshll.u32 %v5683_v53, 16  ;;  %v945_v28 = vshrl.u32 %v5710_v16, 16  ;;  %v5746_v51 = vld [vmem:[%s5649_s23 + $0x58] sm:$0xf] }
  0x33   : > { %v5719_v27 = vrot.slane %v936_v21, 7  ;;  %v953_v29 = vshrl.u32 %v793_v17, 16  ;;  %v891_v31 = vsel %vm5667_vm4, %v883_v11, %v890_v12  ;;  %v892_v32 = vrot.slane %v5688_v59, 4  ;;  %1100 = vrot.lane.b32.xlu1 %v874_v8, %s5547_s24  ;;  %v799_v56 = vld [vmem:[%s5649_s23 + $0x5c] sm:$0xf] }
  0x34   : > { %v931_v33 = vshll.u32 %v790_v2, 16  ;;  %v956_v34 = vshll.u32 %v793_v17, 16  ;;  %v917_v36 = vrot.slane %v913_v18, 4  ;;  %v924_v37 = vor.u32 %v922_v20, %v5715_v19  ;;  %1096 = vrot.lane.b32.xlu0 %v858_v0, %s5547_s24  ;;  %v5762_v62 = vld [vmem:[%s5649_s23 + $0x60] sm:$0xf] }
  0x35   : > { %v947_v39 = vrot.slane %v945_v28, 7  ;;  %v5732_v40 = vrot.slane %v953_v29, 7  ;;  %v899_v42 = vor.u32 %v897_v14, %v896_v3  ;;  %v909_v43 = vrot.slane %v5698_v4, 4  ;;  %v801_v3 = vld [vmem:[%s5649_s23 + $0x64] sm:$0xf] }
  0x36   : > { %v934_v44 = vrot.slane %v930_v24, 4  ;;  %v941_v45 = vor.u32 %v939_v25, %v5719_v27  ;;  %v908_v47 = vsel %vm5667_vm4, %v900_v22, %v907_v23  ;;  %v5742_v48 = vor.u32 %v914_v26, %v913_v18  ;;  %v802_v9 = vld [vmem:[%s5649_s23 + $0x68] sm:$0xf]  ;;  %v803_v20 = vld [vmem:[%s5649_s23 + $0x6c] sm:$0xf] }
  0x37   : > { %v962_v49 = vshrl.u32 %v5723_v30, 16  ;;  %v970_v50 = vshrl.u32 %v795_v35, 16  ;;  %v951_v52 = vrot.slane %v947_v39, 4  ;;  %v958_v53 = vor.u32 %v956_v34, %v5732_v40  ;;  %1102 = vrot.lane.b32.xlu1 %v875_v10, %s5547_s24  ;;  %v804_v25 = vld [vmem:[%s5649_s23 + $0x70] sm:$0xf] }
  0x38   : > { %v948_v54 = vshll.u32 %v5710_v16, 16  ;;  %v979_v55 = vshrl.u32 %v5735_v41, 16  ;;  %v5756_v57 = vsel %vm5667_vm4, %v917_v36, %v924_v37  ;;  %v5758_v58 = vor.u32 %v931_v33, %v930_v24  ;;  %1104 = vrot.lane.b32.xlu0 %v5706_v13, %s5547_s24 }
  0x39   : > { %v926_v60 = vrot.slane %v5715_v19, 4  ;;  %v987_v61 = vshrl.u32 %v797_v46, 16  ;;  %v5766_v63 = vsel %vm5667_vm4, %v934_v44, %v941_v45  ;;  %v943_v1 = vrot.slane %v5719_v27, 4  ;;  %v1378_v27 = vld [vmem:[%s7398_s2 + $0xc] sm:$0xf] }
  0x3a   : > { %v973_v2 = vshll.u32 %v795_v35, 16  ;;  %v965_v0 = vshll.u32 %v5723_v30, 16  ;;  %v964_v5 = vrot.slane %v962_v49, 7  ;;  %v5771_v6 = vrot.slane %v970_v50, 7  ;;  %v5805_v50 = vld [vmem:[%s5649_s23 + $0x74] sm:$0xf] }
  0x3b   : > { %v996_v7 = vshrl.u32 %v5746_v51, 16  ;;  %v1004_v8 = vshrl.u32 %v799_v56, 16  ;;  %v5777_v10 = vsel %vm5667_vm4, %v951_v52, %v958_v53  ;;  %v5779_v11 = vor.u32 %v948_v54, %v947_v39  ;;  %1106 = vrot.lane.b32.xlu1 %v891_v31, %s5547_s24 }
  0x3c   : > { %v981_v12 = vrot.slane %v979_v55, 7  ;;  %v990_v14 = vshll.u32 %v797_v46, 16  ;;  %v5784_v15 = vrot.slane %v987_v61, 7  ;;  %v982_v16 = vshll.u32 %v5735_v41, 16  ;;  %1110 = vrot.lane.b32.xlu0 %v899_v42, %s5547_s24  ;;  %v806_v41 = vld [vmem:[%s5649_s23 + $0x78] sm:$0xf] }
  0x3d   : > { %v1007_v17 = vshll.u32 %v799_v56, 16  ;;  %v1013_v18 = vshrl.u32 %v5762_v62, 16  ;;  %v998_v21 = vrot.slane %v996_v7, 7  ;;  %v5789_v22 = vrot.slane %v1004_v8, 7 }
  0x3e   : > { %v1021_v23 = vshrl.u32 %v801_v3, 16  ;;  %v1030_v24 = vshrl.u32 %v802_v9, 16  ;;  %v968_v26 = vrot.slane %v964_v5, 4  ;;  %v975_v28 = vor.u32 %v973_v2, %v5771_v6 }
  0x3f   : > { %v5793_v29 = vor.u32 %v965_v0, %v964_v5  ;;  %v1024_v13 = vshll.u32 %v801_v3, 16  ;;  %v985_v30 = vrot.slane %v981_v12, 4  ;;  %v1015_v31 = vrot.slane %v1013_v18, 7  ;;  %1112 = vrot.lane.b32.xlu1 %v908_v47, %s5547_s24 }
  0x40   : > { %v5795_v33 = vrot.slane %v1021_v23, 7  ;;  %v1038_v34 = vshrl.u32 %v803_v20, 16  ;;  %v999_v35 = vshll.u32 %v5746_v51, 16  ;;  %v1032_v36 = vrot.slane %v1030_v24, 7  ;;  %1108 = vrot.lane.b32.xlu0 %v892_v32, %s5547_s24  ;;  %v5845_v32 = vld [vmem:[%s5649_s23 + $0x7c] sm:$0xf] }
  0x41   : > { %v1041_v37 = vshll.u32 %v803_v20, 16  ;;  %v1047_v39 = vshrl.u32 %v804_v25, 16  ;;  %v992_v44 = vor.u32 %v990_v14, %v5784_v15  ;;  %v1002_v45 = vrot.slane %v998_v21, 4  ;;  %v302_v14 = vld [vmem:[%s5814_s27] sm:$0xf] }
  0x42   : > { %v1009_v46 = vor.u32 %v1007_v17, %v5789_v22  ;;  %v1016_v49 = vshll.u32 %v5762_v62, 16  ;;  %v1019_v47 = vrot.slane %v1015_v31, 4  ;;  %v1026_v42 = vor.u32 %v1024_v13, %v5795_v33 }
  0x43   : > { %v5808_v51 = vrot.slane %v1038_v34, 7  ;;  %v1033_v52 = vshll.u32 %v802_v9, 16  ;;  %vm666_vm7 = vcmask 24576   ;;  %v5818_v53 = vsel %vm5667_vm4, %v968_v26, %v975_v28  ;;  %1114 = vrot.lane.b32.xlu1 %v909_v43, %s5547_s24  ;;  %v5877_v28 = vld [vmem:[%s5814_s27 + $0x4] sm:$0xf] }
  0x44   : > { %v5820_v54 = vrot.slane %v1047_v39, 7  ;;  %v1050_v55 = vshll.u32 %v804_v25, 16  ;;  %v1064_v56 = vshrl.u32 %v806_v41, 16  ;;  %v5828_v61 = vor.u32 %v982_v16, %v981_v12  ;;  %v304_v12 = vld [vmem:[%s5814_s27 + $0x8] sm:$0xf]  ;;  %1116 = vrot.lane.b32.xlu0 %v5742_v48, %s5547_s24  ;;  %vm5902_vm9 = vmand %vm666_vm7, %vm334_vm2 }
  0x45   : > { %v1036_v62 = vrot.slane %v1032_v36, 4  ;;  %v1043_v2 = vor.u32 %v1041_v37, %v5808_v51  ;;  %v1055_v0 = vshrl.u32 %v5805_v50, 16  ;;  %v5834_v3 = vsel %vm5667_vm4, %v985_v30, %v992_v44  ;;  %v306_v34 = vld [vmem:[%s5814_s27 + $0x10] sm:$0xf]  ;;  %v307_v39 = vld [vmem:[%s5814_s27 + $0x14] sm:$0xf] }
  0x46   : > { %v5838_v4 = vsel %vm5667_vm4, %v1002_v45, %v1009_v46  ;;  %v5840_v43 = vor.u32 %v999_v35, %v998_v21  ;;  %v5842_v59 = vor.u32 %v1016_v49, %v1015_v31  ;;  %v5849_v5 = vsel %vm5667_vm4, %v1019_v47, %v1026_v42  ;;  %v305_v21 = vld [vmem:[%s5814_s27 + $0xc] sm:$0xf]  ;;  %v671_v44 = vld [vmem:[#allocation2 + $0x18] sm:$0xf] }
  0x47   : > { %v5851_v7 = vor.u32 %v1033_v52, %v1032_v36  ;;  %v5853_v8 = vrot.slane %v1064_v56, 7  ;;  %v1067_v9 = vshll.u32 %v806_v41, 16  ;;  %v5858_v16 = vor.u32 %v1050_v55, %v5820_v54  ;;  %1118 = vrot.lane.b32.xlu1 %v5756_v57, %s5547_s24  ;;  %v661_v42 = vld [vmem:[#allocation2 + $0xc] sm:$0xf]  ;;  %v308_v41 = vld [vmem:[%s5814_s27 + $0x18] sm:$0xf] }
  0x48   : > { %v1053_v18 = vrot.slane %v5820_v54, 4  ;;  %v1058_v20 = vshll.u32 %v5805_v50, 16  ;;  %v5870_v23 = vsel %vm5667_vm4, %v1036_v62, %v1043_v2  ;;  %v5872_v24 = vrot.slane %v1055_v0, 7  ;;  %1122 = vrot.lane.b32.xlu0 %v5758_v58, %s5547_s24  ;;  %v675_v58 = vld [vmem:[#allocation2 + $0x20] sm:$0x1] }
  0x49   : > { %v1072_v26 = vshrl.u32 %v5845_v32, 16  ;;  %v1075_v13 = vshll.u32 %v5845_v32, 16  ;;  %v355_v30 = vshrl.u32 %v304_v12, 16  ;;  %v358_v31 = vshll.u32 %v304_v12, 16 }
  0x4a   : > { %v5883_v48 = vor.u32 %v1067_v9, %v5853_v8  ;;  %v338_v35 = vshrl.u32 %v302_v14, 16  ;;  %v341_v36 = vshll.u32 %v302_v14, 16  ;;  %v363_v37 = vshrl.u32 %v305_v21, 16 }
  0x4b   : > { %v357_v45 = vrot.slane %v355_v30, 7  ;;  %v346_v46 = vshrl.u32 %v5877_v28, 16  ;;  %v366_v49 = vshll.u32 %v305_v21, 16  ;;  %1124 = vrot.lane.b32.xlu1 %v5766_v63, %s5547_s24  ;;  %v372_v56 = vshrl.u32 %v306_v34, 16  ;;  %v668_v30 = vld [vmem:[#allocation2 + $0x14] sm:$0x1] }
  0x4c   : > { %v5898_v52 = vrot.slane %v338_v35, 7  ;;  %v365_v55 = vrot.slane %v363_v37, 7  ;;  %v375_v62 = vshll.u32 %v306_v34, 16  ;;  %v380_v12 = vshrl.u32 %v307_v39, 16  ;;  %v678_v37 = vld [vmem:[#allocation2 + $0x24] sm:$0xf]  ;;  %1120 = vrot.lane.b32.xlu0 %v926_v60, %s5547_s24 }
  0x4d   : > { %v360_v2 = vor.u32 %v358_v31, %v357_v45  ;;  %v348_v0 = vrot.slane %v346_v46, 7  ;;  %v361_v9 = vrot.slane %v357_v45, 4  ;;  %v374_v34 = vrot.slane %v372_v56, 7  ;;  %v309_v46 = vld [vmem:[%s5814_s27 + $0x1c] sm:$0xf] }
  0x4e   : > { %v343_v14 = vor.u32 %v341_v36, %v5898_v52  ;;  %v370_v21 = vrot.slane %v365_v55, 4  ;;  %v368_v35 = vor.u32 %v366_v49, %v365_v55  ;;  %v382_v25 = vrot.slane %v380_v12, 7  ;;  %v310_v55 = vld [vmem:[%s5814_s27 + $0x20] sm:$0xf]  ;;  %v2832_v12 = vld [vmem:[%s7398_s2 + $0x10] sm:$0xf] }
  0x4f   : > { %v672_v31 = vsel %vm5894_vm8, %v360_v2, %v671_v44  ;;  %v353_v57 = vrot.slane %v348_v0, 4  ;;  %v383_v17 = vshll.u32 %v307_v39, 16  ;;  %1126 = vrot.lane.b32.xlu1 %v943_v1, %s5547_s24  ;;  %v378_v45 = vrot.slane %v374_v34, 4 }
  0x50   : > { %673 = vst [vmem:[#allocation2 + $0x18] sm:$0xf] %v672_v31  ;;  %v662_v36 = vsel %vm5894_vm8, %v343_v14, %v661_v42  ;;  %v676_v44 = vsel %vm5902_vm9, %v370_v21, %v675_v58  ;;  %v369_v39 = vsel %vm5667_vm4, %v361_v9, %v368_v35  ;;  %v377_v60 = vor.u32 %v375_v62, %v374_v34  ;;  %v682_v42 = vld [vmem:[#allocation2 + $0x2c] sm:$0x1]  ;;  %v685_v14 = vld [vmem:[#allocation2 + $0x30] sm:$0xf] }
  0x51   : > { %663 = vst [vmem:[#allocation2 + $0xc] sm:$0xf] %v662_v36  ;;  %677 = vst [vmem:[#allocation2 + $0x20] sm:$0x1] %v676_v44  ;;  %v669_v19 = vsel %vm5902_vm9, %v353_v57, %v668_v30  ;;  %v385_v1 = vor.u32 %v383_v17, %v382_v25  ;;  %v387_v49 = vrot.slane %v382_v25, 4  ;;  %v344_v56 = vrot.slane %v5898_v52, 4  ;;  %1128 = vrot.lane.b32.xlu0 %v5779_v11, %s5547_s24 }
  0x52   : > { %674 = vst.msk [vmem:[#allocation2 + $0x1c] sm:$0xf] %vm658_vm5, %v369_v39  ;;  %670 = vst [vmem:[#allocation2 + $0x14] sm:$0x1] %v669_v19  ;;  %v349_v2 = vshll.u32 %v5877_v28, 16  ;;  %v389_v58 = vshrl.u32 %v308_v41, 16  ;;  %v679_v57 = vsel %vm5894_vm8, %v377_v60, %v678_v37 }
  0x53   : > { %v392_v9 = vshll.u32 %v308_v41, 16  ;;  %v386_v17 = vsel %vm5667_vm4, %v378_v45, %v385_v1  ;;  %v397_v25 = vshrl.u32 %v309_v46, 16  ;;  %v400_v62 = vshll.u32 %v309_v46, 16  ;;  %1130 = vrot.lane.b32.xlu1 %v5777_v10, %s5547_s24  ;;  %680 = vst [vmem:[#allocation2 + $0x24] sm:$0xf] %v679_v57 }
  0x54   : > { %681 = vst.msk [vmem:[#allocation2 + $0x28] sm:$0xf] %vm658_vm5, %v386_v17  ;;  %v351_v28 = vor.u32 %v349_v2, %v348_v0  ;;  %v391_v41 = vrot.slane %v389_v58, 7  ;;  %vm1508_vm10 = vcmask 1043456   ;;  %v683_v52 = vsel %vm5902_vm9, %v387_v49, %v682_v42  ;;  %v311_v21 = vld [vmem:[%s5814_s27 + $0x24] sm:$0xf] }
  0x55   : > { %v5950_v30 = vld [vmem:[%s7398_s2] sm:$0xf]  ;;  %v5954_v10 = vrot.slane %v1072_v26, 7  ;;  %v399_v11 = vrot.slane %v397_v25, 7  ;;  %5490 = vmatprep.subr.msk.bf16.mxu1 %vm1508_vm10, %v1378_v27  ;;  %684 = vst [vmem:[#allocation2 + $0x2c] sm:$0x1] %v683_v52  ;;  %5494 = vmatprep.subr.msk.bf16.mxu0 %vm1508_vm10, %v2832_v12 }
  0x56   : > { %v1510_v0 = vsel %vm1508_vm10, %v1378_v27, 0  ;;  %v406_v35 = vshrl.u32 %v310_v55, 16  ;;  %v312_v37 = vld [vmem:[%s5814_s27 + $0x28] sm:$0xf]  ;;  %v352_v34 = vsel %vm5667_vm4, %v344_v56, %v351_v28  ;;  %v394_v31 = vor.u32 %v392_v9, %v391_v41  ;;  %v689_v44 = vld [vmem:[#allocation2 + $0x38] sm:$0x1]  ;;  %1134 = vrot.lane.b32.xlu0 %v5793_v29, %s5547_s24 }
  0x57   : > { %v395_v36 = vrot.slane %v391_v41, 4  ;;  %4927 = vmatpush3.bf16.msra.mxu1 %v1510_v0  ;;  %v409_v26 = vshll.u32 %v310_v55, 16  ;;  %665 = vst.msk [vmem:[#allocation2 + $0x10] sm:$0xf] %vm658_vm5, %v352_v34  ;;  %v402_v39 = vor.u32 %v400_v62, %v399_v11  ;;  %v404_v45 = vrot.slane %v399_v11, 4  ;;  %1136 = vrot.lane.b32.xlu1 %v5818_v53, %s5547_s24 }
  0x58   : > { %v408_v46 = vrot.slane %v406_v35, 7  ;;  %v414_v19 = vshrl.u32 %v311_v21, 16  ;;  %v313_v60 = vld [vmem:[%s5814_s27 + $0x2c] sm:$0xf]  ;;  %5491 = vmatprep.subr.msk.bf16.mxu1 %vm1508_vm10, %v5950_v30  ;;  %v994_v27 = vrot.slane %v5784_v15, 4  ;;  %v686_v1 = vsel %vm5894_vm8, %v394_v31, %v685_v14 }
  0x59   : > { %v417_v49 = vshll.u32 %v311_v21, 16  ;;  %v692_v42 = vld [vmem:[#allocation2 + $0x3c] sm:$0xf]  ;;  %v423_v55 = vshrl.u32 %v312_v37, 16  ;;  %v403_v56 = vsel %vm5667_vm4, %v395_v36, %v402_v39  ;;  %687 = vst [vmem:[#allocation2 + $0x30] sm:$0xf] %v686_v1  ;;  %v690_v2 = vsel %vm5902_vm9, %v404_v45, %v689_v44 }
  0x5a   : > { %v411_v53 = vor.u32 %v409_v26, %v408_v46  ;;  %v412_v58 = vrot.slane %v408_v46, 4  ;;  %v699_v9 = vld [vmem:[#allocation2 + $0x48] sm:$0xf]  ;;  %688 = vst.msk [vmem:[#allocation2 + $0x34] sm:$0xf] %vm658_vm5, %v403_v56  ;;  %v416_v29 = vrot.slane %v414_v19, 7  ;;  %v5981_v14 = vor.u32 %v1058_v20, %v5872_v24  ;;  %1140 = vrot.lane.b32.xlu0 %v5828_v61, %s5547_s24 }
  0x5b   : > { %691 = vst [vmem:[#allocation2 + $0x38] sm:$0x1] %v690_v2  ;;  %v425_v57 = vrot.slane %v423_v55, 7  ;;  %v426_v17 = vshll.u32 %v312_v37, 16  ;;  %v431_v25 = vshrl.u32 %v313_v60, 16  ;;  %v434_v41 = vshll.u32 %v313_v60, 16  ;;  %1142 = vrot.lane.b32.xlu1 %v5834_v3, %s5547_s24 }
  0x5c   : > { %v696_v62 = vld [vmem:[#allocation2 + $0x44] sm:$0x1]  ;;  %v693_v28 = vsel %vm5894_vm8, %v411_v53, %v692_v42  ;;  %v5986_v52 = vsel %vm1508_vm10, %v2832_v12, 0  ;;  %v314_v21 = vld [vmem:[%s5814_s27 + $0x30] sm:$0xf]  ;;  %v1045_v50 = vrot.slane %v5808_v51, 4  ;;  %v419_v20 = vor.u32 %v417_v49, %v416_v29 }
  0x5d   : > { %7446 = vst [vmem:[#allocation3_spill] sm:$0xff] %v5986_v52  ;;  %v5992_v11 = vld [vmem:[%s7398_s2 + $0x1c] sm:$0xf]  ;;  %v421_v0 = vrot.slane %v416_v29, 4  ;;  %694 = vst [vmem:[#allocation2 + $0x3c] sm:$0xf] %v693_v28  ;;  %v428_v12 = vor.u32 %v426_v17, %v425_v57  ;;  %5063 = vmatpush3.bf16.msra.mxu0 %v5986_v52  ;;  %v6021_v42 = vor.u32 %v1075_v13, %v5954_v10 }
  0x5e   : > { %v315_v35 = vld [vmem:[%s5814_s27 + $0x34] sm:$0xf]  ;;  %v1028_v37 = vrot.slane %v5795_v33, 4  ;;  %v1062_v34 = vrot.slane %v5872_v24, 4  ;;  %v429_v31 = vrot.slane %v425_v57, 4  ;;  %v433_v36 = vrot.slane %v431_v25, 7  ;;  %5496 = vmatprep.subr.msk.bf16.mxu0 %vm1508_vm10, %v5992_v11  ;;  %1146 = vrot.lane.b32.xlu0 %v5840_v43, %s5547_s24 }
  0x5f   : > { %v420_v61 = vsel %vm5667_vm4, %v412_v58, %v419_v20  ;;  %v700_v3 = vsel %vm5894_vm8, %v428_v12, %v699_v9  ;;  %v703_v44 = vld [vmem:[#allocation2 + $0x50] sm:$0x1]  ;;  %v697_v26 = vsel %vm5902_vm9, %v421_v0, %v696_v62  ;;  %v440_v39 = vshrl.u32 %v314_v21, 16  ;;  %v316_v45 = vld [vmem:[%s5814_s27 + $0x38] sm:$0xf]  ;;  %1148 = vrot.lane.b32.xlu1 %v5838_v4, %s5547_s24 }
  0x60   : > { %695 = vst.msk [vmem:[#allocation2 + $0x40] sm:$0xf] %vm658_vm5, %v420_v61  ;;  %v436_v46 = vor.u32 %v434_v41, %v433_v36  ;;  %v438_v19 = vrot.slane %v433_v36, 4  ;;  %701 = vst [vmem:[#allocation2 + $0x48] sm:$0xf] %v700_v3  ;;  %v443_v60 = vshll.u32 %v314_v21, 16 }
  0x61   : > { %698 = vst [vmem:[#allocation2 + $0x44] sm:$0x1] %v697_v26  ;;  %v448_v1 = vshrl.u32 %v315_v35, 16  ;;  %v317_v49 = vld [vmem:[%s5814_s27 + $0x3c] sm:$0xf]  ;;  %v1079_v55 = vrot.slane %v5954_v10, 4 }
  0x62   : > { %v442_v56 = vrot.slane %v440_v39, 7  ;;  %v451_v2 = vshll.u32 %v315_v35, 16  ;;  %v437_v53 = vsel %vm5667_vm4, %v429_v31, %v436_v46  ;;  %v704_v58 = vsel %vm5902_vm9, %v438_v19, %v703_v44  ;;  %v706_v4 = vld [vmem:[#allocation2 + $0x54] sm:$0xf]  ;;  %v318_v43 = vld [vmem:[%s5814_s27 + $0x40] sm:$0xf]  ;;  %1152 = vrot.lane.b32.xlu0 %v5842_v59, %s5547_s24 }
  0x63   : > { %v450_v9 = vrot.slane %v448_v1, 7  ;;  %v457_v29 = vshrl.u32 %v316_v45, 16  ;;  %702 = vst.msk [vmem:[#allocation2 + $0x4c] sm:$0xf] %vm658_vm5, %v437_v53  ;;  %705 = vst [vmem:[#allocation2 + $0x50] sm:$0x1] %v704_v58  ;;  %1154 = vrot.lane.b32.xlu1 %v5849_v5, %s5547_s24  ;;  %v1061_v59 = vsel %vm5667_vm4, %v1053_v18, %v5981_v14 }
  0x64   : > { %v445_v32 = vor.u32 %v443_v60, %v442_v56  ;;  %v446_v13 = vrot.slane %v442_v56, 4  ;;  %v460_v57 = vshll.u32 %v316_v45, 16  ;;  %v465_v17 = vshrl.u32 %v317_v49, 16  ;;  %v713_v25 = vld [vmem:[#allocation2 + $0x60] sm:$0xf] }
  0x65   : > { %v710_v62 = vld [vmem:[#allocation2 + $0x5c] sm:$0x1]  ;;  %v453_v28 = vor.u32 %v451_v2, %v450_v9  ;;  %v455_v41 = vrot.slane %v450_v9, 4  ;;  %v459_v21 = vrot.slane %v457_v29, 7  ;;  %v468_v20 = vshll.u32 %v317_v49, 16 }
  0x66   : > { %v319_v0 = vld [vmem:[%s5814_s27 + $0x44] sm:$0xf]  ;;  %v707_v12 = vsel %vm5894_vm8, %v445_v32, %v706_v4  ;;  %v467_v35 = vrot.slane %v465_v17, 7  ;;  %v474_v31 = vshrl.u32 %v318_v43, 16  ;;  %v477_v36 = vshll.u32 %v318_v43, 16  ;;  %1158 = vrot.lane.b32.xlu0 %v5851_v7, %s5547_s24 }
  0x67   : > { %v320_v61 = vld [vmem:[%s5814_s27 + $0x48] sm:$0xf]  ;;  %v454_v3 = vsel %vm5667_vm4, %v446_v13, %v453_v28  ;;  %708 = vst [vmem:[#allocation2 + $0x54] sm:$0xf] %v707_v12  ;;  %v462_v44 = vor.u32 %v460_v57, %v459_v21  ;;  %v463_v26 = vrot.slane %v459_v21, 4  ;;  %v711_v5 = vsel %vm5902_vm9, %v455_v41, %v710_v62  ;;  %1160 = vrot.lane.b32.xlu1 %v5870_v23, %s5547_s24 }
  0x68   : > { %v717_v39 = vld [vmem:[#allocation2 + $0x68] sm:$0x1]  ;;  %709 = vst.msk [vmem:[#allocation2 + $0x58] sm:$0xf] %vm658_vm5, %v454_v3  ;;  %v470_v45 = vor.u32 %v468_v20, %v467_v35  ;;  %v472_v46 = vrot.slane %v467_v35, 4  ;;  %v476_v19 = vrot.slane %v474_v31, 7 }
  0x69   : > { %712 = vst [vmem:[#allocation2 + $0x5c] sm:$0x1] %v711_v5  ;;  %v720_v60 = vld [vmem:[#allocation2 + $0x6c] sm:$0xf]  ;;  %v714_v49 = vsel %vm5894_vm8, %v462_v44, %v713_v25  ;;  %v482_v56 = vshrl.u32 %v319_v0, 16  ;;  %v485_v2 = vshll.u32 %v319_v0, 16 }
  0x6a   : > { %v321_v1 = vld [vmem:[%s5814_s27 + $0x4c] sm:$0xf]  ;;  %v491_v53 = vshrl.u32 %v320_v61, 16  ;;  %v322_v58 = vld [vmem:[%s5814_s27 + $0x50] sm:$0xf]  ;;  %v471_v54 = vsel %vm5667_vm4, %v463_v26, %v470_v45  ;;  %v718_v18 = vsel %vm5902_vm9, %v472_v46, %v717_v39  ;;  %v479_v14 = vor.u32 %v477_v36, %v476_v19 }
  0x6b   : > { %715 = vst [vmem:[#allocation2 + $0x60] sm:$0xf] %v714_v49  ;;  %v480_v9 = vrot.slane %v476_v19, 4  ;;  %v727_v4 = vld [vmem:[#allocation2 + $0x78] sm:$0xf]  ;;  %v6061_v29 = vrot.slane %v482_v56, 7  ;;  %1164 = vrot.lane.b32.xlu1 %v5858_v16, %s5547_s24 }
  0x6c   : > { %716 = vst.msk [vmem:[#allocation2 + $0x64] sm:$0xf] %vm658_vm5, %v471_v54  ;;  %719 = vst [vmem:[#allocation2 + $0x68] sm:$0x1] %v718_v18  ;;  %v493_v23 = vrot.slane %v491_v53, 7  ;;  %v494_v43 = vshll.u32 %v320_v61, 16  ;;  %v721_v13 = vsel %vm5894_vm8, %v479_v14, %v720_v60 }
  0x6d   : > { %v499_v32 = vshrl.u32 %v321_v1, 16  ;;  %v323_v7 = vld [vmem:[%s5814_s27 + $0x54] sm:$0xf]  ;;  %v502_v57 = vshll.u32 %v321_v1, 16  ;;  %v508_v17 = vshrl.u32 %v322_v58, 16  ;;  %v511_v25 = vshll.u32 %v322_v58, 16 }
  0x6e   : > { %v324_v62 = vld [vmem:[%s5814_s27 + $0x58] sm:$0xf]  ;;  %v7447_v28 = vrot.slane %v5853_v8, 4  ;;  %v487_v21 = vor.u32 %v485_v2, %v6061_v29  ;;  %722 = vst [vmem:[#allocation2 + $0x6c] sm:$0xf] %v721_v13  ;;  %v496_v20 = vor.u32 %v494_v43, %v493_v23  ;;  %v497_v0 = vrot.slane %v493_v23, 4 }
  0x6f   : > { %v7448_v12 = vrot.slane %v5732_v40, 4  ;;  %v6078_v35 = vrot.slane %v499_v32, 7  ;;  %v510_v31 = vrot.slane %v508_v17, 7  ;;  %v516_v8 = vshrl.u32 %v323_v7, 16  ;;  %v325_v61 = vld [vmem:[%s5814_s27 + $0x5c] sm:$0xf]  ;;  %1170 = vrot.lane.b32.xlu1 %v5883_v48, %s5547_s24 }
  0x70   : > { %v1078_v41 = vsel %vm5667_vm4, %v7447_v28, %v6021_v42  ;;  %v519_v36 = vshll.u32 %v323_v7, 16  ;;  %v488_v42 = vsel %vm5667_vm4, %v480_v9, %v487_v21  ;;  %v728_v3 = vsel %vm5894_vm8, %v496_v20, %v727_v4  ;;  %v734_v44 = vld [vmem:[#allocation2 + $0x84] sm:$0xf]  ;;  %v326_v39 = vld [vmem:[%s5814_s27 + $0x60] sm:$0xf] }
  0x71   : > { %1132 = vrot.lane.b32.xlu0 %v7448_v12, %s5547_s24  ;;  %v525_v26 = vshrl.u32 %v324_v62, 16  ;;  %v528_v16 = vshll.u32 %v324_v62, 16  ;;  %v489_v40 = vrot.slane %v6061_v29, 4  ;;  %723 = vst.msk [vmem:[#allocation2 + $0x70] sm:$0xf] %vm658_vm5, %v488_v42  ;;  %v504_v5 = vor.u32 %v502_v57, %v6078_v35 }
  0x72   : > { %729 = vst [vmem:[#allocation2 + $0x78] sm:$0xf] %v728_v3  ;;  %v513_v45 = vor.u32 %v511_v25, %v510_v31  ;;  %v514_v46 = vrot.slane %v510_v31, 4  ;;  %v6089_v19 = vrot.slane %v516_v8, 7  ;;  %v533_v1 = vshrl.u32 %v325_v61, 16 }
  0x73   : > { %v527_v60 = vrot.slane %v525_v26, 7  ;;  %v536_v49 = vshll.u32 %v325_v61, 16  ;;  %v327_v56 = vld [vmem:[%s5814_s27 + $0x64] sm:$0xf]  ;;  %v505_v2 = vsel %vm5667_vm4, %v497_v0, %v504_v5  ;;  %v741_v58 = vld [vmem:[#allocation2 + $0x90] sm:$0xf] }
  0x74   : > { %v735_v53 = vsel %vm5894_vm8, %v513_v45, %v734_v44  ;;  %v542_v54 = vshrl.u32 %v326_v39, 16  ;;  %v545_v18 = vshll.u32 %v326_v39, 16  ;;  %v328_v14 = vld [vmem:[%s5814_s27 + $0x68] sm:$0xf]  ;;  %v506_v9 = vrot.slane %v6078_v35, 4 }
  0x75   : > { %1166 = vrot.lane.b32.xlu0 %v1061_v59, %s5547_s24  ;;  %730 = vst.msk [vmem:[#allocation2 + $0x7c] sm:$0xf] %vm658_vm5, %v505_v2  ;;  %v521_v4 = vor.u32 %v519_v36, %v6089_v19  ;;  %736 = vst [vmem:[#allocation2 + $0x84] sm:$0xf] %v735_v53  ;;  %v530_v48 = vor.u32 %v528_v16, %v527_v60  ;;  %v531_v59 = vrot.slane %v527_v60, 4  ;;  %v6104_v32 = vrot.slane %v533_v1, 7 }
  0x76   : > { %v748_v23 = vld [vmem:[#allocation2 + $0x9c] sm:$0xf]  ;;  %v329_v43 = vld [vmem:[%s5814_s27 + $0x6c] sm:$0xf]  ;;  %v544_v7 = vrot.slane %v542_v54, 7  ;;  %v550_v13 = vshrl.u32 %v327_v56, 16 }
  0x77   : > { %v553_v57 = vshll.u32 %v327_v56, 16  ;;  %v330_v17 = vld [vmem:[%s5814_s27 + $0x70] sm:$0xf]  ;;  %v522_v25 = vsel %vm5667_vm4, %v514_v46, %v521_v4  ;;  %v742_v62 = vsel %vm5894_vm8, %v530_v48, %v741_v58  ;;  %v559_v28 = vshrl.u32 %v328_v14, 16  ;;  %v724_v3 = vld [vmem:[#allocation2 + $0x74] sm:$0x1] }
  0x78   : > { %v562_v21 = vshll.u32 %v328_v14, 16  ;;  %v7449_v20 = vrot.slane %v5771_v6, 4  ;;  %v523_v0 = vrot.slane %v6089_v19, 4  ;;  %737 = vst.msk [vmem:[#allocation2 + $0x88] sm:$0xf] %vm658_vm5, %v522_v25  ;;  %v538_v12 = vor.u32 %v536_v49, %v6104_v32 }
  0x79   : > { %1172 = vrot.lane.b32.xlu0 %v1078_v41, %s5547_s24  ;;  %v540_v31 = vrot.slane %v6104_v32, 4  ;;  %743 = vst [vmem:[#allocation2 + $0x90] sm:$0xf] %v742_v62  ;;  %v547_v8 = vor.u32 %v545_v18, %v544_v7  ;;  %v548_v36 = vrot.slane %v544_v7, 4  ;;  %v6119_v61 = vrot.slane %v550_v13, 7 }
  0x7a   : > { %1138 = vrot.lane.b32.xlu1 %v7449_v20, %s5547_s24  ;;  %v561_v42 = vrot.slane %v559_v28, 7  ;;  %v567_v6 = vshrl.u32 %v329_v43, 16  ;;  %v539_v41 = vsel %vm5667_vm4, %v531_v59, %v538_v12  ;;  %v570_v26 = vshll.u32 %v329_v43, 16  ;;  %v755_v16 = vld [vmem:[#allocation2 + $0xa8] sm:$0xf] }
  0x7b   : > { %v749_v44 = vsel %vm5894_vm8, %v547_v8, %v748_v23  ;;  %v576_v39 = vshrl.u32 %v330_v17, 16  ;;  %v332_v5 = vld [vmem:[%s5814_s27 + $0x78] sm:$0xf]  ;;  %744 = vst.msk [vmem:[#allocation2 + $0x94] sm:$0xf] %vm658_vm5, %v539_v41  ;;  %v555_v45 = vor.u32 %v553_v57, %v6119_v61  ;;  %v557_v46 = vrot.slane %v6119_v61, 4 }
  0x7c   : > { %750 = vst [vmem:[#allocation2 + $0x9c] sm:$0xf] %v749_v44  ;;  %v564_v60 = vor.u32 %v562_v21, %v561_v42  ;;  %v565_v1 = vrot.slane %v561_v42, 4  ;;  %v762_v49 = vld [vmem:[#allocation2 + $0xb4] sm:$0xf]  ;;  %v7450_v2 = vrot.slane %v5789_v22, 4  ;;  %v725_v18 = vsel %vm5902_vm9, %v489_v40, %v724_v3 }
  0x7d   : > { %v331_v56 = vld [vmem:[%s5814_s27 + $0x74] sm:$0xf]  ;;  %1144 = vrot.lane.b32.xlu0 %v994_v27, %s5547_s24  ;;  %v569_v53 = vrot.slane %v567_v6, 7  ;;  %v578_v58 = vrot.slane %v576_v39, 7  ;;  %v579_v54 = vshll.u32 %v330_v17, 16  ;;  %v556_v4 = vsel %vm5667_vm4, %v548_v36, %v555_v45 }
  0x7e   : > { %1150 = vrot.lane.b32.xlu1 %v7450_v2, %s5547_s24  ;;  %v731_v14 = vld [vmem:[#allocation2 + $0x80] sm:$0x1]  ;;  %v756_v22 = vsel %vm5894_vm8, %v564_v60, %v755_v16  ;;  %726 = vst [vmem:[#allocation2 + $0x74] sm:$0x1] %v725_v18  ;;  %v593_v48 = vshrl.u32 %v332_v5, 16  ;;  %v596_v59 = vshll.u32 %v332_v5, 16 }
  0x7f   : > { %v333_v15 = vld [vmem:[%s5814_s27 + $0x7c] sm:$0xf]  ;;  %v745_v27 = vld [vmem:[#allocation2 + $0x98] sm:$0x1]  ;;  %751 = vst.msk [vmem:[#allocation2 + $0xa0] sm:$0xf] %vm658_vm5, %v556_v4  ;;  %v572_v23 = vor.u32 %v570_v26, %v569_v53  ;;  %v581_v29 = vor.u32 %v579_v54, %v578_v58  ;;  %v732_v62 = vsel %vm5902_vm9, %v506_v9, %v731_v14 }
  0x80   : > { %v574_v43 = vrot.slane %v569_v53, 4  ;;  %757 = vst [vmem:[#allocation2 + $0xa8] sm:$0xf] %v756_v22  ;;  %v582_v7 = vrot.slane %v578_v58, 4  ;;  %v738_v40 = vld [vmem:[#allocation2 + $0x8c] sm:$0x1]  ;;  %v746_v33 = vsel %vm5902_vm9, %v540_v31, %v745_v27 }
  0x81   : > { %v759_v13 = vld [vmem:[#allocation2 + $0xb0] sm:$0x1]  ;;  %v595_v57 = vrot.slane %v593_v48, 7  ;;  %v584_v17 = vshrl.u32 %v331_v56, 16  ;;  %v587_v25 = vshll.u32 %v331_v56, 16  ;;  %1156 = vrot.lane.b32.xlu0 %v1028_v37, %s5547_s24  ;;  %v573_v21 = vsel %vm5667_vm4, %v565_v1, %v572_v23 }
  0x82   : > { %v752_v28 = vld [vmem:[#allocation2 + $0xa4] sm:$0x1]  ;;  %1162 = vrot.lane.b32.xlu1 %v1045_v50, %s5547_s24  ;;  %v763_v20 = vsel %vm5894_vm8, %v581_v29, %v762_v49  ;;  %v769_v12 = vld [vmem:[#allocation2 + $0xc0] sm:$0xf]  ;;  %733 = vst [vmem:[#allocation2 + $0x80] sm:$0x1] %v732_v62  ;;  %v739_v36 = vsel %vm5902_vm9, %v523_v0, %v738_v40  ;;  %v760_v61 = vsel %vm5902_vm9, %v574_v43, %v759_v13 }
  0x83   : > { %v601_v35 = vshrl.u32 %v333_v15, 16  ;;  %v604_v8 = vshll.u32 %v333_v15, 16  ;;  %758 = vst.msk [vmem:[#allocation2 + $0xac] sm:$0xf] %vm658_vm5, %v573_v21  ;;  %764 = vst [vmem:[#allocation2 + $0xb4] sm:$0xf] %v763_v20  ;;  %v598_v9 = vor.u32 %v596_v59, %v595_v57  ;;  %v753_v42 = vsel %vm5902_vm9, %v557_v46, %v752_v28 }
  0x84   : > { %v586_v51 = vrot.slane %v584_v17, 7  ;;  %v599_v50 = vrot.slane %v595_v57, 4  ;;  %747 = vst [vmem:[#allocation2 + $0x98] sm:$0x1] %v746_v33  ;;  %v766_v6 = vld [vmem:[#allocation2 + $0xbc] sm:$0x1] }
  0x85   : > { %v603_v37 = vrot.slane %v601_v35, 7  ;;  %v770_v32 = vsel %vm5894_vm8, %v598_v9, %v769_v12  ;;  %740 = vst [vmem:[#allocation2 + $0x8c] sm:$0x1] %v739_v36  ;;  %761 = vst [vmem:[#allocation2 + $0xb0] sm:$0x1] %v760_v61  ;;  %1168 = vrot.lane.b32.xlu0 %v1062_v34, %s5547_s24  ;;  %vm1224_vm11 = vcmask 60448  }
  0x86   : > { %v589_v3 = vor.u32 %v587_v25, %v586_v51  ;;  %v591_v41 = vrot.slane %v586_v51, 4  ;;  %754 = vst [vmem:[#allocation2 + $0xa4] sm:$0x1] %v753_v42  ;;  %v773_v31 = vld [vmem:[#allocation2 + $0xc8] sm:$0x1]  ;;  %1174 = vrot.lane.b32.xlu1 %v1079_v55, %s5547_s24  ;;  %vm6193_vm12 = vmand %vm1224_vm11, %vm659_vm6  ;;  %vm1231_vm13 = vcmask 57376  }
  0x87   : > { %771 = vst [vmem:[#allocation2 + $0xc0] sm:$0xf] %v770_v32  ;;  %v606_v19 = vor.u32 %v604_v8, %v603_v37  ;;  %v608_v0 = vrot.slane %v603_v37, 4  ;;  %v1236_v34 = vld [vmem:[#allocation2 + $0x18] sm:$0xf]  ;;  %vm6202_vm14 = vmand %vm1231_vm13, %vm334_vm2  ;;  %vm1459_vm1 = vcmask 64512  }
  0x88   : > { %v590_v47 = vsel %vm5667_vm4, %v582_v7, %v589_v3  ;;  %v767_v44 = vsel %vm5902_vm9, %v591_v41, %v766_v6  ;;  %v1226_v55 = vld [vmem:[#allocation2 + $0xc] sm:$0xf]  ;;  %v1240_v45 = vld [vmem:[#allocation2 + $0x20] sm:$0x1]  ;;  %v1233_v46 = vld [vmem:[#allocation2 + $0x14] sm:$0x1] }
  0x89   : > { %765 = vst.msk [vmem:[#allocation2 + $0xb8] sm:$0xf] %vm658_vm5, %v590_v47  ;;  %v607_v26 = vsel %vm5667_vm4, %v599_v50, %v606_v19  ;;  %v774_v10 = vsel %vm5902_vm9, %v608_v0, %v773_v31  ;;  %768 = vst [vmem:[#allocation2 + $0xbc] sm:$0x1] %v767_v44  ;;  %v1243_v2 = vld [vmem:[#allocation2 + $0x24] sm:$0xf] }
  0x8a   : > { %772 = vst.msk [vmem:[#allocation2 + $0xc4] sm:$0xf] %vm658_vm5, %v607_v26  ;;  %775 = vst [vmem:[#allocation2 + $0xc8] sm:$0x1] %v774_v10  ;;  %v2101_v53 = vld [vmem:[#allocation2 + $0xcc] sm:$0xf] }
  0x8b   : > { %v2102_v18 = vld [vmem:[#allocation2 + $0xd0] sm:$0xf]  ;;  %vm2104_vm15 = vsmask.f32 3328  ;;  %vm2105_vm0 = vsmask.f32 7440 }
  0x8c   : > { %v2516_v15 = vshrl.u32 %v2101_v53, 16  ;;  %v2519_v27 = vshll.u32 %v2101_v53, 16  ;;  %v6216_v29 = vld [vmem:[%s7398_s2 + $0x8] sm:$0xf]  ;;  %v2525_v7 = vshll.u32 %v2102_v18, 16  ;;  %v2529_v40 = vshrl.u32 %v2102_v18, 16  ;;  %vm6283_vm4 = vmor %vm2104_vm15, %vm2105_vm0 }
  0x8d   : > { %v1250_v17 = vld [vmem:[#allocation2 + $0x30] sm:$0xf]  ;;  %v6220_v21 = vld [vmem:[#allocation2 + $0xd4] sm:$0x1]  ;;  %vm3310_vm2 = vcmask 1042432   ;;  %vm3311_vm3 = vcmask 1046532  }
  0x8e   : > { %v6230_v51 = vsel %vm1508_vm10, %v5950_v30, 0  ;;  %v6234_v50 = vsel %vm1508_vm10, %v5992_v11, 0  ;;  %v6238_v33 = vsel %vm1508_vm10, %v6216_v29, 0  ;;  %v6244_v42 = vrot.slane %v2516_v15, 4  ;;  %v1254_v3 = vld [vmem:[#allocation2 + $0x38] sm:$0x1]  ;;  %vm6296_vm6 = vmor %vm3310_vm2, %vm3311_vm3 }
  0x8f   : > { %v6246_v6 = vrot.slane %v2519_v27, 5  ;;  %v1247_v41 = vld [vmem:[#allocation2 + $0x2c] sm:$0x1]  ;;  %v6249_v31 = vrot.slane %v2525_v7, 5  ;;  %v6251_v19 = vrot.slane %v2529_v40, 4  ;;  %v2535_v0 = vshll.u32 %v6220_v21, 16 }
  0x90   : > { %v1087_v16 = vpop.permute.xlu1 %1086  ;;  %v1081_v38 = vpop.permute.xlu0 %1080  ;;  %v6273_v18 = vld [vmem:[%s7398_s2 + $0x18] sm:$0xf] }
  0x91   : > { %v1237_v63 = vsel %vm6193_vm12, %v1087_v16, %v1236_v34  ;;  %v1227_v39 = vsel %vm6193_vm12, %v1081_v38, %v1226_v55 }
  0x92   : > { %1238 = vst [vmem:[#allocation2 + $0x18] sm:$0xf] %v1237_v63  ;;  %1228 = vst [vmem:[#allocation2 + $0xc] sm:$0xf] %v1227_v39 }
  0x95   : > { %v1091_v60 = vpop.permute.xlu1 %1090  ;;  %v1085_v1 = vpop.permute.xlu0 %1084 }
  0x96   : > { %v1241_v49 = vsel %vm6202_vm14, %v1091_v60, %v1240_v45  ;;  %v1234_v56 = vsel %vm6202_vm14, %v1085_v1, %v1233_v46 }
  0x97   : > { %1242 = vst [vmem:[#allocation2 + $0x20] sm:$0x1] %v1241_v49  ;;  %1235 = vst [vmem:[#allocation2 + $0x14] sm:$0x1] %v1234_v56 }
  0x99   : > { %v2053_v4 = vld [vmem:[#allocation2 + $0xc] sm:$0xf]  ;;  %v2056_v59 = vld [vmem:[#allocation2 + $0x18] sm:$0xf] }
  0x9a   : > { %v1093_v54 = vpop.permute.xlu0 %1092  ;;  %v2132_v22 = vshrl.u32 %v2053_v4, 16  ;;  %v2135_v48 = vshll.u32 %v2053_v4, 16  ;;  %v2156_v23 = vshrl.u32 %v2056_v59, 16  ;;  %v2159_v43 = vshll.u32 %v2056_v59, 16  ;;  %v6218_v28 = vld [vmem:[#allocation2 + $0xc] sm:$0xe] }
  0x9b   : > { %v1244_v14 = vsel %vm6193_vm12, %v1093_v54, %v1243_v2  ;;  %v6240_v37 = vld [vmem:[#allocation2 + $0x18] sm:$0xe]  ;;  %v4619_v11 = vrot.slane %v6218_v28, 9 }
  0x9c   : > { %1245 = vst [vmem:[#allocation2 + $0x24] sm:$0xf] %v1244_v14  ;;  %v2134_v25 = vrot.slane %v2132_v22, 4  ;;  %v2137_v62 = vrot.slane %v2135_v48, 5  ;;  %v2158_v35 = vrot.slane %v2156_v23, 4  ;;  %v2161_v8 = vrot.slane %v2159_v43, 5 }
  0x9d   : > { %v1089_v58 = vpop.permute.xlu1 %1088  ;;  %v4620_v34 = vrot.slane %v6240_v37, 9  ;;  %v2522_v14 = vor.u32 %v6246_v6, %v6244_v42 }
  0x9e   : > { %1239 = vst.msk [vmem:[#allocation2 + $0x1c] sm:$0xf] %vm1224_vm11, %v1089_v58  ;;  %v1083_v57 = vpop.permute.xlu0 %1082  ;;  %v6224_v20 = vld [vmem:[#allocation2 + $0x14] sm:$0x1]  ;;  %v6226_v12 = vld [vmem:[#allocation2 + $0x20] sm:$0x1]  ;;  %v2138_v9 = vor.u32 %v2137_v62, %v2134_v25  ;;  %v2162_v10 = vor.u32 %v2161_v8, %v2158_v35 }
  0x9f   : > { %1230 = vst.msk [vmem:[#allocation2 + $0x10] sm:$0xf] %vm1224_vm11, %v1083_v57  ;;  %v2151_v36 = vshll.u32 %v6224_v20, 16  ;;  %v2175_v61 = vshll.u32 %v6226_v12, 16  ;;  %v3325_v44 = vrot.slane %v6224_v20, 5  ;;  %v3332_v39 = vrot.slane %v6226_v12, 5 }
  0xa0   : > { %v6261_v55 = vrot.slane %v2138_v9, 4  ;;  %v1257_v58 = vld [vmem:[#allocation2 + $0x3c] sm:$0xf]  ;;  %v2163_v15 = vrot.slane %v2162_v10, 4 }
  0xa1   : > { %v1095_v13 = vpop.permute.xlu1 %1094  ;;  %v6266_v46 = vrot.slane %v2151_v36, 5  ;;  %v6268_v60 = vrot.slane %v2175_v61, 5 }
  0xa2   : > { %1246 = vst.msk [vmem:[#allocation2 + $0x28] sm:$0xf] %vm1224_vm11, %v1095_v13  ;;  %v1099_v32 = vpop.permute.xlu0 %1098 }
  0xa3   : > { %v1251_v47 = vsel %vm6193_vm12, %v1099_v32, %v1250_v17  ;;  %v2059_v63 = vld [vmem:[#allocation2 + $0x24] sm:$0xf] }
  0xa4   : > { %1252 = vst [vmem:[#allocation2 + $0x30] sm:$0xf] %v1251_v47  ;;  %v2180_v1 = vshrl.u32 %v2059_v63, 16  ;;  %v2183_v49 = vshll.u32 %v2059_v63, 16 }
  0xa5   : > { %v1101_v30 = vpop.permute.xlu1 %1100  ;;  %v6258_v26 = vld [vmem:[#allocation2 + $0x1c] sm:$0xf] }
  0xa6   : > { %1253 = vst.msk [vmem:[#allocation2 + $0x34] sm:$0xf] %vm1224_vm11, %v1101_v30  ;;  %v2165_v16 = vshll.u32 %v6258_v26, 16  ;;  %v2169_v38 = vshrl.u32 %v6258_v26, 16  ;;  %v5511_v45 = vld [vmem:[#allocation2 + $0x18] sm:$0xff]   ;;  %v1097_v2 = vpop.permute.xlu0 %1096  ;;  %v5510_v53 = vld [vmem:[#allocation2 + $0xc] sm:$0xff]  }
  0xa7   : > { %v1248_v22 = vsel %vm6202_vm14, %v1097_v2, %v1247_v41  ;;  %v2054_v48 = vld [vmem:[#allocation2 + $0x10] sm:$0xf]  ;;  %4928 = vmatprep.mubr.msk.bf16.mxu1 %vm1459_vm1, %v5510_v53  ;;  %v3329_v57 = vrot.slane %v6258_v26, 5  ;;  %v2182_v25 = vrot.slane %v2180_v1, 4  ;;  %v2185_v62 = vrot.slane %v2183_v49, 5 }
  0xa8   : > { %v2167_v54 = vrot.slane %v2165_v16, 5  ;;  %v2171_v27 = vrot.slane %v2169_v38, 4  ;;  %1249 = vst [vmem:[#allocation2 + $0x2c] sm:$0x1] %v1248_v22  ;;  %v2141_v7 = vshll.u32 %v2054_v48, 16  ;;  %v2145_v40 = vshrl.u32 %v2054_v48, 16  ;;  %4929 = vmatmul.mubr.msk.bf16.vlgmr.msra.gmra.mrb[0].mxu1 %vm1459_vm1, %v5511_v45 }
  0xa9   : > { %v1103_v56 = vpop.permute.xlu1 %1102  ;;  %v6287_v23 = vld [vmem:[#allocation2 + $0x28] sm:$0xf]  ;;  %v3322_v13 = vrot.slane %v2054_v48, 5  ;;  %4961 = vmatpush3.bf16.msra.mxu1 %v6230_v51  ;;  %v2186_v10 = vor.u32 %v2185_v62, %v2182_v25 }
  0xaa   : > { %v1255_v4 = vsel %vm6202_vm14, %v1103_v56, %v1254_v3  ;;  %v5512_v43 = vld [vmem:[#allocation2 + $0x24] sm:$0xff]   ;;  %v2172_v17 = vor.u32 %v2171_v27, %v2167_v54  ;;  %v2189_v28 = vshll.u32 %v6287_v23, 16  ;;  %v1105_v35 = vpop.permute.xlu0 %1104  ;;  %v2143_v8 = vrot.slane %v2141_v7, 5  ;;  %5492 = vmatprep.subr.msk.bf16.mxu1 %vm1508_vm10, %v6273_v18 }
  0xab   : > { %1256 = vst [vmem:[#allocation2 + $0x38] sm:$0x1] %v1255_v4  ;;  %4932 = vmatprep.mubr.msk.bf16.mxu1 %vm1459_vm1, %v5512_v43  ;;  %v2147_v9 = vrot.slane %v2145_v40, 4  ;;  %v3324_v61 = vrot.slane %v3322_v13, 4  ;;  %v2168_v30 = vsel %vm6283_vm4, %v2163_v15, %v2167_v54  ;;  %v1258_v32 = vsel %vm6193_vm12, %v1105_v35, %v1257_v58  ;;  %v1264_v3 = vld [vmem:[#allocation2 + $0x48] sm:$0xf] }
  0xac   : > { %v3323_v41 = vsel %vm6296_vm6, %v4619_v11, %v3322_v13  ;;  %v2173_v47 = vrot.slane %v2172_v17, 4  ;;  %1259 = vst [vmem:[#allocation2 + $0x3c] sm:$0xf] %v1258_v32  ;;  %v2191_v51 = vrot.slane %v2189_v28, 5  ;;  %v2193_v63 = vshrl.u32 %v6287_v23, 16 }
  0xad   : > { %v1107_v20 = vpop.permute.xlu1 %1106  ;;  %v2148_v16 = vor.u32 %v2147_v9, %v2143_v8  ;;  %v3326_v38 = vsel %vm6296_vm6, %v3324_v61, %v3325_v44  ;;  %v2062_v45 = vld [vmem:[#allocation2 + $0x30] sm:$0xf]  ;;  %v6313_v1 = vld [vmem:[#allocation2 + $0x34] sm:$0xf]  ;;  %v2144_v11 = vsel %vm6283_vm4, %v6261_v55, %v2143_v8  ;;  %v2187_v4 = vrot.slane %v2186_v10, 4 }
  0xae   : > { %1260 = vst.msk [vmem:[#allocation2 + $0x40] sm:$0xf] %vm1224_vm11, %v1107_v20  ;;  %v6318_v49 = vcombine.low %v3323_v41, %v3326_v38  ;;  %v2178_v56 = vsel %vm6283_vm4, %v2173_v47, %v6268_v60  ;;  %v2204_v2 = vshrl.u32 %v2062_v45, 16  ;;  %v1111_v58 = vpop.permute.xlu0 %1110  ;;  %v5513_v44 = vld [vmem:[#allocation2 + $0x30] sm:$0xff]   ;;  %v2195_v22 = vrot.slane %v2193_v63, 4 }
  0xaf   : > { %v2149_v54 = vrot.slane %v2148_v16, 4  ;;  %v2207_v48 = vshll.u32 %v2062_v45, 16  ;;  %v1265_v15 = vsel %vm6193_vm12, %v1111_v58, %v1264_v3  ;;  %v6326_v55 = vcombine.low %v2168_v30, %v2178_v56  ;;  %v6328_v27 = vld [vmem:[#allocation2 + $0x2c] sm:$0x1]  ;;  %v1268_v40 = vld [vmem:[#allocation2 + $0x50] sm:$0x1] }
  0xb0   : > { %7459 = vst [vmem:[#allocation4_spill] sm:$0xff] %v6318_v49  ;;  %v2206_v60 = vrot.slane %v2204_v2, 4  ;;  %v2213_v7 = vshll.u32 %v6313_v1, 16  ;;  %1266 = vst [vmem:[#allocation2 + $0x48] sm:$0xf] %v1265_v15  ;;  %v2196_v25 = vor.u32 %v2195_v22, %v2191_v51  ;;  %v2199_v62 = vshll.u32 %v6328_v27, 16  ;;  %4933 = vmatmul.mubr.msk.bf16.gmra.mrb[4].mxu1 %vm1459_vm1, %v5513_v44 }
  0xb1   : > { %v1113_v53 = vpop.permute.xlu1 %1112  ;;  %7460 = vst [vmem:[#allocation5_spill] sm:$0xff] %v6326_v55  ;;  %v1261_v13 = vld [vmem:[#allocation2 + $0x44] sm:$0x1]  ;;  %v2154_v17 = vsel %vm6283_vm4, %v2149_v54, %v6266_v46  ;;  %v2209_v28 = vrot.slane %v2207_v48, 5  ;;  %v2217_v8 = vshrl.u32 %v6313_v1, 16  ;;  %v2192_v3 = vsel %vm6283_vm4, %v2187_v4, %v2191_v51 }
  0xb2   : > { %1267 = vst.msk [vmem:[#allocation2 + $0x4c] sm:$0xf] %vm1224_vm11, %v1113_v53  ;;  %v6330_v43 = vld [vmem:[#allocation2 + $0x38] sm:$0x1]  ;;  %v6338_v20 = vcombine.low %v2144_v11, %v2154_v17  ;;  %v2215_v35 = vrot.slane %v2213_v7, 5  ;;  %v1109_v30 = vpop.permute.xlu0 %1108  ;;  %v2197_v46 = vrot.slane %v2196_v25, 4 }
  0xb3   : > { %v2223_v9 = vshll.u32 %v6330_v43, 16  ;;  %v1271_v32 = vld [vmem:[#allocation2 + $0x54] sm:$0xf]  ;;  %v2201_v41 = vrot.slane %v2199_v62, 5  ;;  %v2210_v47 = vor.u32 %v2209_v28, %v2206_v60  ;;  %v1262_v38 = vsel %vm6202_vm14, %v1109_v30, %v1261_v13  ;;  %v2065_v2 = vld [vmem:[#allocation2 + $0x3c] sm:$0xf] }
  0xb4   : > { %7461 = vst [vmem:[#allocation6_spill] sm:$0xff] %v6338_v20  ;;  %5064 = vmatprep.mubr.msk.bf16.mxu0 %vm1459_vm1, %v6338_v20  ;;  %v2219_v45 = vrot.slane %v2217_v8, 4  ;;  %1263 = vst [vmem:[#allocation2 + $0x44] sm:$0x1] %v1262_v38  ;;  %v2228_v4 = vshrl.u32 %v2065_v2, 16  ;;  %v2231_v22 = vshll.u32 %v2065_v2, 16  ;;  %v3330_v2 = vsel %vm6296_vm6, %v4620_v34, %v3329_v57 }
  0xb5   : > { %v1115_v61 = vpop.permute.xlu1 %1114  ;;  %v6344_v10 = vld [vmem:[#allocation2 + $0x40] sm:$0xf]  ;;  %v2225_v11 = vrot.slane %v2223_v9, 5  ;;  %5065 = vmatmul.mubr.msk.bf16.vlgmr.msra.gmra.mrb[0].mxu0 %vm1459_vm1, %v6326_v55  ;;  %v2202_v51 = vsel %vm6283_vm4, %v2197_v46, %v2201_v41  ;;  %v2211_v56 = vrot.slane %v2210_v47, 4  ;;  %v1282_v26 = vld [vmem:[#allocation2 + $0x68] sm:$0x1] }
  0xb6   : > { %v1269_v16 = vsel %vm6202_vm14, %v1115_v61, %v1268_v40  ;;  %v5514_v63 = vld [vmem:[#allocation2 + $0x3c] sm:$0xff]   ;;  %v2237_v53 = vshll.u32 %v6344_v10, 16  ;;  %v2241_v58 = vshrl.u32 %v6344_v10, 16  ;;  %v6359_v44 = vcombine.low %v2192_v3, %v2202_v51  ;;  %5097 = vmatpush3.bf16.msra.mxu0 %v6234_v50  ;;  %v1117_v15 = vpop.permute.xlu0 %1116 }
  0xb7   : > { %1270 = vst [vmem:[#allocation2 + $0x50] sm:$0x1] %v1269_v16  ;;  %4936 = vmatprep.mubr.msk.bf16.mxu1 %vm1459_vm1, %v5514_v63  ;;  %v2220_v54 = vor.u32 %v2219_v45, %v2215_v35  ;;  %v1278_v60 = vld [vmem:[#allocation2 + $0x60] sm:$0xf]  ;;  %v2216_v7 = vsel %vm6283_vm4, %v2211_v56, %v2215_v35  ;;  %5497 = vmatprep.subr.msk.bf16.mxu0 %vm1508_vm10, %v6216_v29  ;;  %v2230_v35 = vrot.slane %v2228_v4, 4  ;;  %v2233_v8 = vrot.slane %v2231_v22, 5 }
  0xb8   : > { %7462 = vst [vmem:[#allocation7_spill] sm:$0xff] %v6359_v44  ;;  %v6364_v40 = vrot.slane %v2237_v53, 5  ;;  %v2243_v13 = vrot.slane %v2241_v58, 4  ;;  %v2532_v50 = vor.u32 %v6251_v19, %v6249_v31  ;;  %v1272_v25 = vsel %vm6193_vm12, %v1117_v15, %v1271_v32  ;;  %5068 = vmatprep.mubr.msk.bf16.mxu0 %vm1459_vm1, %v6359_v44  ;;  %v2068_v29 = vld [vmem:[#allocation2 + $0x48] sm:$0xf] }
  0xb9   : > { %v1119_v48 = vpop.permute.xlu1 %1118  ;;  %v6366_v17 = vld [vmem:[#allocation2 + $0x4c] sm:$0xf]  ;;  %v2221_v28 = vrot.slane %v2220_v54, 4  ;;  %1273 = vst [vmem:[#allocation2 + $0x54] sm:$0xf] %v1272_v25  ;;  %v3331_v3 = vrot.slane %v3329_v57, 4  ;;  %v2234_v46 = vor.u32 %v2233_v8, %v2230_v35 }
  0xba   : > { %1274 = vst.msk [vmem:[#allocation2 + $0x58] sm:$0xf] %vm1224_vm11, %v1119_v48  ;;  %v6377_v62 = vld [vmem:[#allocation2 + $0x48] sm:$0xff]   ;;  %v2244_v9 = vor.u32 %v2243_v13, %v6364_v40  ;;  %v2261_v61 = vshll.u32 %v6366_v17, 16  ;;  %v2265_v30 = vshrl.u32 %v6366_v17, 16  ;;  %v2252_v41 = vshrl.u32 %v2068_v29, 16  ;;  %v1123_v38 = vpop.permute.xlu0 %1122 }
  0xbb   : > { %4937 = vmatmul.mubr.msk.bf16.gmra.mrb[8].mxu1 %vm1459_vm1, %v6377_v62  ;;  %v2226_v32 = vsel %vm6283_vm4, %v2221_v28, %v2225_v11  ;;  %v2255_v47 = vshll.u32 %v2068_v29, 16  ;;  %v1275_v45 = vld [vmem:[#allocation2 + $0x5c] sm:$0x1]  ;;  %v3241_v53 = vld [vmem:[#allocation2 + $0x24] sm:$0xe]  ;;  %v1279_v11 = vsel %vm6193_vm12, %v1123_v38, %v1278_v60  ;;  %v2235_v54 = vrot.slane %v2234_v46, 4 }
  0xbc   : > { %v6388_v63 = vcombine.low %v2216_v7, %v2226_v32  ;;  %v2263_v51 = vrot.slane %v2261_v61, 5  ;;  %v2267_v56 = vrot.slane %v2265_v30, 4  ;;  %v6399_v58 = vld [vmem:[#allocation2 + $0x44] sm:$0x1]  ;;  %v2254_v22 = vrot.slane %v2252_v41, 4  ;;  %v7517_v59 = vld [vmem:[#allocation6_spill] sm:$0xff] }
  0xbd   : > { %v1125_v16 = vpop.permute.xlu1 %1124  ;;  %v3333_v37 = vsel %vm6296_vm6, %v3331_v3, %v3332_v39  ;;  %1280 = vst [vmem:[#allocation2 + $0x60] sm:$0xf] %v1279_v11  ;;  %v2247_v34 = vshll.u32 %v6399_v58, 16  ;;  %v2257_v57 = vrot.slane %v2255_v47, 5  ;;  %v2245_v60 = vrot.slane %v2244_v9, 4 }
  0xbe   : > { %7463 = vst [vmem:[#allocation8_spill] sm:$0xff] %v6388_v63  ;;  %1281 = vst.msk [vmem:[#allocation2 + $0x64] sm:$0xf] %vm1224_vm11, %v1125_v16  ;;  %v6401_v4 = vld [vmem:[#allocation2 + $0x50] sm:$0x1]  ;;  %5069 = vmatmul.mubr.msk.bf16.gmra.mrb[4].mxu0 %vm1459_vm1, %v6388_v63  ;;  %v2268_v48 = vor.u32 %v2267_v56, %v2263_v51  ;;  %v6411_v7 = vcombine.low %v3330_v2, %v3333_v37  ;;  %v4621_v13 = vrot.slane %v3241_v53, 9  ;;  %v1121_v28 = vpop.permute.xlu0 %1120 }
  0xbf   : > { %v2271_v15 = vshll.u32 %v6401_v4, 16  ;;  %v3336_v12 = vrot.slane %v6287_v23, 5  ;;  %v2249_v39 = vrot.slane %v2247_v34, 5  ;;  %v2258_v35 = vor.u32 %v2257_v57, %v2254_v22  ;;  %v1285_v46 = vld [vmem:[#allocation2 + $0x6c] sm:$0xf] }
  0xc0   : > { %7464 = vst [vmem:[#allocation9_spill] sm:$0xff] %v6411_v7  ;;  %v2269_v8 = vrot.slane %v2268_v48, 4  ;;  %v1276_v30 = vsel %vm6202_vm14, %v1121_v28, %v1275_v45  ;;  %v2240_v9 = vsel %vm6283_vm4, %v2235_v54, %v6364_v40  ;;  %v2071_v32 = vld [vmem:[#allocation2 + $0x54] sm:$0xf]  ;;  %v1292_v37 = vld [vmem:[#allocation2 + $0x78] sm:$0xf] }
  0xc1   : > { %v1127_v25 = vpop.permute.xlu1 %1126  ;;  %v2273_v29 = vrot.slane %v2271_v15, 5  ;;  %v6418_v3 = vld [vmem:[#allocation2 + $0x54] sm:$0xff]   ;;  %v3338_v23 = vrot.slane %v3336_v12, 4  ;;  %1277 = vst [vmem:[#allocation2 + $0x5c] sm:$0x1] %v1276_v30  ;;  %v2250_v41 = vsel %vm6283_vm4, %v2245_v60, %v2249_v39  ;;  %v2259_v47 = vrot.slane %v2258_v35, 4 }
  0xc2   : > { %v1283_v61 = vsel %vm6202_vm14, %v1127_v25, %v1282_v26  ;;  %7465 = vst [vmem:[#allocation10_spill] sm:$0xff] %v6418_v3  ;;  %v6427_v38 = vld [vmem:[#allocation2 + $0x58] sm:$0xf]  ;;  %v2276_v45 = vshrl.u32 %v2071_v32, 16  ;;  %4940 = vmatprep.mubr.msk.bf16.mxu1 %vm1459_vm1, %v6418_v3  ;;  %v6431_v56 = vcombine.low %v2240_v9, %v2250_v41  ;;  %v2279_v40 = vshll.u32 %v2071_v32, 16 }
  0xc3   : > { %1284 = vst [vmem:[#allocation2 + $0x68] sm:$0x1] %v1283_v61  ;;  %v2274_v16 = vsel %vm6283_vm4, %v2269_v8, %v2273_v29  ;;  %v2285_v2 = vshll.u32 %v6427_v38, 16  ;;  %v2289_v53 = vshrl.u32 %v6427_v38, 16  ;;  %v1129_v54 = vpop.permute.xlu0 %1128  ;;  %v2264_v22 = vsel %vm6283_vm4, %v2259_v47, %v2263_v51 }
  0xc4   : > { %7466 = vst [vmem:[#allocation11_spill] sm:$0xff] %v6431_v56  ;;  %v2278_v26 = vrot.slane %v2276_v45, 4  ;;  %v3337_v57 = vsel %vm6296_vm6, %v4621_v13, %v3336_v12  ;;  %v3339_v48 = vrot.slane %v6328_v27, 5  ;;  %v1286_v15 = vsel %vm6193_vm12, %v1129_v54, %v1285_v46  ;;  %5072 = vmatprep.mubr.msk.bf16.mxu0 %vm1459_vm1, %v6431_v56  ;;  %v2074_v35 = vld [vmem:[#allocation2 + $0x60] sm:$0xf] }
  0xc5   : > { %v1131_v11 = vpop.permute.xlu1 %1130  ;;  %v6437_v34 = vld [vmem:[#allocation2 + $0x64] sm:$0xf]  ;;  %v6447_v60 = vcombine.low %v2264_v22, %v2274_v16  ;;  %v2281_v25 = vrot.slane %v2279_v40, 5  ;;  %v2287_v28 = vrot.slane %v2285_v2, 5  ;;  %1287 = vst [vmem:[#allocation2 + $0x6c] sm:$0xf] %v1286_v15 }
  0xc6   : > { %1288 = vst.msk [vmem:[#allocation2 + $0x70] sm:$0xf] %vm1224_vm11, %v1131_v11  ;;  %v6449_v51 = vld [vmem:[#allocation2 + $0x60] sm:$0xff]   ;;  %v2291_v39 = vrot.slane %v2289_v53, 4  ;;  %v2309_v13 = vshll.u32 %v6437_v34, 16  ;;  %v2313_v27 = vshrl.u32 %v6437_v34, 16  ;;  %v3340_v12 = vsel %vm6296_vm6, %v3338_v23, %v3339_v48 }
  0xc7   : > { %7467 = vst [vmem:[#allocation12_spill] sm:$0xff] %v6447_v60  ;;  %7468 = vst [vmem:[#allocation13_spill] sm:$0xff] %v6449_v51  ;;  %5073 = vmatmul.mubr.msk.bf16.gmra.mrb[8].mxu0 %vm1459_vm1, %v6447_v60  ;;  %4941 = vmatmul.mubr.msk.bf16.gmra.mrb[12].mxu1 %vm1459_vm1, %v6449_v51  ;;  %v2282_v8 = vor.u32 %v2281_v25, %v2278_v26  ;;  %v2300_v29 = vshrl.u32 %v2074_v35, 16  ;;  %v2303_v61 = vshll.u32 %v2074_v35, 16  ;;  %v6463_v16 = vsel %vm1508_vm10, %v6273_v18, 0 }
  0xc8   : > { %v6459_v30 = vcombine.low %v3337_v57, %v3340_v12  ;;  %v1135_v32 = vpop.permute.xlu0 %1134  ;;  %v2292_v46 = vor.u32 %v2291_v39, %v2287_v28  ;;  %v2311_v41 = vrot.slane %v2309_v13, 5  ;;  %v2315_v47 = vrot.slane %v2313_v27, 4  ;;  %v6468_v45 = vld [vmem:[#allocation2 + $0x5c] sm:$0x1]  ;;  %v1299_v11 = vld [vmem:[#allocation2 + $0x84] sm:$0xf] }
  0xc9   : > { %v1137_v9 = vpop.permute.xlu1 %1136  ;;  %v1293_v23 = vsel %vm6193_vm12, %v1135_v32, %v1292_v37  ;;  %v2283_v40 = vrot.slane %v2282_v8, 4  ;;  %v2302_v53 = vrot.slane %v2300_v29, 4  ;;  %v2295_v54 = vshll.u32 %v6468_v45, 16  ;;  %v6488_v25 = vld [vmem:[#allocation2 + $0x30] sm:$0xe] }
  0xca   : > { %7469 = vst [vmem:[#allocation14_spill] sm:$0xff] %v6459_v30  ;;  %1295 = vst.msk [vmem:[#allocation2 + $0x7c] sm:$0xf] %vm1224_vm11, %v1137_v9  ;;  %v6470_v2 = vld [vmem:[#allocation2 + $0x68] sm:$0x1]  ;;  %v2305_v22 = vrot.slane %v2303_v61, 5  ;;  %v2316_v26 = vor.u32 %v2315_v47, %v2311_v41 }
  0xcb   : > { %1294 = vst [vmem:[#allocation2 + $0x78] sm:$0xf] %v1293_v23  ;;  %v6476_v18 = vrot.slane %v2522_v14, 4  ;;  %v2293_v57 = vrot.slane %v2292_v46, 4  ;;  %v2319_v37 = vshll.u32 %v6470_v2, 16  ;;  %v6482_v48 = vrot.slane %v2532_v50, 4 }
  0xcc   : > { %v6486_v15 = vrot.slane %v2535_v0, 5  ;;  %v1141_v35 = vpop.permute.xlu0 %1140  ;;  %v1306_v13 = vld [vmem:[#allocation2 + $0x90] sm:$0xf]  ;;  %v2297_v42 = vrot.slane %v2295_v54, 5  ;;  %v2306_v6 = vor.u32 %v2305_v22, %v2302_v53  ;;  %v2317_v14 = vrot.slane %v2316_v26, 4 }
  0xcd   : > { %v1143_v39 = vpop.permute.xlu1 %1142  ;;  %v3343_v27 = vrot.slane %v6313_v1, 5  ;;  %v1300_v19 = vsel %vm6193_vm12, %v1141_v35, %v1299_v11  ;;  %v6494_v50 = vld [vmem:[#allocation2 + $0x6c] sm:$0xff]   ;;  %v2288_v21 = vsel %vm6283_vm4, %v2283_v40, %v2287_v28  ;;  %v2321_v0 = vrot.slane %v2319_v37, 5  ;;  %v1313_v11 = vld [vmem:[#allocation2 + $0x9c] sm:$0xf] }
  0xce   : > { %1302 = vst.msk [vmem:[#allocation2 + $0x88] sm:$0xf] %vm1224_vm11, %v1143_v39  ;;  %7470 = vst [vmem:[#allocation15_spill] sm:$0xff] %v6494_v50  ;;  %v2077_v12 = vld [vmem:[#allocation2 + $0x6c] sm:$0xf]  ;;  %v2298_v8 = vsel %vm6283_vm4, %v2293_v57, %v2297_v42  ;;  %v2307_v29 = vrot.slane %v2306_v6, 4  ;;  %4944 = vmatprep.mubr.msk.bf16.mxu1 %vm1459_vm1, %v6494_v50 }
  0xcf   : > { %1301 = vst [vmem:[#allocation2 + $0x84] sm:$0xf] %v1300_v19  ;;  %v6500_v61 = vld [vmem:[#allocation2 + $0x70] sm:$0xf]  ;;  %v2324_v1 = vshrl.u32 %v2077_v12, 16  ;;  %v2327_v9 = vshll.u32 %v2077_v12, 16  ;;  %v6504_v32 = vcombine.low %v2288_v21, %v2298_v8  ;;  %v2322_v46 = vsel %vm6283_vm4, %v2317_v14, %v2321_v0 }
  0xd0   : > { %v2333_v28 = vshll.u32 %v6500_v61, 16  ;;  %v2337_v47 = vshrl.u32 %v6500_v61, 16  ;;  %v1147_v40 = vpop.permute.xlu0 %1146  ;;  %v2312_v53 = vsel %vm6283_vm4, %v2307_v29, %v2311_v41  ;;  %v6512_v54 = vld [vmem:[#allocation2 + $0x4] sm:$0xf]  ;;  %v6514_v22 = vld [vmem:[#allocation2] sm:$0xe] }
  0xd1   : > { %7471 = vst [vmem:[#allocation16_spill] sm:$0xff] %v6504_v32  ;;  %v1149_v23 = vpop.permute.xlu1 %1148  ;;  %7472 = vst [vmem:[#allocation17_spill] sm:$0xff] %v6512_v54  ;;  %v4622_v26 = vrot.slane %v6488_v25, 9  ;;  %v3346_v57 = vrot.slane %v6330_v43, 5  ;;  %v1307_v37 = vsel %vm6193_vm12, %v1147_v40, %v1306_v13  ;;  %5076 = vmatprep.mubr.msk.bf16.mxu0 %vm1459_vm1, %v6504_v32  ;;  %v6523_v39 = vcombine.low %v2312_v53, %v2322_v46  ;;  %v6527_v42 = vld [vmem:[#allocation2 + $0x7c] sm:$0xf] }
  0xd2   : > { %7473 = vst [vmem:[#allocation18_spill] sm:$0xff] %v6514_v22  ;;  %1309 = vst.msk [vmem:[#allocation2 + $0x94] sm:$0xf] %vm1224_vm11, %v1149_v23  ;;  %v6525_v41 = vld [vmem:[#allocation2 + $0x78] sm:$0xff]   ;;  %v2326_v35 = vrot.slane %v2324_v1, 4  ;;  %v2329_v6 = vrot.slane %v2327_v9, 5 }
  0xd3   : > { %7474 = vst [vmem:[#allocation19_spill] sm:$0xff] %v6523_v39  ;;  %7475 = vst [vmem:[#allocation20_spill] sm:$0xff] %v6525_v41  ;;  %v2080_v25 = vld [vmem:[#allocation2 + $0x78] sm:$0xf]  ;;  %v2357_v43 = vshll.u32 %v6527_v42, 16  ;;  %v2361_v14 = vshrl.u32 %v6527_v42, 16  ;;  %5077 = vmatmul.mubr.msk.bf16.gmra.mrb[12].mxu0 %vm1459_vm1, %v6523_v39  ;;  %4945 = vmatmul.mubr.msk.bf16.gmra.mrb[16].mxu1 %vm1459_vm1, %v6525_v41 }
  0xd4   : > { %1308 = vst [vmem:[#allocation2 + $0x90] sm:$0xf] %v1307_v37  ;;  %v3345_v19 = vrot.slane %v3343_v27, 4  ;;  %v6535_v13 = vrot.slane %v2333_v28, 5  ;;  %v2339_v21 = vrot.slane %v2337_v47, 4  ;;  %v2348_v0 = vshrl.u32 %v2080_v25, 16  ;;  %5098 = vmatprep.mubr.msk.bf16.mxu0 %vm1459_vm1, %v6326_v55  ;;  %v1153_v29 = vpop.permute.xlu0 %1152 }
  0xd5   : > { %v2351_v12 = vshll.u32 %v2080_v25, 16  ;;  %v1155_v8 = vpop.permute.xlu1 %1154  ;;  %v1320_v1 = vld [vmem:[#allocation2 + $0xa8] sm:$0xf]  ;;  %v6539_v9 = vrot.slane %v2357_v43, 5  ;;  %v2363_v46 = vrot.slane %v2361_v14, 4  ;;  %v1314_v28 = vsel %vm6193_vm12, %v1153_v29, %v1313_v11 }
  0xd6   : > { %v6541_v23 = vld [vmem:[#allocation2 + $0x8] sm:$0x1]  ;;  %v3347_v40 = vsel %vm6296_vm6, %v3345_v19, %v3346_v57  ;;  %1316 = vst.msk [vmem:[#allocation2 + $0xa0] sm:$0xf] %vm1224_vm11, %v1155_v8  ;;  %v3344_v25 = vsel %vm6296_vm6, %v4622_v26, %v3343_v27  ;;  %1315 = vst [vmem:[#allocation2 + $0x9c] sm:$0xf] %v1314_v28  ;;  %v2330_v43 = vor.u32 %v2329_v6, %v2326_v35 }
  0xd7   : > { %7476 = vst [vmem:[#allocation21_spill] sm:$0xff] %v6541_v23  ;;  %v6548_v47 = vld [vmem:[#allocation2 + $0x84] sm:$0xff]   ;;  %v2350_v14 = vrot.slane %v2348_v0, 4  ;;  %v2353_v52 = vrot.slane %v2351_v12, 5  ;;  %v6556_v19 = vcombine.low %v3344_v25, %v3347_v40  ;;  %v2340_v11 = vor.u32 %v2339_v21, %v6535_v13  ;;  %v1327_v26 = vld [vmem:[#allocation2 + $0xb4] sm:$0xf] }
  0xd8   : > { %7477 = vst [vmem:[#allocation22_spill] sm:$0xff] %v6548_v47  ;;  %v2083_v55 = vld [vmem:[#allocation2 + $0x84] sm:$0xf]  ;;  %v6554_v57 = vld [vmem:[#allocation2 + $0x88] sm:$0xf]  ;;  %4948 = vmatprep.mubr.msk.bf16.mxu1 %vm1459_vm1, %v6548_v47  ;;  %v1159_v27 = vpop.permute.xlu0 %1158  ;;  %v2364_v6 = vor.u32 %v2363_v46, %v6539_v9  ;;  %v7481_v46 = vrot.slane %v6512_v54, 5 }
  0xd9   : > { %7478 = vst [vmem:[#allocation23_spill] sm:$0xff] %v6556_v19  ;;  %v2372_v8 = vshrl.u32 %v2083_v55, 16  ;;  %v2375_v29 = vshll.u32 %v2083_v55, 16  ;;  %v2381_v53 = vshll.u32 %v6554_v57, 16  ;;  %v1161_v37 = vpop.permute.xlu1 %1160  ;;  %v1289_v35 = vld [vmem:[#allocation2 + $0x74] sm:$0x1]  ;;  %v1321_v55 = vsel %vm6193_vm12, %v1159_v27, %v1320_v1 }
  0xda   : > { %v2385_v0 = vshrl.u32 %v6554_v57, 16  ;;  %v6568_v40 = vld [vmem:[%s7398_s2 + $0x14] sm:$0xf]  ;;  %v3243_v21 = vld [vmem:[#allocation2 + $0x3c] sm:$0xe]  ;;  %v6577_v19 = vrot.slane %v7481_v46, 4  ;;  %v2354_v30 = vor.u32 %v2353_v52, %v2350_v14 }
  0xdb   : > { %7479 = vst [vmem:[#allocation24_spill] sm:$0xff] %v6568_v40  ;;  %1323 = vst.msk [vmem:[#allocation2 + $0xac] sm:$0xf] %vm1224_vm11, %v1161_v37  ;;  %v6573_v28 = vld [vmem:[#allocation2 + $0x90] sm:$0xff]   ;;  %v2374_v25 = vrot.slane %v2372_v8, 4  ;;  %v2377_v20 = vrot.slane %v2375_v29, 5  ;;  %5099 = vmatmul.mubr.msk.bf16.vlgmr.msra.gmra.mrb[0].mxu0 %vm1459_vm1, %v6359_v44 }
  0xdc   : > { %7480 = vst [vmem:[#allocation25_spill] sm:$0xff] %v6573_v28  ;;  %7482 = vst [vmem:[#allocation26_spill] sm:$0xff] %v6577_v19  ;;  %v6579_v12 = vrot.slane %v2330_v43, 4  ;;  %v6581_v47 = vrot.slane %v2381_v53, 5  ;;  %v2387_v7 = vrot.slane %v2385_v0, 4  ;;  %4949 = vmatmul.mubr.msk.bf16.gmra.mrb[20].mxu1 %vm1459_vm1, %v6573_v28  ;;  %v6587_v1 = vrot.slane %v2340_v11, 4  ;;  %5131 = vmatpush3.bf16.msra.mxu0 %v6238_v33 }
  0xdd   : > { %1322 = vst [vmem:[#allocation2 + $0xa8] sm:$0xf] %v1321_v55  ;;  %v2086_v49 = vld [vmem:[#allocation2 + $0x90] sm:$0xf]  ;;  %v6589_v37 = vld [vmem:[#allocation2 + $0x94] sm:$0xf]  ;;  %5102 = vmatprep.mubr.msk.bf16.mxu0 %vm1459_vm1, %v6388_v63  ;;  %v1165_v52 = vpop.permute.xlu1 %1164  ;;  %v2378_v46 = vor.u32 %v2377_v20, %v2374_v25  ;;  %5498 = vmatprep.subr.msk.bf16.mxu0 %vm1508_vm10, %v6568_v40 }
  0xde   : > { %v2396_v8 = vshrl.u32 %v2086_v49, 16  ;;  %v2399_v29 = vshll.u32 %v2086_v49, 16  ;;  %v4623_v27 = vrot.slane %v3243_v21, 9  ;;  %v6594_v43 = vrot.slane %v2364_v6, 4  ;;  %v1334_v33 = vld [vmem:[#allocation2 + $0xc0] sm:$0xf] }
  0xdf   : > { %v2405_v14 = vshll.u32 %v6589_v37, 16  ;;  %v2409_v0 = vshrl.u32 %v6589_v37, 16  ;;  %v3350_v11 = vrot.slane %v6344_v10, 5  ;;  %v1328_v55 = vsel %vm6193_vm12, %v1165_v52, %v1327_v26  ;;  %v6603_v21 = vld [vmem:[#allocation2 + $0x9c] sm:$0xff]   ;;  %v1317_v22 = vld [vmem:[#allocation2 + $0xa4] sm:$0x1] }
  0xe0   : > { %7483 = vst [vmem:[#allocation27_spill] sm:$0xff] %v6603_v21  ;;  %v2398_v63 = vrot.slane %v2396_v8, 4  ;;  %1329 = vst [vmem:[#allocation2 + $0xb4] sm:$0xf] %v1328_v55  ;;  %v6611_v6 = vrot.slane %v2354_v30, 4  ;;  %v2388_v26 = vor.u32 %v2387_v7, %v6581_v47  ;;  %4952 = vmatprep.mubr.msk.bf16.mxu1 %vm1459_vm1, %v6603_v21  ;;  %v6633_v41 = vrot.slane %v2378_v46, 4 }
  0xe1   : > { %v2089_v52 = vld [vmem:[#allocation2 + $0x9c] sm:$0xf]  ;;  %v1296_v10 = vld [vmem:[#allocation2 + $0x80] sm:$0x1]  ;;  %v6620_v28 = vrot.slane %v2405_v14, 5  ;;  %v6622_v7 = vrot.slane %v2409_v0, 4  ;;  %v3351_v40 = vsel %vm6296_vm6, %v4623_v27, %v3350_v11 }
  0xe2   : > { %v2420_v20 = vshrl.u32 %v2089_v52, 16  ;;  %v2423_v25 = vshll.u32 %v2089_v52, 16  ;;  %v6639_v0 = vrot.slane %v2388_v26, 4 }
  0xe3   : > { %v1133_v53 = vpop.permute.xlu0 %1132  ;;  %5103 = vmatmul.mubr.msk.bf16.gmra.mrb[4].mxu0 %vm1459_vm1, %v6431_v56  ;;  %v2412_v56 = vor.u32 %v6622_v7, %v6620_v28 }
  0xe4   : > { %v1290_v49 = vsel %vm6202_vm14, %v1133_v53, %v1289_v35  ;;  %v2401_v35 = vrot.slane %v2399_v29, 5  ;;  %v6614_v53 = vld [vmem:[#allocation2 + $0xa0] sm:$0xf]  ;;  %v6624_v29 = vld [vmem:[#allocation2 + $0xac] sm:$0xf]  ;;  %v2422_v50 = vrot.slane %v2420_v20, 4  ;;  %5106 = vmatprep.mubr.msk.bf16.mxu0 %vm1459_vm1, %v6447_v60 }
  0xe5   : > { %1291 = vst [vmem:[#allocation2 + $0x74] sm:$0x1] %v1290_v49  ;;  %v2429_v8 = vshll.u32 %v6614_v53, 16  ;;  %v2433_v55 = vshrl.u32 %v6614_v53, 16  ;;  %v1171_v49 = vpop.permute.xlu1 %1170  ;;  %v6631_v21 = vld [vmem:[#allocation2 + $0xa8] sm:$0xff]   ;;  %v2453_v24 = vshll.u32 %v6624_v29, 16 }
  0xe6   : > { %v2402_v30 = vor.u32 %v2401_v35, %v2398_v63  ;;  %v1335_v52 = vsel %vm6193_vm12, %v1171_v49, %v1334_v33  ;;  %7484 = vst [vmem:[#allocation28_spill] sm:$0xff] %v6631_v21  ;;  %v2425_v63 = vrot.slane %v2423_v25, 5  ;;  %v2092_v27 = vld [vmem:[#allocation2 + $0xa8] sm:$0xf]  ;;  %v2457_v33 = vshrl.u32 %v6624_v29, 16  ;;  %4953 = vmatmul.mubr.msk.bf16.gmra.mrb[24].mxu1 %vm1459_vm1, %v6631_v21 }
  0xe7   : > { %v1167_v44 = vpop.permute.xlu0 %1166  ;;  %1336 = vst [vmem:[#allocation2 + $0xc0] sm:$0xf] %v1335_v52  ;;  %v6649_v46 = vrot.slane %v2433_v55, 4  ;;  %v2444_v35 = vshrl.u32 %v2092_v27, 16  ;;  %v2447_v20 = vshll.u32 %v2092_v27, 16  ;;  %v3352_v21 = vrot.slane %v3350_v11, 4 }
  0xe8   : > { %1330 = vst.msk [vmem:[#allocation2 + $0xb8] sm:$0xf] %vm1224_vm11, %v1167_v44  ;;  %v6647_v44 = vrot.slane %v2429_v8, 5  ;;  %v1310_v49 = vld [vmem:[#allocation2 + $0x98] sm:$0x1]  ;;  %v6653_v14 = vrot.slane %v2402_v30, 4  ;;  %v2426_v51 = vor.u32 %v2425_v63, %v2422_v50 }
  0xe9   : > { %v1303_v52 = vld [vmem:[#allocation2 + $0x8c] sm:$0x1]  ;;  %v3353_v8 = vrot.slane %v6399_v58, 5  ;;  %v6667_v30 = vrot.slane %v2453_v24, 5  ;;  %v2446_v7 = vrot.slane %v2444_v35, 4  ;;  %v2449_v58 = vrot.slane %v2447_v20, 5 }
  0xea   : > { %v2459_v63 = vrot.slane %v2457_v33, 4  ;;  %v2095_v3 = vld [vmem:[#allocation2 + $0xb4] sm:$0xf]  ;;  %v1324_v24 = vld [vmem:[#allocation2 + $0xb0] sm:$0x1]  ;;  %v6676_v54 = vrot.slane %v2426_v51, 4 }
  0xeb   : > { %v1173_v25 = vpop.permute.xlu0 %1172  ;;  %v3354_v19 = vsel %vm6296_vm6, %v3352_v21, %v3353_v8  ;;  %v2450_v35 = vor.u32 %v2449_v58, %v2446_v7  ;;  %v6688_v51 = vrot.slane %v2412_v56, 4  ;;  %5107 = vmatmul.mubr.msk.bf16.gmra.mrb[8].mxu0 %vm1459_vm1, %v6504_v32  ;;  %v6698_v56 = vld [vmem:[#allocation2 + $0x48] sm:$0xe] }
  0xec   : > { %v1139_v26 = vpop.permute.xlu1 %1138  ;;  %1337 = vst.msk [vmem:[#allocation2 + $0xc4] sm:$0xf] %vm1224_vm11, %v1173_v25  ;;  %v6661_v27 = vld [vmem:[#allocation2 + $0x74] sm:$0x1]  ;;  %v2471_v25 = vshll.u32 %v2095_v3, 16  ;;  %v6678_v33 = vcombine.low %v3351_v40, %v3354_v19  ;;  %v2460_v19 = vor.u32 %v2459_v63, %v6667_v30  ;;  %5110 = vmatprep.mubr.msk.bf16.mxu0 %vm1459_vm1, %v6523_v39 }
  0xed   : > { %v1297_v55 = vsel %vm6202_vm14, %v1139_v26, %v1296_v10  ;;  %v2343_v50 = vshll.u32 %v6661_v27, 16  ;;  %v2436_v10 = vor.u32 %v6649_v46, %v6647_v44  ;;  %v2468_v26 = vshrl.u32 %v2095_v3, 16 }
  0xee   : > { %1298 = vst [vmem:[#allocation2 + $0x80] sm:$0x1] %v1297_v55  ;;  %7486 = vst [vmem:[#allocation30_spill] sm:$0xff] %v6678_v33  ;;  %v2473_v8 = vrot.slane %v2471_v25, 5 }
  0xef   : > { %v1145_v60 = vpop.permute.xlu0 %1144  ;;  %v6674_v11 = vld [vmem:[#allocation2 + $0xb4] sm:$0xff]   ;;  %v2345_v55 = vrot.slane %v2343_v50, 5  ;;  %v2470_v21 = vrot.slane %v2468_v26, 4 }
  0xf0   : > { %v1151_v23 = vpop.permute.xlu1 %1150  ;;  %7485 = vst [vmem:[#allocation29_spill] sm:$0xff] %v6674_v11  ;;  %v1304_v3 = vsel %vm6202_vm14, %v1145_v60, %v1303_v52  ;;  %v6684_v20 = vld [vmem:[#allocation2 + $0xb8] sm:$0xf]  ;;  %4956 = vmatprep.mubr.msk.bf16.mxu1 %vm1459_vm1, %v6674_v11  ;;  %v5526_v52 = vld [vmem:[#allocation2] sm:$0xff]  }
  0xf1   : > { %v1311_v46 = vsel %vm6202_vm14, %v1151_v23, %v1310_v49  ;;  %1305 = vst [vmem:[#allocation2 + $0x8c] sm:$0x1] %v1304_v3  ;;  %v2477_v40 = vshll.u32 %v6684_v20, 16  ;;  %v2481_v23 = vshrl.u32 %v6684_v20, 16  ;;  %v2098_v49 = vld [vmem:[#allocation2 + $0xc0] sm:$0xf]  ;;  %v2346_v60 = vsel %vm6283_vm4, %v6587_v1, %v2345_v55 }
  0xf2   : > { %1312 = vst [vmem:[#allocation2 + $0x98] sm:$0x1] %v1311_v46  ;;  %v2474_v50 = vor.u32 %v2473_v8, %v2470_v21  ;;  %v2492_v7 = vshrl.u32 %v2098_v49, 16  ;;  %v2495_v58 = vshll.u32 %v2098_v49, 16  ;;  %v1331_v46 = vld [vmem:[#allocation2 + $0xbc] sm:$0x1] }
  0xf3   : > { %v1157_v26 = vpop.permute.xlu0 %1156  ;;  %v6702_v25 = vld [vmem:[#allocation2 + $0xc0] sm:$0xff]   ;;  %v6712_v55 = vrot.slane %v2436_v10, 4  ;;  %v6714_v21 = vrot.slane %v2450_v35, 4  ;;  %v6722_v32 = vrot.slane %v2477_v40, 5  ;;  %v6724_v3 = vrot.slane %v2481_v23, 4 }
  0xf4   : > { %v1163_v63 = vpop.permute.xlu1 %1162  ;;  %7487 = vst [vmem:[#allocation31_spill] sm:$0xff] %v6702_v25  ;;  %v1318_v49 = vsel %vm6202_vm14, %v1157_v26, %v1317_v22  ;;  %v6726_v11 = vld [vmem:[#allocation2 + $0xc4] sm:$0xf]  ;;  %4957 = vmatmul.mubr.msk.bf16.gmra.mrb[28].mxu1 %vm1459_vm1, %v6702_v25  ;;  %v1338_v10 = vld [vmem:[#allocation2 + $0xc8] sm:$0x1]  ;;  %v6738_v40 = vrot.slane %v2460_v19, 4 }
  0xf5   : > { %v1325_v8 = vsel %vm6202_vm14, %v1163_v63, %v1324_v24  ;;  %v6720_v39 = vld [vmem:[#allocation2 + $0x80] sm:$0x1]  ;;  %1319 = vst [vmem:[#allocation2 + $0xa4] sm:$0x1] %v1318_v49  ;;  %v7488_v24 = vsel %vm6283_vm4, %v6579_v12, %v6535_v13  ;;  %v6740_v23 = vrot.slane %v2474_v50, 4  ;;  %4962 = vmatprep.mubr.msk.bf16.mxu1 %vm1459_vm1, %v5526_v52  ;;  %v2494_v63 = vrot.slane %v2492_v7, 4 }
  0xf6   : > { %1326 = vst [vmem:[#allocation2 + $0xb0] sm:$0x1] %v1325_v8  ;;  %v6735_v22 = vcombine.low %v7488_v24, %v2346_v60  ;;  %v2367_v35 = vshll.u32 %v6720_v39, 16  ;;  %v2497_v26 = vrot.slane %v2495_v58, 5  ;;  %v2501_v8 = vshll.u32 %v6726_v11, 16 }
  0xf7   : > { %v3357_v49 = vrot.slane %v6366_v17, 5  ;;  %v1169_v25 = vpop.permute.xlu0 %1168  ;;  %v2456_v13 = vsel %vm6283_vm4, %v6714_v21, %v6667_v30  ;;  %v2505_v12 = vshrl.u32 %v6726_v11, 16  ;;  %v4624_v19 = vrot.slane %v6698_v56, 9  ;;  %v3249_v21 = vld [vmem:[#allocation2 + $0x84] sm:$0xe] }
  0xf8   : > { %v1175_v1 = vpop.permute.xlu1 %1174  ;;  %v2369_v33 = vrot.slane %v2367_v35, 5  ;;  %v1332_v52 = vsel %vm6202_vm14, %v1169_v25, %v1331_v46  ;;  %v6755_v50 = vld [vmem:[#allocation2 + $0x8c] sm:$0x1]  ;;  %v2484_v7 = vor.u32 %v6724_v3, %v6722_v32  ;;  %v3360_v58 = vrot.slane %v6401_v4, 5  ;;  %v3245_v46 = vld [vmem:[#allocation2 + $0x54] sm:$0xe]  ;;  %5111 = vmatmul.mubr.msk.bf16.gmra.mrb[12].mxu0 %vm1459_vm1, %v6735_v22 }
  0xf9   : > { %v1339_v60 = vsel %vm6202_vm14, %v1175_v1, %v1338_v10  ;;  %v6757_v17 = vld [vmem:[#allocation2 + $0x98] sm:$0x1]  ;;  %1333 = vst [vmem:[#allocation2 + $0xbc] sm:$0x1] %v1332_v52  ;;  %v2391_v1 = vshll.u32 %v6755_v50, 16  ;;  %v7489_v4 = vsel %vm6283_vm4, %v6611_v6, %v6539_v9  ;;  %v3359_v10 = vrot.slane %v3357_v49, 4 }
  0xfa   : > { %1340 = vst [vmem:[#allocation2 + $0xc8] sm:$0x1] %v1339_v60  ;;  %v2370_v56 = vsel %vm6283_vm4, %v6594_v43, %v2369_v33  ;;  %v2415_v5 = vshll.u32 %v6757_v17, 16  ;;  %v2498_v43 = vor.u32 %v2497_v26, %v2494_v63  ;;  %v6780_v33 = vrot.slane %v2501_v8, 5  ;;  %v6786_v25 = vld [vmem:[%s7398_s2 + $0x4] sm:$0xf] }
  0xfb   : > { %v6778_v3 = vcombine.low %v7489_v4, %v2370_v56  ;;  %v2393_v24 = vrot.slane %v2391_v1, 5  ;;  %v2507_v60 = vrot.slane %v2505_v12, 4  ;;  %v3364_v52 = vrot.slane %v6427_v38, 5  ;;  %v5528_v12 = vld [vmem:[#allocation2 + $0xc] sm:$0xff]  }
  0xfc   : > { %v2417_v35 = vrot.slane %v2415_v5, 5  ;;  %v6790_v9 = vld [vmem:[#allocation2 + $0xa4] sm:$0x1]  ;;  %v3358_v63 = vsel %vm6296_vm6, %v4624_v19, %v3357_v49  ;;  %v3361_v26 = vsel %vm6296_vm6, %v3359_v10, %v3360_v58  ;;  %v4625_v8 = vrot.slane %v3245_v46, 9  ;;  %4963 = vmatmul.mubr.msk.bf16.vlgmr.msra.gmra.mrb[0].mxu1 %vm1459_vm1, %v5528_v12  ;;  %v3246_v19 = vld [vmem:[#allocation2 + $0x60] sm:$0xe] }
  0xfd   : > { %5114 = vmatprep.mubr.msk.bf16.mxu0 %vm1459_vm1, %v6778_v3  ;;  %v6792_v6 = vld [vmem:[#allocation2 + $0xb0] sm:$0x1]  ;;  %v3367_v38 = vrot.slane %v6468_v45, 5  ;;  %v2394_v56 = vsel %vm6283_vm4, %v6639_v0, %v2393_v24  ;;  %v2439_v5 = vshll.u32 %v6790_v9, 16  ;;  %v6808_v58 = vld [vmem:[#allocation2 + $0x18] sm:$0xff]   ;;  %4995 = vmatpush3.bf16.msra.mxu1 %v6463_v16  ;;  %v7490_v45 = vsel %vm6283_vm4, %v6633_v41, %v6581_v47 }
  0xfe   : > { %v2418_v1 = vsel %vm6283_vm4, %v6688_v51, %v2417_v35  ;;  %v2463_v49 = vshll.u32 %v6792_v6, 16  ;;  %4966 = vmatprep.mubr.msk.bf16.mxu1 %vm1459_vm1, %v6808_v58  ;;  %v6818_v0 = vcombine.low %v7490_v45, %v2394_v56  ;;  %v6820_v51 = vrot.slane %v2498_v43, 4  ;;  %5493 = vmatprep.subr.msk.bf16.mxu1 %vm1508_vm10, %v6786_v25 }
  0xff   : > { %v6822_v46 = vcombine.low %v3358_v63, %v3361_v26  ;;  %v3366_v4 = vrot.slane %v3364_v52, 4  ;;  %v7491_v10 = vsel %vm6283_vm4, %v6653_v14, %v6620_v28  ;;  %v2441_v16 = vrot.slane %v2439_v5, 5  ;;  %v3247_v5 = vld [vmem:[#allocation2 + $0x6c] sm:$0xe] }
 0x100   : > { %v6829_v24 = vcombine.low %v7491_v10, %v2418_v1  ;;  %v2465_v35 = vrot.slane %v2463_v49, 5  ;;  %v2508_v12 = vor.u32 %v2507_v60, %v6780_v33  ;;  %v6834_v41 = vld [vmem:[#allocation2 + $0xbc] sm:$0x1]  ;;  %v3365_v43 = vsel %vm6296_vm6, %v4625_v8, %v3364_v52  ;;  %v3248_v52 = vld [vmem:[#allocation2 + $0x78] sm:$0xe]  ;;  %5115 = vmatmul.mubr.msk.bf16.gmra.mrb[16].mxu0 %vm1459_vm1, %v6818_v0 }
 0x101   : > { %v6836_v47 = vld [vmem:[#allocation2 + $0xc8] sm:$0x1]  ;;  %v3368_v63 = vsel %vm6296_vm6, %v3366_v4, %v3367_v38  ;;  %v4626_v28 = vrot.slane %v3246_v19, 9  ;;  %v3371_v14 = vrot.slane %v6437_v34, 5  ;;  %v2442_v60 = vsel %vm6283_vm4, %v6712_v55, %v2441_v16 }
 0x102   : > { %v2466_v26 = vsel %vm6283_vm4, %v6738_v40, %v2465_v35  ;;  %v2487_v56 = vshll.u32 %v6834_v41, 16  ;;  %v3374_v1 = vrot.slane %v6470_v2, 5  ;;  %v6853_v8 = vrot.slane %v2484_v7, 4  ;;  %5118 = vmatprep.mubr.msk.bf16.mxu0 %vm1459_vm1, %v6829_v24  ;;  %v6883_v35 = vld [vmem:[#allocation2 + $0x24] sm:$0xff]  }
 0x103   : > { %v2504_v34 = vsel %vm6283_vm4, %v6820_v51, %v6780_v33  ;;  %v2511_v55 = vshll.u32 %v6836_v47, 16  ;;  %v6860_v38 = vcombine.low %v3365_v43, %v3368_v63  ;;  %v7492_v2 = vsel %vm6283_vm4, %v6676_v54, %v6647_v44  ;;  %v6893_v43 = vld [vmem:[#allocation2 + $0x30] sm:$0xff]  }
 0x104   : > { %v6869_v40 = vcombine.low %v7492_v2, %v2442_v60  ;;  %v6871_v7 = vrot.slane %v2487_v56, 5  ;;  %v6873_v49 = vrot.slane %v2508_v12, 4  ;;  %v3373_v19 = vrot.slane %v3371_v14, 4  ;;  %4967 = vmatmul.mubr.msk.bf16.gmra.mrb[4].mxu1 %vm1459_vm1, %v6883_v35 }
 0x105   : > { %v6880_v45 = vcombine.low %v2456_v13, %v2466_v26  ;;  %v4627_v4 = vrot.slane %v3247_v5, 9  ;;  %v3378_v10 = vrot.slane %v6500_v61, 5  ;;  %v4628_v16 = vrot.slane %v3248_v52, 9  ;;  %v3250_v13 = vld [vmem:[#allocation2 + $0x90] sm:$0xe]  ;;  %4970 = vmatprep.mubr.msk.bf16.mxu1 %vm1459_vm1, %v6893_v43 }
 0x106   : > { %v3372_v54 = vsel %vm6296_vm6, %v4626_v28, %v3371_v14  ;;  %v3375_v44 = vsel %vm6296_vm6, %v3373_v19, %v3374_v1  ;;  %v3381_v12 = vrot.slane %v6661_v27, 5  ;;  %v3385_v30 = vrot.slane %v6527_v42, 5 }
 0x107   : > { %v2490_v61 = vsel %vm6283_vm4, %v6853_v8, %v6871_v7  ;;  %v2513_v63 = vrot.slane %v2511_v55, 5  ;;  %v6901_v28 = vcombine.low %v3372_v54, %v3375_v44  ;;  %v3379_v27 = vsel %vm6296_vm6, %v4627_v4, %v3378_v10  ;;  %v3251_v8 = vld [vmem:[#allocation2 + $0x9c] sm:$0xe]  ;;  %v3252_v4 = vld [vmem:[#allocation2 + $0xa8] sm:$0xe] }
 0x108   : > { %v3380_v14 = vrot.slane %v3378_v10, 4  ;;  %v3386_v42 = vsel %vm6296_vm6, %v4628_v16, %v3385_v30  ;;  %v3387_v60 = vrot.slane %v3385_v30, 4  ;;  %v3388_v26 = vrot.slane %v6720_v39, 5  ;;  %5119 = vmatmul.mubr.msk.bf16.gmra.mrb[20].mxu0 %vm1459_vm1, %v6869_v40 }
 0x109   : > { %v4629_v56 = vrot.slane %v3249_v21, 9  ;;  %v3392_v1 = vrot.slane %v6554_v57, 5  ;;  %v3395_v5 = vrot.slane %v6755_v50, 5  ;;  %v4630_v52 = vrot.slane %v3250_v13, 9  ;;  %5122 = vmatprep.mubr.msk.bf16.mxu0 %vm1459_vm1, %v6880_v45  ;;  %v3253_v21 = vld [vmem:[#allocation2 + $0xb4] sm:$0xe] }
 0x10a   : > { %v3382_v55 = vsel %vm6296_vm6, %v3380_v14, %v3381_v12  ;;  %v3389_v2 = vsel %vm6296_vm6, %v3387_v60, %v3388_v26  ;;  %v3399_v7 = vrot.slane %v6589_v37, 5  ;;  %v3402_v19 = vrot.slane %v6757_v17, 5  ;;  %v6934_v13 = vld [vmem:[#allocation2 + $0x3c] sm:$0xff]  }
 0x10b   : > { %v2514_v39 = vsel %vm6283_vm4, %v6873_v49, %v2513_v63  ;;  %v6921_v57 = vcombine.low %v3379_v27, %v3382_v55  ;;  %v6923_v50 = vcombine.low %v3386_v42, %v3389_v2  ;;  %v3394_v10 = vrot.slane %v3392_v1, 4  ;;  %v3254_v2 = vld [vmem:[#allocation2 + $0xc0] sm:$0xe] }
 0x10c   : > { %v3393_v37 = vsel %vm6296_vm6, %v4629_v56, %v3392_v1  ;;  %v3401_v17 = vrot.slane %v3399_v7, 4  ;;  %v4631_v16 = vrot.slane %v3251_v8, 9  ;;  %v3406_v54 = vrot.slane %v6614_v53, 5  ;;  %4971 = vmatmul.mubr.msk.bf16.gmra.mrb[8].mxu1 %vm1459_vm1, %v6934_v13 }
 0x10d   : > { %v3396_v44 = vsel %vm6296_vm6, %v3394_v10, %v3395_v5  ;;  %v3409_v49 = vrot.slane %v6790_v9, 5  ;;  %v4632_v12 = vrot.slane %v3252_v4, 9  ;;  %v3413_v30 = vrot.slane %v6624_v29, 5  ;;  %4974 = vmatprep.mubr.msk.bf16.mxu1 %vm1459_vm1, %v6377_v62  ;;  %v7500_v10 = vld [vmem:[#allocation26_spill] sm:$0xff] }
 0x10e   : > { %v6938_v63 = vcombine.low %v3393_v37, %v3396_v44  ;;  %v3400_v27 = vsel %vm6296_vm6, %v4630_v52, %v3399_v7  ;;  %v3403_v53 = vsel %vm6296_vm6, %v3401_v17, %v3402_v19  ;;  %v3408_v14 = vrot.slane %v3406_v54, 4  ;;  %v7494_v19 = vld [vmem:[#allocation17_spill] sm:$0xff] }
 0x10f   : > { %v6946_v9 = vcombine.low %v3400_v27, %v3403_v53  ;;  %v3407_v29 = vsel %vm6296_vm6, %v4631_v16, %v3406_v54  ;;  %v3415_v42 = vrot.slane %v3413_v30, 4  ;;  %v3416_v60 = vrot.slane %v6792_v6, 5  ;;  %v7501_v16 = vld [vmem:[#allocation10_spill] sm:$0xff]  ;;  %v7502_v44 = vld [vmem:[#allocation13_spill] sm:$0xff]  ;;  %v7503_v53 = vld [vmem:[#allocation15_spill] sm:$0xff] }
 0x110   : > { %v3410_v26 = vsel %vm6296_vm6, %v3408_v14, %v3409_v49  ;;  %v4633_v56 = vrot.slane %v3253_v21, 9  ;;  %v3420_v1 = vrot.slane %v6684_v20, 5  ;;  %v3423_v5 = vrot.slane %v6834_v41, 5  ;;  %v7505_v14 = vld [vmem:[#allocation24_spill] sm:$0xff] }
 0x111   : > { %v7493_v62 = vsel %vm6283_vm4, %v6740_v23, %v6722_v32  ;;  %v6962_v8 = vcombine.low %v3407_v29, %v3410_v26  ;;  %v3414_v6 = vsel %vm6296_vm6, %v4632_v12, %v3413_v30  ;;  %v3417_v55 = vsel %vm6296_vm6, %v3415_v42, %v3416_v60  ;;  %v3935_v42 = vld [vmem:[%s7398_s2 + $0x20] sm:$0xf]  ;;  %v7507_v26 = vld [vmem:[#allocation9_spill] sm:$0xff] }
 0x112   : > { %v6960_v52 = vcombine.low %v7493_v62, %v2490_v61  ;;  %v6973_v20 = vcombine.low %v2504_v34, %v2514_v39  ;;  %v6975_v41 = vcombine.low %v3414_v6, %v3417_v55  ;;  %v3422_v32 = vrot.slane %v3420_v1, 4  ;;  %v7506_v60 = vld [vmem:[#allocation4_spill] sm:$0xff]  ;;  %v7511_v62 = vld [vmem:[#allocation23_spill] sm:$0xff] }
 0x113   : > { %v2528_v23 = vsel %vm6283_vm4, %v6476_v18, %v6249_v31  ;;  %v2538_v61 = vsel %vm6283_vm4, %v6482_v48, %v6486_v15  ;;  %v3421_v33 = vsel %vm6296_vm6, %v4633_v56, %v3420_v1  ;;  %v4634_v34 = vrot.slane %v3254_v2, 9  ;;  %v7496_v31 = vld [vmem:[#allocation18_spill] sm:$0xff]  ;;  %v7498_v48 = vld [vmem:[#allocation21_spill] sm:$0xff]  ;;  %v7512_v6 = vld [vmem:[#allocation27_spill] sm:$0xff] }
 0x114   : > { %5123 = vmatmul.mubr.msk.bf16.gmra.mrb[24].mxu0 %vm1459_vm1, %v6960_v52  ;;  %v3424_v51 = vsel %vm6296_vm6, %v3422_v32, %v3423_v5  ;;  %v3427_v7 = vrot.slane %v6726_v11, 5  ;;  %v7495_v4 = vrot.slane %v7494_v19, 5  ;;  %v7497_v18 = vrot.slane %v7496_v31, 9  ;;  %4975 = vmatmul.mubr.msk.bf16.gmra.mrb[12].mxu1 %vm1459_vm1, %v7501_v16  ;;  %v7508_v56 = vld [vmem:[#allocation22_spill] sm:$0xff]  ;;  %v7509_v1 = vld [vmem:[#allocation25_spill] sm:$0xff]  ;;  %v7513_v55 = vld [vmem:[#allocation28_spill] sm:$0xff] }
 0x115   : > { %5126 = vmatprep.mubr.msk.bf16.mxu0 %vm1459_vm1, %v6973_v20  ;;  %v7499_v15 = vrot.slane %v7498_v48, 5  ;;  %v7005_v17 = vcombine.low %v3421_v33, %v3424_v51  ;;  %v3430_v11 = vrot.slane %v6836_v47, 5  ;;  %4978 = vmatprep.mubr.msk.bf16.mxu1 %vm1459_vm1, %v7502_v44  ;;  %v4601_v49 = vcombine.low %v2528_v23, %v2538_v61  ;;  %v7504_v47 = vld [vmem:[#allocation20_spill] sm:$0xff]  ;;  %v7510_v5 = vld [vmem:[#allocation14_spill] sm:$0xff]  ;;  %v7515_v32 = vld [vmem:[#allocation29_spill] sm:$0xff] }
 0x116   : > { %v3316_v39 = vsel %vm6296_vm6, %v7497_v18, %v7495_v4  ;;  %v3429_v54 = vrot.slane %v3427_v7, 4  ;;  %v3428_v30 = vsel %vm6296_vm6, %v4634_v34, %v3427_v7  ;;  %v3740_v29 = vsel %vm1508_vm10, %v7505_v14, 0  ;;  %v7514_v2 = vld [vmem:[#allocation30_spill] sm:$0xff]  ;;  %v7523_v14 = vld [vmem:[#allocation12_spill] sm:$0xff] }
 0x117   : > { %v3319_v37 = vsel %vm6296_vm6, %v7500_v10, %v7499_v15  ;;  %v2637_v23 = vsel %vm1508_vm10, %v6786_v25, 0  ;;  %v5534_v25 = vld [vmem:[#allocation2 + $0x48] sm:$0xff]   ;;  %v2117_v33 = vshll.u32 %v7494_v19, 16  ;;  %v2121_v51 = vshrl.u32 %v7494_v19, 16 }
 0x118   : > { %v4636_v12 = vcombine.low %v3316_v39, %v3319_v37  ;;  %v3431_v21 = vsel %vm6296_vm6, %v3429_v54, %v3430_v11  ;;  %v3943_v34 = vsel %vm1508_vm10, %v3935_v42, 0  ;;  %v2127_v15 = vshll.u32 %v7498_v48, 16  ;;  %v7516_v54 = vld [vmem:[#allocation31_spill] sm:$0xff] }
 0x119   : > { %v7016_v27 = vcombine.low %v3428_v30, %v3431_v21  ;;  %v2119_v31 = vrot.slane %v2117_v33, 5  ;;  %v2123_v18 = vrot.slane %v2121_v51, 4  ;;  %v7519_v30 = vld [vmem:[#allocation3_spill] sm:$0xff] }
 0x11a   : > { %v2129_v16 = vrot.slane %v2127_v15, 5  ;;  %v7520_v21 = vld [vmem:[#allocation7_spill] sm:$0xff] }
 0x11b   : > { %v2124_v39 = vor.u32 %v2123_v18, %v2119_v31 }
 0x11c   : > { %5127 = vmatmul.mubr.msk.bf16.gmra.mrb[28].mxu0 %vm1459_vm1, %v4601_v49  ;;  %4979 = vmatmul.mubr.msk.bf16.gmra.mrb[16].mxu1 %vm1459_vm1, %v7503_v53 }
 0x11d   : > { %5132 = vmatprep.mubr.msk.bf16.mxu0 %vm1459_vm1, %v4636_v12  ;;  %4982 = vmatprep.mubr.msk.bf16.mxu1 %vm1459_vm1, %v7504_v47  ;;  %v2125_v37 = vrot.slane %v2124_v39, 4  ;;  %v7518_v12 = vld [vmem:[#allocation5_spill] sm:$0xff] }
 0x11f   : > { %v2130_v48 = vsel %vm6283_vm4, %v2125_v37, %v2129_v16 }
 0x124   : > { %5133 = vmatmul.mubr.msk.bf16.vlgmr.msra.gmra.mrb[0].mxu0 %vm1459_vm1, %v7506_v60  ;;  %4983 = vmatmul.mubr.msk.bf16.gmra.mrb[20].mxu1 %vm1459_vm1, %v7508_v56 }
 0x125   : > { %5165 = vmatpush3.bf16.msra.mxu0 %v3740_v29  ;;  %5136 = vmatprep.mubr.msk.bf16.mxu0 %vm1459_vm1, %v7507_v26  ;;  %v7524_v29 = vld [vmem:[#allocation16_spill] sm:$0xff] }
 0x126   : > { %5499 = vmatprep.subr.msk.bf16.mxu0 %vm1508_vm10, %v3935_v42  ;;  %4986 = vmatprep.mubr.msk.bf16.mxu1 %vm1459_vm1, %v7509_v1  ;;  %v7525_v42 = vld [vmem:[#allocation19_spill] sm:$0xff] }
 0x12c   : > { %5137 = vmatmul.mubr.msk.bf16.gmra.mrb[4].mxu0 %vm1459_vm1, %v7510_v5  ;;  %4987 = vmatmul.mubr.msk.bf16.gmra.mrb[24].mxu1 %vm1459_vm1, %v7512_v6 }
 0x12d   : > { %5140 = vmatprep.mubr.msk.bf16.mxu0 %vm1459_vm1, %v7511_v62  ;;  %4990 = vmatprep.mubr.msk.bf16.mxu1 %vm1459_vm1, %v7513_v55 }
 0x134   : > { %5141 = vmatmul.mubr.msk.bf16.gmra.mrb[8].mxu0 %vm1459_vm1, %v7514_v2  ;;  %4991 = vmatmul.mubr.msk.bf16.gmra.mrb[28].mxu1 %vm1459_vm1, %v7515_v32 }
 0x135   : > { %5144 = vmatprep.mubr.msk.bf16.mxu0 %vm1459_vm1, %v6822_v46  ;;  %4996 = vmatprep.mubr.msk.bf16.mxu1 %vm1459_vm1, %v6808_v58  ;;  %v5533_v58 = vld [vmem:[%s7398_s2 + $0x10] sm:$0xf] }
 0x13c   : > { %5145 = vmatmul.mubr.msk.bf16.gmra.mrb[12].mxu0 %vm1459_vm1, %v6860_v38  ;;  %4997 = vmatmul.mubr.msk.bf16.vlgmr.msra.gmra.mrb[0].mxu1 %vm1459_vm1, %v6883_v35  ;;  %v5535_v35 = vld [vmem:[#allocation2 + $0x54] sm:$0xff]  }
 0x13d   : > { %5148 = vmatprep.mubr.msk.bf16.mxu0 %vm1459_vm1, %v6901_v28  ;;  %5000 = vmatprep.mubr.msk.bf16.mxu1 %vm1459_vm1, %v6893_v43  ;;  %v2050_v43 = vld [vmem:[#allocation2] sm:$0xf] }
 0x13e   : > { %5029 = vmatpush3.bf16.msra.mxu1 %v2637_v23  ;;  %v2111_v61 = vshll.u32 %v2050_v43, 16  ;;  %v7250_v23 = vld [vmem:[%s7400_s4] ss:$0 sm:$0xff] }
 0x13f   : > { %5495 = vmatprep.subr.msk.bf16.mxu1 %vm1508_vm10, %v5533_v58 }
 0x140   : > { %v2113_v4 = vrot.slane %v2111_v61, 5 }
 0x144   : > { %5149 = vmatmul.mubr.msk.bf16.gmra.mrb[16].mxu0 %vm1459_vm1, %v6921_v57  ;;  %5001 = vmatmul.mubr.msk.bf16.gmra.mrb[4].mxu1 %vm1459_vm1, %v6934_v13  ;;  %v2108_v13 = vshrl.u32 %v2050_v43, 16 }
 0x145   : > { %5152 = vmatprep.mubr.msk.bf16.mxu0 %vm1459_vm1, %v6923_v50  ;;  %5004 = vmatprep.mubr.msk.bf16.mxu1 %vm1459_vm1, %v5534_v25 }
 0x146   : > { %v2110_v7 = vrot.slane %v2108_v13, 4 }
 0x148   : > { %v2114_v19 = vor.u32 %v2113_v4, %v2110_v7 }
 0x14a   : > { %v2115_v10 = vrot.slane %v2114_v19, 4 }
 0x14c   : > { %5153 = vmatmul.mubr.msk.bf16.gmra.mrb[20].mxu0 %vm1459_vm1, %v6938_v63  ;;  %5005 = vmatmul.mubr.msk.bf16.gmra.mrb[8].mxu1 %vm1459_vm1, %v5535_v35  ;;  %v2120_v11 = vsel %vm6283_vm4, %v2115_v10, %v2119_v31 }
 0x14d   : > { %5156 = vmatprep.mubr.msk.bf16.mxu0 %vm1459_vm1, %v6946_v9  ;;  %5008 = vmatprep.mubr.msk.bf16.mxu1 %vm1459_vm1, %v7502_v44  ;;  %v5527_v44 = vld [vmem:[#allocation2 + $0xcc] sm:$0xff]   ;;  %v4552_v49 = vcombine.low %v2120_v11, %v2130_v48 }
 0x154   : > { %5157 = vmatmul.mubr.msk.bf16.gmra.mrb[24].mxu0 %vm1459_vm1, %v6962_v8  ;;  %5009 = vmatmul.mubr.msk.bf16.gmra.mrb[12].mxu1 %vm1459_vm1, %v7503_v53  ;;  %v7521_v53 = vld [vmem:[#allocation8_spill] sm:$0xff] }
 0x155   : > { %5160 = vmatprep.mubr.msk.bf16.mxu0 %vm1459_vm1, %v6975_v41  ;;  %5012 = vmatprep.mubr.msk.bf16.mxu1 %vm1459_vm1, %v7504_v47  ;;  %v7522_v47 = vld [vmem:[#allocation11_spill] sm:$0xff] }
 0x15c   : > { %5161 = vmatmul.mubr.msk.bf16.gmra.mrb[28].mxu0 %vm1459_vm1, %v7005_v17  ;;  %5013 = vmatmul.mubr.msk.bf16.gmra.mrb[16].mxu1 %vm1459_vm1, %v7508_v56 }
 0x15d   : > { %5166 = vmatprep.mubr.msk.bf16.mxu0 %vm1459_vm1, %v7506_v60  ;;  %5016 = vmatprep.mubr.msk.bf16.mxu1 %vm1459_vm1, %v7509_v1 }
 0x164   : > { %5167 = vmatmul.mubr.msk.bf16.vlgmr.msra.gmra.mrb[0].mxu0 %vm1459_vm1, %v7507_v26  ;;  %5017 = vmatmul.mubr.msk.bf16.gmra.mrb[20].mxu1 %vm1459_vm1, %v7512_v6 }
 0x165   : > { %5199 = vmatpush3.bf16.msra.mxu0 %v3943_v34  ;;  %5170 = vmatprep.mubr.msk.bf16.mxu0 %vm1459_vm1, %v7510_v5 }
 0x166   : > { %5020 = vmatprep.mubr.msk.bf16.mxu1 %vm1459_vm1, %v7513_v55  ;;  %v7245_v55 = vld [vmem:[%s7399_s3] ss:$0 sm:$0xff] }
 0x16c   : > { %5171 = vmatmul.mubr.msk.bf16.gmra.mrb[4].mxu0 %vm1459_vm1, %v7511_v62  ;;  %5021 = vmatmul.mubr.msk.bf16.gmra.mrb[24].mxu1 %vm1459_vm1, %v7515_v32 }
 0x16d   : > { %5174 = vmatprep.mubr.msk.bf16.mxu0 %vm1459_vm1, %v7514_v2  ;;  %5024 = vmatprep.mubr.msk.bf16.mxu1 %vm1459_vm1, %v7516_v54 }
 0x174   : > { %5175 = vmatmul.mubr.msk.bf16.gmra.mrb[8].mxu0 %vm1459_vm1, %v6822_v46  ;;  %5025 = vmatmul.mubr.msk.bf16.gmra.mrb[28].mxu1 %vm1459_vm1, %v5527_v44 }
 0x175   : > { %5178 = vmatprep.mubr.msk.bf16.mxu0 %vm1459_vm1, %v6860_v38  ;;  %5030 = vmatprep.mubr.msk.bf16.mxu1 %vm1459_vm1, %v4552_v49 }
 0x17c   : > { %5179 = vmatmul.mubr.msk.bf16.gmra.mrb[12].mxu0 %vm1459_vm1, %v6901_v28  ;;  %5031 = vmatmul.mubr.msk.bf16.vlgmr.msra.gmra.mrb[0].mxu1 %vm1459_vm1, %v7517_v59 }
 0x17d   : > { %5182 = vmatprep.mubr.msk.bf16.mxu0 %vm1459_vm1, %v6921_v57  ;;  %5034 = vmatprep.mubr.msk.bf16.mxu1 %vm1459_vm1, %v7518_v12 }
 0x17e   : > { %5233 = vmatpush3.bf16.msra.mxu1 %v7519_v30 }
 0x184   : > { %5183 = vmatmul.mubr.msk.bf16.gmra.mrb[16].mxu0 %vm1459_vm1, %v6923_v50  ;;  %5035 = vmatmul.mubr.msk.bf16.gmra.mrb[4].mxu1 %vm1459_vm1, %v7520_v21 }
 0x185   : > { %5186 = vmatprep.mubr.msk.bf16.mxu0 %vm1459_vm1, %v6938_v63  ;;  %5038 = vmatprep.mubr.msk.bf16.mxu1 %vm1459_vm1, %v7521_v53 }
 0x18c   : > { %5187 = vmatmul.mubr.msk.bf16.gmra.mrb[20].mxu0 %vm1459_vm1, %v6946_v9  ;;  %5039 = vmatmul.mubr.msk.bf16.gmra.mrb[8].mxu1 %vm1459_vm1, %v7522_v47 }
 0x18d   : > { %5190 = vmatprep.mubr.msk.bf16.mxu0 %vm1459_vm1, %v6962_v8  ;;  %5042 = vmatprep.mubr.msk.bf16.mxu1 %vm1459_vm1, %v7523_v14 }
 0x194   : > { %5191 = vmatmul.mubr.msk.bf16.gmra.mrb[24].mxu0 %vm1459_vm1, %v6975_v41  ;;  %5043 = vmatmul.mubr.msk.bf16.gmra.mrb[12].mxu1 %vm1459_vm1, %v7524_v29 }
 0x195   : > { %5194 = vmatprep.mubr.msk.bf16.mxu0 %vm1459_vm1, %v7005_v17  ;;  %5046 = vmatprep.mubr.msk.bf16.mxu1 %vm1459_vm1, %v7525_v42 }
 0x19c   : > { %5195 = vmatmul.mubr.msk.bf16.gmra.mrb[28].mxu0 %vm1459_vm1, %v7016_v27  ;;  %5047 = vmatmul.mubr.msk.bf16.gmra.mrb[16].mxu1 %vm1459_vm1, %v6735_v22 }
 0x19d   : > { %5200 = vmatprep.mubr.msk.bf16.mxu0 %vm1459_vm1, %v7507_v26  ;;  %5050 = vmatprep.mubr.msk.bf16.mxu1 %vm1459_vm1, %v6778_v3 }
 0x1a4   : > { %5201 = vmatmul.mubr.msk.bf16.vlgmr.msra.gmra.mrb[0].mxu0 %vm1459_vm1, %v7510_v5  ;;  %5051 = vmatmul.mubr.msk.bf16.gmra.mrb[20].mxu1 %vm1459_vm1, %v6818_v0 }
 0x1a5   : > { %5204 = vmatprep.mubr.msk.bf16.mxu0 %vm1459_vm1, %v7511_v62  ;;  %5054 = vmatprep.mubr.msk.bf16.mxu1 %vm1459_vm1, %v6829_v24 }
 0x1ac   : > { %5205 = vmatmul.mubr.msk.bf16.gmra.mrb[4].mxu0 %vm1459_vm1, %v7514_v2  ;;  %5055 = vmatmul.mubr.msk.bf16.gmra.mrb[24].mxu1 %vm1459_vm1, %v6869_v40 }
 0x1ad   : > { %5208 = vmatprep.mubr.msk.bf16.mxu0 %vm1459_vm1, %v6822_v46  ;;  %5058 = vmatprep.mubr.msk.bf16.mxu1 %vm1459_vm1, %v6880_v45 }
 0x1b4   : > { %5209 = vmatmul.mubr.msk.bf16.gmra.mrb[8].mxu0 %vm1459_vm1, %v6860_v38  ;;  %5059 = vmatmul.mubr.msk.bf16.gmra.mrb[28].mxu1 %vm1459_vm1, %v6960_v52  ;;  %v5537_v38 = vld [vmem:[#allocation2 + $0xd4] sm:$0x1] }
 0x1b5   : > { %5212 = vmatprep.mubr.msk.bf16.mxu0 %vm1459_vm1, %v6901_v28  ;;  %5080 = vmatprep.mubr.msk.bf16.mxu1 %vm1459_vm1, %v6735_v22  ;;  %v5536_v22 = vld [vmem:[#allocation2 + $0xd0] sm:$0xf]  ;;  %v3437_v28 = vrot.slane %v5537_v38, 5 }
 0x1bc   : > { %5213 = vmatmul.mubr.msk.bf16.gmra.mrb[12].mxu0 %vm1459_vm1, %v6921_v57  ;;  %5081 = vmatmul.mubr.msk.bf16.vlgmr.msra.gmra.mrb[16].mxu1 %vm1459_vm1, %v6778_v3  ;;  %v3434_v3 = vrot.slane %v5536_v22, 5 }
 0x1bd   : > { %5216 = vmatprep.mubr.msk.bf16.mxu0 %vm1459_vm1, %v6923_v50  ;;  %5084 = vmatprep.mubr.msk.bf16.mxu1 %vm1459_vm1, %v6818_v0  ;;  %v3255_v0 = vld [vmem:[#allocation2 + $0xcc] sm:$0xe] }
 0x1be   : > { %v4635_v46 = vrot.slane %v3255_v0, 9 }
 0x1c4   : > { %5217 = vmatmul.mubr.msk.bf16.gmra.mrb[16].mxu0 %vm1459_vm1, %v6938_v63  ;;  %5085 = vmatmul.mubr.msk.bf16.gmra.mrb[20].mxu1 %vm1459_vm1, %v6829_v24  ;;  %v3436_v24 = vrot.slane %v3434_v3, 4 }
 0x1c5   : > { %5220 = vmatprep.mubr.msk.bf16.mxu0 %vm1459_vm1, %v6946_v9  ;;  %5088 = vmatprep.mubr.msk.bf16.mxu1 %vm1459_vm1, %v6869_v40  ;;  %v3435_v40 = vsel %vm6296_vm6, %v4635_v46, %v3434_v3 }
 0x1c6   : > { %v3438_v57 = vsel %vm6296_vm6, %v3436_v24, %v3437_v28 }
 0x1cc   : > { %5221 = vmatmul.mubr.msk.bf16.gmra.mrb[20].mxu0 %vm1459_vm1, %v6962_v8  ;;  %5089 = vmatmul.mubr.msk.bf16.gmra.mrb[24].mxu1 %vm1459_vm1, %v6880_v45  ;;  %v4685_v45 = vcombine.low %v3435_v40, %v3438_v57 }
 0x1cd   : > { %5224 = vmatprep.mubr.msk.bf16.mxu0 %vm1459_vm1, %v6975_v41  ;;  %5092 = vmatprep.mubr.msk.bf16.mxu1 %vm1459_vm1, %v6960_v52 }
 0x1d4   : > { %5225 = vmatmul.mubr.msk.bf16.gmra.mrb[24].mxu0 %vm1459_vm1, %v7005_v17  ;;  %5093 = vmatmul.mubr.msk.bf16.gmra.mrb[28].mxu1 %vm1459_vm1, %v6973_v20 }
 0x1d5   : > { %5228 = vmatprep.mubr.msk.bf16.mxu0 %vm1459_vm1, %v7016_v27 }
 0x1dc   : > { %5229 = vmatmul.mubr.msk.bf16.gmra.mrb[28].mxu0 %vm1459_vm1, %v4685_v45 }
 0x24f   : > { %v5032_v50 = vpop.f32.mrb[0].mxu1 }
 0x250   : > { %v2673_v63 = vpop.f32.mrb[1].mxu1 }
 0x251   : > { %v5033_v9 = vpop.f32.mrb[2].mxu1 }
 0x252   : > { %v2676_v52 = vpop.f32.mrb[3].mxu1 }
 0x257   : > { %v5036_v8 = vpop.f32.mrb[4].mxu1 }
 0x258   : > { %v2689_v41 = vpop.f32.mrb[5].mxu1 }
 0x259   : > { %v5037_v17 = vpop.f32.mrb[6].mxu1 }
 0x25a   : > { %v2692_v27 = vpop.f32.mrb[7].mxu1 }
 0x25f   : > { %v5040_v60 = vpop.f32.mrb[8].mxu1 }
 0x260   : > { %v7228_v26 = vpop.f32.mrb[9].mxu1 }
 0x261   : > { %v7230_v56 = vpop.f32.mrb[10].mxu1 }
 0x262   : > { %v7232_v36 = vpop.f32.mrb[11].mxu1 }
 0x267   : > { %v7234_v1 = vpop.f32.mrb[12].mxu1 }
 0x268   : > { %v7236_v20 = vpop.f32.mrb[13].mxu1 }
 0x269   : > { %v7238_v5 = vpop.f32.mrb[14].mxu1 }
 0x26a   : > { %v7240_v62 = vpop.f32.mrb[15].mxu1 }
 0x277   : > { %v5202_v6 = vpop.f32.mrb[0].mxu0 }
 0x278   : > { %v5234_v2 = vadd.f32 %v5202_v6, %v5032_v50  ;;  %v3979_v32 = vpop.f32.mrb[1].mxu0 }
 0x279   : > { %v5235_v58 = vadd.f32 %v3979_v32, %v2673_v63  ;;  %v5203_v25 = vpop.f32.mrb[2].mxu0 }
 0x27a   : > { %v4147_v35 = vmul.f32 %v5234_v2, %v7245_v55  ;;  %v5236_v43 = vadd.f32 %v5203_v25, %v5033_v9  ;;  %v3982_v13 = vpop.f32.mrb[3].mxu0 }
 0x27b   : > { %v4145_v61 = vmul.f32 %v5235_v58, %v7245_v55  ;;  %v5237_v33 = vadd.f32 %v3982_v13, %v2676_v52 }
 0x27c   : > { %v4186_v51 = vadd.f32 %v7250_v23, %v4147_v35  ;;  %v4148_v34 = vmul.f32 %v5236_v43, %v7245_v55 }
 0x27d   : > { %v4184_v7 = vadd.f32 %v7250_v23, %v4145_v61  ;;  %v4146_v4 = vmul.f32 %v5237_v33, %v7245_v55 }
 0x27e   : > { %v4218_v31 = vmax.f32 %v4186_v51, 0.0  ;;  %v4187_v18 = vadd.f32 %v7250_v23, %v4148_v34 }
 0x27f   : > { %v4216_v19 = vmax.f32 %v4184_v7, 0.0  ;;  %v4185_v39 = vadd.f32 %v7250_v23, %v4146_v4  ;;  %v5206_v15 = vpop.f32.mrb[4].mxu0 }
 0x280   : > { %v4743_v10 = vpack.c.bf16 %v4218_v31, %v4218_v31  ;;  %v4219_v37 = vmax.f32 %v4187_v18, 0.0  ;;  %v5238_v16 = vadd.f32 %v5206_v15, %v5036_v8  ;;  %v3995_v54 = vpop.f32.mrb[5].mxu0 }
 0x281   : > { %v4741_v11 = vpack.c.bf16 %v4216_v19, %v4216_v19  ;;  %v4217_v48 = vmax.f32 %v4185_v39, 0.0  ;;  %v5239_v44 = vadd.f32 %v3995_v54, %v2689_v41  ;;  %v5207_v49 = vpop.f32.mrb[6].mxu0 }
 0x282   : > { %4378 = vst.msk [vmem:[%s7263_s6 + $0x8] sm:$0xf] %vm658_vm5, %v4743_v10  ;;  %v4744_v59 = vpack.c.bf16 %v4219_v37, %v4219_v37  ;;  %v4151_v12 = vmul.f32 %v5238_v16, %v7245_v55  ;;  %v5240_v30 = vadd.f32 %v5207_v49, %v5037_v17  ;;  %v3998_v21 = vpop.f32.mrb[7].mxu0 }
 0x283   : > { %4376 = vst.msk [vmem:[%s7263_s6] sm:$0xf] %vm658_vm5, %v4741_v11  ;;  %v4742_v53 = vpack.c.bf16 %v4217_v48, %v4217_v48  ;;  %v4149_v47 = vmul.f32 %v5239_v44, %v7245_v55  ;;  %v5241_v14 = vadd.f32 %v3998_v21, %v2692_v27 }
 0x284   : > { %4379 = vst.msk [vmem:[%s7263_s6 + $0xc] sm:$0xf] %vm658_vm5, %v4744_v59  ;;  %v4190_v29 = vadd.f32 %v7250_v23, %v4151_v12  ;;  %v4152_v42 = vmul.f32 %v5240_v30, %v7245_v55 }
 0x285   : > { %4377 = vst.msk [vmem:[%s7263_s6 + $0x4] sm:$0xf] %vm658_vm5, %v4742_v53  ;;  %v4188_v22 = vadd.f32 %v7250_v23, %v4149_v47  ;;  %v4150_v3 = vmul.f32 %v5241_v14, %v7245_v55 }
 0x286   : > { %v4222_v0 = vmax.f32 %v4190_v29, 0.0  ;;  %v4191_v46 = vadd.f32 %v7250_v23, %v4152_v42 }
 0x287   : > { %v4220_v24 = vmax.f32 %v4188_v22, 0.0  ;;  %v4189_v38 = vadd.f32 %v7250_v23, %v4150_v3  ;;  %v5210_v28 = vpop.f32.mrb[8].mxu0 }
 0x288   : > { %v4747_v40 = vpack.c.bf16 %v4222_v0, %v4222_v0  ;;  %v4223_v57 = vmax.f32 %v4191_v46, 0.0  ;;  %v5242_v45 = vadd.f32 %v5210_v28, %v5040_v60  ;;  %v4011_v50 = vpop.f32.mrb[9].mxu0 }
 0x289   : > { %v4745_v63 = vpack.c.bf16 %v4220_v24, %v4220_v24  ;;  %v4221_v9 = vmax.f32 %v4189_v38, 0.0  ;;  %v5243_v52 = vadd.f32 %v4011_v50, %v7228_v26  ;;  %v5211_v8 = vpop.f32.mrb[10].mxu0 }
 0x28a   : > { %4382 = vst.msk [vmem:[%s7263_s6 + $0x18] sm:$0xf] %vm658_vm5, %v4747_v40  ;;  %v4748_v41 = vpack.c.bf16 %v4223_v57, %v4223_v57  ;;  %v4155_v17 = vmul.f32 %v5242_v45, %v7245_v55  ;;  %v5244_v27 = vadd.f32 %v5211_v8, %v7230_v56  ;;  %v4014_v6 = vpop.f32.mrb[11].mxu0 }
 0x28b   : > { %4380 = vst.msk [vmem:[%s7263_s6 + $0x10] sm:$0xf] %vm658_vm5, %v4745_v63  ;;  %v4746_v2 = vpack.c.bf16 %v4221_v9, %v4221_v9  ;;  %v4153_v60 = vmul.f32 %v5243_v52, %v7245_v55  ;;  %v5245_v32 = vadd.f32 %v4014_v6, %v7232_v36 }
 0x28c   : > { %4383 = vst.msk [vmem:[%s7263_s6 + $0x1c] sm:$0xf] %vm658_vm5, %v4748_v41  ;;  %v4194_v26 = vadd.f32 %v7250_v23, %v4155_v17  ;;  %v4156_v58 = vmul.f32 %v5244_v27, %v7245_v55 }
 0x28d   : > { %4381 = vst.msk [vmem:[%s7263_s6 + $0x14] sm:$0xf] %vm658_vm5, %v4746_v2  ;;  %v4192_v25 = vadd.f32 %v7250_v23, %v4153_v60  ;;  %v4154_v56 = vmul.f32 %v5245_v32, %v7245_v55 }
 0x28e   : > { %v4226_v35 = vmax.f32 %v4194_v26, 0.0  ;;  %v4195_v43 = vadd.f32 %v7250_v23, %v4156_v58 }
 0x28f   : > { %v4224_v13 = vmax.f32 %v4192_v25, 0.0  ;;  %v4193_v61 = vadd.f32 %v7250_v23, %v4154_v56  ;;  %v5214_v36 = vpop.f32.mrb[12].mxu0  ;;  %v5082_v16 = vpop.f32.mrb[16].mxu1 }
 0x290   : > { %v4751_v33 = vpack.c.bf16 %v4226_v35, %v4226_v35  ;;  %v4227_v51 = vmax.f32 %v4195_v43, 0.0  ;;  %v5246_v34 = vadd.f32 %v5214_v36, %v7234_v1  ;;  %v4027_v7 = vpop.f32.mrb[13].mxu0  ;;  %v2940_v48 = vpop.f32.mrb[17].mxu1 }
 0x291   : > { %v4749_v4 = vpack.c.bf16 %v4224_v13, %v4224_v13  ;;  %v4225_v31 = vmax.f32 %v4193_v61, 0.0  ;;  %v5247_v18 = vadd.f32 %v4027_v7, %v7236_v20  ;;  %v5215_v19 = vpop.f32.mrb[14].mxu0  ;;  %v5083_v49 = vpop.f32.mrb[18].mxu1 }
 0x292   : > { %4386 = vst.msk [vmem:[%s7263_s6 + $0x28] sm:$0xf] %vm658_vm5, %v4751_v33  ;;  %v4752_v39 = vpack.c.bf16 %v4227_v51, %v4227_v51  ;;  %v4159_v15 = vmul.f32 %v5246_v34, %v7245_v55  ;;  %v5248_v10 = vadd.f32 %v5215_v19, %v7238_v5  ;;  %v4030_v37 = vpop.f32.mrb[15].mxu0  ;;  %v2943_v12 = vpop.f32.mrb[19].mxu1 }
 0x293   : > { %4384 = vst.msk [vmem:[%s7263_s6 + $0x20] sm:$0xf] %vm658_vm5, %v4749_v4  ;;  %v4750_v1 = vpack.c.bf16 %v4225_v31, %v4225_v31  ;;  %v4157_v54 = vmul.f32 %v5247_v18, %v7245_v55  ;;  %v5249_v11 = vadd.f32 %v4030_v37, %v7240_v62 }
 0x294   : > { %4387 = vst.msk [vmem:[%s7263_s6 + $0x2c] sm:$0xf] %vm658_vm5, %v4752_v39  ;;  %v4198_v20 = vadd.f32 %v7250_v23, %v4159_v15  ;;  %v4160_v44 = vmul.f32 %v5248_v10, %v7245_v55 }
 0x295   : > { %4385 = vst.msk [vmem:[%s7263_s6 + $0x24] sm:$0xf] %vm658_vm5, %v4750_v1  ;;  %v4196_v5 = vadd.f32 %v7250_v23, %v4157_v54  ;;  %v4158_v59 = vmul.f32 %v5249_v11, %v7245_v55 }
 0x296   : > { %v4230_v30 = vmax.f32 %v4198_v20, 0.0  ;;  %v4199_v21 = vadd.f32 %v7250_v23, %v4160_v44 }
 0x297   : > { %v4228_v62 = vmax.f32 %v4196_v5, 0.0  ;;  %v4197_v53 = vadd.f32 %v7250_v23, %v4158_v59  ;;  %v5218_v47 = vpop.f32.mrb[16].mxu0  ;;  %v5086_v45 = vpop.f32.mrb[20].mxu1 }
 0x298   : > { %v4755_v14 = vpack.c.bf16 %v4230_v30, %v4230_v30  ;;  %v4231_v29 = vmax.f32 %v4199_v21, 0.0  ;;  %v5250_v42 = vadd.f32 %v5218_v47, %v5082_v16  ;;  %v4043_v22 = vpop.f32.mrb[17].mxu0  ;;  %v2956_v52 = vpop.f32.mrb[21].mxu1 }
 0x299   : > { %v4753_v3 = vpack.c.bf16 %v4228_v62, %v4228_v62  ;;  %v4229_v0 = vmax.f32 %v4197_v53, 0.0  ;;  %v5251_v46 = vadd.f32 %v4043_v22, %v2940_v48  ;;  %v5219_v24 = vpop.f32.mrb[18].mxu0  ;;  %v5087_v17 = vpop.f32.mrb[22].mxu1 }
 0x29a   : > { %4390 = vst.msk [vmem:[%s7263_s6 + $0x38] sm:$0xf] %vm658_vm5, %v4755_v14  ;;  %v4756_v38 = vpack.c.bf16 %v4231_v29, %v4231_v29  ;;  %v4163_v28 = vmul.f32 %v5250_v42, %v7245_v55  ;;  %v5252_v40 = vadd.f32 %v5219_v24, %v5083_v49  ;;  %v4046_v57 = vpop.f32.mrb[19].mxu0  ;;  %v2959_v2 = vpop.f32.mrb[23].mxu1 }
 0x29b   : > { %4388 = vst.msk [vmem:[%s7263_s6 + $0x30] sm:$0xf] %vm658_vm5, %v4753_v3  ;;  %v4754_v50 = vpack.c.bf16 %v4229_v0, %v4229_v0  ;;  %v4161_v63 = vmul.f32 %v5251_v46, %v7245_v55  ;;  %v5253_v9 = vadd.f32 %v4046_v57, %v2943_v12 }
 0x29c   : > { %4391 = vst.msk [vmem:[%s7263_s6 + $0x3c] sm:$0xf] %vm658_vm5, %v4756_v38  ;;  %v4202_v8 = vadd.f32 %v7250_v23, %v4163_v28  ;;  %v4164_v41 = vmul.f32 %v5252_v40, %v7245_v55 }
 0x29d   : > { %4389 = vst.msk [vmem:[%s7263_s6 + $0x34] sm:$0xf] %vm658_vm5, %v4754_v50  ;;  %v4200_v27 = vadd.f32 %v7250_v23, %v4161_v63  ;;  %v4162_v6 = vmul.f32 %v5253_v9, %v7245_v55 }
 0x29e   : > { %v4234_v60 = vmax.f32 %v4202_v8, 0.0  ;;  %v4203_v32 = vadd.f32 %v7250_v23, %v4164_v41 }
 0x29f   : > { %v4232_v26 = vmax.f32 %v4200_v27, 0.0  ;;  %v4201_v58 = vadd.f32 %v7250_v23, %v4162_v6  ;;  %v5222_v25 = vpop.f32.mrb[20].mxu0  ;;  %v5090_v18 = vpop.f32.mrb[24].mxu1 }
 0x2a0   : > { %v4759_v56 = vpack.c.bf16 %v4234_v60, %v4234_v60  ;;  %v4235_v35 = vmax.f32 %v4203_v32, 0.0  ;;  %v5254_v43 = vadd.f32 %v5222_v25, %v5086_v45  ;;  %v4059_v13 = vpop.f32.mrb[21].mxu0  ;;  %v2972_v10 = vpop.f32.mrb[25].mxu1 }
 0x2a1   : > { %v4757_v61 = vpack.c.bf16 %v4232_v26, %v4232_v26  ;;  %v4233_v36 = vmax.f32 %v4201_v58, 0.0  ;;  %v5255_v33 = vadd.f32 %v4059_v13, %v2956_v52  ;;  %v5223_v51 = vpop.f32.mrb[22].mxu0  ;;  %v5091_v1 = vpop.f32.mrb[26].mxu1 }
 0x2a2   : > { %4394 = vst.msk [vmem:[%s7263_s6 + $0x48] sm:$0xf] %vm658_vm5, %v4759_v56  ;;  %v4760_v34 = vpack.c.bf16 %v4235_v35, %v4235_v35  ;;  %v4167_v7 = vmul.f32 %v5254_v43, %v7245_v55  ;;  %v5256_v4 = vadd.f32 %v5223_v51, %v5087_v17  ;;  %v4062_v31 = vpop.f32.mrb[23].mxu0  ;;  %v2975_v48 = vpop.f32.mrb[27].mxu1 }
 0x2a3   : > { %4392 = vst.msk [vmem:[%s7263_s6 + $0x40] sm:$0xf] %vm658_vm5, %v4757_v61  ;;  %v4758_v19 = vpack.c.bf16 %v4233_v36, %v4233_v36  ;;  %v4165_v39 = vmul.f32 %v5255_v33, %v7245_v55  ;;  %v5257_v15 = vadd.f32 %v4062_v31, %v2959_v2 }
 0x2a4   : > { %4395 = vst.msk [vmem:[%s7263_s6 + $0x4c] sm:$0xf] %vm658_vm5, %v4760_v34  ;;  %v4206_v37 = vadd.f32 %v7250_v23, %v4167_v7  ;;  %v4168_v16 = vmul.f32 %v5256_v4, %v7245_v55 }
 0x2a5   : > { %4393 = vst.msk [vmem:[%s7263_s6 + $0x44] sm:$0xf] %vm658_vm5, %v4758_v19  ;;  %v4204_v54 = vadd.f32 %v7250_v23, %v4165_v39  ;;  %v4166_v11 = vmul.f32 %v5257_v15, %v7245_v55 }
 0x2a6   : > { %v4238_v20 = vmax.f32 %v4206_v37, 0.0  ;;  %v4207_v44 = vadd.f32 %v7250_v23, %v4168_v16 }
 0x2a7   : > { %v4236_v49 = vmax.f32 %v4204_v54, 0.0  ;;  %v4205_v5 = vadd.f32 %v7250_v23, %v4166_v11  ;;  %v5226_v59 = vpop.f32.mrb[24].mxu0  ;;  %v5094_v46 = vpop.f32.mrb[28].mxu1 }
 0x2a8   : > { %v4763_v12 = vpack.c.bf16 %v4238_v20, %v4238_v20  ;;  %v4239_v30 = vmax.f32 %v4207_v44, 0.0  ;;  %v5258_v21 = vadd.f32 %v5226_v59, %v5090_v18  ;;  %v4075_v62 = vpop.f32.mrb[25].mxu0  ;;  %v2988_v40 = vpop.f32.mrb[29].mxu1 }
 0x2a9   : > { %v4761_v53 = vpack.c.bf16 %v4236_v49, %v4236_v49  ;;  %v4237_v47 = vmax.f32 %v4205_v5, 0.0  ;;  %v5259_v14 = vadd.f32 %v4075_v62, %v2972_v10  ;;  %v5227_v29 = vpop.f32.mrb[26].mxu0  ;;  %v5095_v50 = vpop.f32.mrb[30].mxu1 }
 0x2aa   : > { %4398 = vst.msk [vmem:[%s7263_s6 + $0x58] sm:$0xf] %vm658_vm5, %v4763_v12  ;;  %v4764_v42 = vpack.c.bf16 %v4239_v30, %v4239_v30  ;;  %v4171_v22 = vmul.f32 %v5258_v21, %v7245_v55  ;;  %v5260_v3 = vadd.f32 %v5227_v29, %v5091_v1  ;;  %v4078_v0 = vpop.f32.mrb[27].mxu0  ;;  %v2991_v52 = vpop.f32.mrb[31].mxu1 }
 0x2ab   : > { %4396 = vst.msk [vmem:[%s7263_s6 + $0x50] sm:$0xf] %vm658_vm5, %v4761_v53  ;;  %v4762_v24 = vpack.c.bf16 %v4237_v47, %v4237_v47  ;;  %v4169_v38 = vmul.f32 %v5259_v14, %v7245_v55  ;;  %v5261_v28 = vadd.f32 %v4078_v0, %v2975_v48 }
 0x2ac   : > { %4399 = vst.msk [vmem:[%s7263_s6 + $0x5c] sm:$0xf] %vm658_vm5, %v4764_v42  ;;  %v4210_v57 = vadd.f32 %v7250_v23, %v4171_v22  ;;  %v4172_v45 = vmul.f32 %v5260_v3, %v7245_v55 }
 0x2ad   : > { %4397 = vst.msk [vmem:[%s7263_s6 + $0x54] sm:$0xf] %vm658_vm5, %v4762_v24  ;;  %v4208_v63 = vadd.f32 %v7250_v23, %v4169_v38  ;;  %v4170_v9 = vmul.f32 %v5261_v28, %v7245_v55 }
 0x2ae   : > { %v4242_v8 = vmax.f32 %v4210_v57, 0.0  ;;  %v4211_v41 = vadd.f32 %v7250_v23, %v4172_v45 }
 0x2af   : > { %v4240_v17 = vmax.f32 %v4208_v63, 0.0  ;;  %v4209_v27 = vadd.f32 %v7250_v23, %v4170_v9  ;;  %v5230_v6 = vpop.f32.mrb[28].mxu0 }
 0x2b0   : > { %v4767_v2 = vpack.c.bf16 %v4242_v8, %v4242_v8  ;;  %v4243_v60 = vmax.f32 %v4211_v41, 0.0  ;;  %v5262_v32 = vadd.f32 %v5230_v6, %v5094_v46  ;;  %v4091_v26 = vpop.f32.mrb[29].mxu0 }
 0x2b1   : > { %v4765_v58 = vpack.c.bf16 %v4240_v17, %v4240_v17  ;;  %v4241_v25 = vmax.f32 %v4209_v27, 0.0  ;;  %v5263_v56 = vadd.f32 %v4091_v26, %v2988_v40  ;;  %v5231_v35 = vpop.f32.mrb[30].mxu0 }
 0x2b2   : > { %4402 = vst.msk [vmem:[%s7263_s6 + $0x68] sm:$0xf] %vm658_vm5, %v4767_v2  ;;  %v4768_v43 = vpack.c.bf16 %v4243_v60, %v4243_v60  ;;  %v4175_v13 = vmul.f32 %v5262_v32, %v7245_v55  ;;  %v5264_v61 = vadd.f32 %v5231_v35, %v5095_v50  ;;  %v4094_v36 = vpop.f32.mrb[31].mxu0 }
 0x2b3   : > { %4400 = vst.msk [vmem:[%s7263_s6 + $0x60] sm:$0xf] %vm658_vm5, %v4765_v58  ;;  %v4766_v33 = vpack.c.bf16 %v4241_v25, %v4241_v25  ;;  %v4173_v51 = vmul.f32 %v5263_v56, %v7245_v55  ;;  %v5265_v34 = vadd.f32 %v4094_v36, %v2991_v52 }
 0x2b4   : > { %4403 = vst.msk [vmem:[%s7263_s6 + $0x6c] sm:$0xf] %vm658_vm5, %v4768_v43  ;;  %v4214_v7 = vadd.f32 %v7250_v23, %v4175_v13  ;;  %v4176_v4 = vmul.f32 %v5264_v61, %v7245_v55 }
 0x2b5   : > { %4401 = vst.msk [vmem:[%s7263_s6 + $0x64] sm:$0xf] %vm658_vm5, %v4766_v33  ;;  %v4212_v31 = vadd.f32 %v7250_v23, %v4173_v51  ;;  %v4174_v18 = vmul.f32 %v5265_v34, %v7245_v55 }
 0x2b6   : > { %v4246_v19 = vmax.f32 %v4214_v7, 0.0  ;;  %v4215_v39 = vadd.f32 %v7250_v23, %v4176_v4 }
 0x2b7   : > { %v4244_v15 = vmax.f32 %v4212_v31, 0.0  ;;  %v4213_v10 = vadd.f32 %v7250_v23, %v4174_v18 }
 0x2b8   : > { %v4771_v37 = vpack.c.bf16 %v4246_v19, %v4246_v19  ;;  %v4247_v16 = vmax.f32 %v4215_v39, 0.0 }
 0x2b9   : > { %v4769_v1 = vpack.c.bf16 %v4244_v15, %v4244_v15  ;;  %v4245_v54 = vmax.f32 %v4213_v10, 0.0 }
 0x2ba   : > { %4406 = vst.msk [vmem:[%s7263_s6 + $0x78] sm:$0xf] %vm658_vm5, %v4771_v37  ;;  %v4772_v11 = vpack.c.bf16 %v4247_v16, %v4247_v16 }
 0x2bb   : > { %4404 = vst.msk [vmem:[%s7263_s6 + $0x70] sm:$0xf] %vm658_vm5, %v4769_v1  ;;  %v4770_v48 = vpack.c.bf16 %v4245_v54, %v4245_v54 }
 0x2bc   : > { %4407 = vst.msk [vmem:[%s7263_s6 + $0x7c] sm:$0xf] %vm658_vm5, %v4772_v11 }
 0x2bd   : > { %4405 = vst.msk [vmem:[%s7263_s6 + $0x74] sm:$0xf] %vm658_vm5, %v4770_v48 }
 0x2be PF: > { %s15_s18 = sadd.s32 1, %s5544_s18  }
 0x2bf   : > { %p12_p4 = scmp.ge.s32.totalorder %s15_s18, 4  }
 0x2c1   :  { %14 = sbr.rel (!%p12_p4) target bundleno = 1 (0x1), region = 74 }

</bundles_post_ra>
